<compile_context>
chip_gen: v5e
topology: v5e:2x2
jax: 0.10.0
libtpu: 0.0.40
codegen_flags: <defaults>
</compile_context>

<pallas_src>
import numpy as np

import jax
import jax.numpy as jnp
from jax.experimental import pallas as pl
from jax.experimental.pallas import tpu as pltpu


# --------------------------------------------------------------------------
# One-time parameter preparation (host side, runs once at init; batch-agnostic)
# --------------------------------------------------------------------------
def _bf16(a):
    return jnp.asarray(np.asarray(a, np.float32)).astype(jnp.bfloat16)


def _stripe_mat(w, cinp, coutp, w_in, w_conv):
    """Stacked (deep-K) stripe-GEMM matrix for a VALID conv on the slab layout.

    Activation slab: a[row, xs*cinp + ci].  Returns C of shape
    (k*w_in*cinp, w_conv*coutp) with
      C[di*w_in*cinp + xs*cinp + ci, x*coutp + co] = w[co, ci, di, xs - x]
    for 0 <= xs - x < k, so that
      conv_out[y, x*coutp+co] = concat_di(a[y+di, :]) @ C.
    """
    w = np.asarray(w, np.float32)
    cout, cin, k, _ = w.shape
    xs = np.arange(w_in)[:, None, None, None]
    ci = np.arange(cinp)[None, :, None, None]
    x = np.arange(w_conv)[None, None, :, None]
    co = np.arange(coutp)[None, None, None, :]
    dj = xs - x
    valid = (dj >= 0) & (dj < k) & (ci < cin) & (co < cout)
    djc = np.clip(dj, 0, k - 1)
    cic = np.minimum(ci, cin - 1)
    coc = np.minimum(co, cout - 1)
    mats = []
    for di in range(k):
        vals = np.where(valid, w[coc, cic, di, djc], 0.0)
        mats.append(vals.reshape(w_in * cinp, w_conv * coutp))
    return _bf16(np.concatenate(mats, axis=0))


def _bias_row(b, coutp, w_conv):
    b = np.asarray(b, np.float32)
    bp = np.zeros((coutp,), np.float32)
    bp[: b.shape[0]] = b
    return jnp.asarray(np.tile(bp, w_conv)[None, :])           # f32 (1, w_conv*coutp)


def _row_selectors(h_conv, h_out):
    """0/1 even/odd row selectors applied BEFORE the pool max (no wasted rows)."""
    dre = np.zeros((h_out, h_conv), np.float32)
    dro = np.zeros((h_out, h_conv), np.float32)
    for py in range(h_out):
        dre[py, 2 * py] = 1.0
        dro[py, 2 * py + 1] = 1.0
    return _bf16(dre), _bf16(dro)


def _col_selector(w_conv, cp):
    """0/1 column down-sample selector (keeps even conv columns after col max)."""
    w_out = w_conv // 2
    dc = np.zeros(((w_conv - 1) * cp, w_out * cp), np.float32)
    for px in range(w_out):
        dc[2 * px * cp: 2 * px * cp + cp, px * cp: px * cp + cp] = np.eye(cp)
    return _bf16(dc)


def prepare_params(params):
    """Pre-transpose / pad / bf16-cast all weights once. Batch-size independent."""
    p = {k: np.asarray(v, np.float32) for k, v in params.items()}
    out = {}
    # Deep-K stripe GEMM matrices (channels padded to 8 / 8 / 16 lanes per pixel).
    out["c1"] = _stripe_mat(p["conv1_w"], 1, 8, 48, 44)        # (240, 352) bf16
    out["c2"] = _stripe_mat(p["conv2_w"], 8, 8, 22, 20)        # (528, 160)
    out["c3"] = _stripe_mat(p["conv3_w"], 8, 16, 10, 8)        # (240, 128)
    out["b1r"] = _bias_row(p["conv1_b"], 8, 44)                # f32 (1, 352)
    out["b2r"] = _bias_row(p["conv2_b"], 8, 20)                # (1, 160)
    out["b3r"] = _bias_row(p["conv3_b"], 16, 8)                # (1, 128)
    # Per-sample pooling selectors (row selection happens before the max).
    out["dr1e"], out["dr1o"] = _row_selectors(44, 22)
    out["dr2e"], out["dr2o"] = _row_selectors(20, 10)
    out["dr3e"], out["dr3o"] = _row_selectors(8, 4)
    out["dc1"] = _col_selector(44, 8)                          # (344, 176)
    out["dc2"] = _col_selector(20, 8)                          # (152, 80)
    out["dc3"] = _col_selector(8, 16)                          # (112, 64)
    # fc1 as a single K=256 GEMM over the lane-repacked pooled slab:
    #   flat[py*64 + px*16 + c]  <->  torch flat index c*16 + py*4 + px.
    w1 = p["fc1_w"].reshape(120, 16, 4, 4).transpose(2, 3, 1, 0).reshape(256, 120)
    out["w1"] = _bf16(w1)
    out["b1f"] = jnp.asarray(p["fc1_b"][None, :])
    out["w2"] = _bf16(p["fc2_w"].T)                            # (120, 48)
    out["b2f"] = jnp.asarray(p["fc2_b"][None, :])
    w3 = np.zeros((48, 128), np.float32)                       # lane-pad fc3 to 128
    w3[:, :3] = p["fc3_w"].T
    out["w3"] = _bf16(w3)
    b3 = np.zeros((1, 128), np.float32)
    b3[0, :3] = p["fc3_b"]
    out["b3f"] = jnp.asarray(b3)
    return out


# --------------------------------------------------------------------------
# In-kernel building blocks (per-sample, VMEM-resident)
# --------------------------------------------------------------------------
def _conv_relu(a_f32, lhs_ref, c_ref, brow_ref):
    """VALID conv + bias + ReLU as ONE deep-K bf16 GEMM.

    The k row-shifted slabs are packed side-by-side along lanes into the f32
    VMEM scratch `lhs_ref`, then a single (gr, k*ws) @ (k*ws, n_out) bf16 dot
    accumulates in f32.
    """
    gr, kw = lhs_ref.shape
    ws = a_f32.shape[1]
    k = kw // ws
    for di in range(k):                                        # static unrolled packs
        lhs_ref[:, di * ws:(di + 1) * ws] = a_f32[di:di + gr, :]
    acc = jnp.dot(lhs_ref[...].astype(jnp.bfloat16), c_ref[...],
                  preferred_element_type=jnp.float32)
    return jnp.maximum(acc + brow_ref[...], 0.0)               # f32


def _pool(o_bf16, dre_ref, dro_ref, dc_ref, cp):
    """2x2/2 max-pool: even/odd row selection GEMMs, f32 maxes, column selector."""
    even = jnp.dot(dre_ref[...], o_bf16, preferred_element_type=jnp.float32)
    odd = jnp.dot(dro_ref[...], o_bf16, preferred_element_type=jnp.float32)
    rmax = jnp.maximum(even, odd)                              # only kept rows
    mcols = rmax.shape[1] - cp
    cmax = jnp.maximum(rmax[:, :mcols], rmax[:, cp:cp + mcols])
    return jnp.dot(cmax.astype(jnp.bfloat16), dc_ref[...],
                   preferred_element_type=jnp.float32)


# --------------------------------------------------------------------------
# Fused per-sample Pallas kernel (whole forward pass, grid over batch)
# --------------------------------------------------------------------------
def _net_kernel(x_ref,
                c1, c2, c3, b1r, b2r, b3r,
                dr1e, dr1o, dr2e, dr2o, dr3e, dr3o,
                dc1, dc2, dc3,
                w1, b1f, w2, b2f, w3, b3f,
                out_ref,
                o1_ref, lhs1_ref, lhs2_ref, lhs3_ref, fc_ref):
    f32, bf16 = jnp.float32, jnp.bfloat16

    a1 = x_ref[...]                                            # (48, 48) f32, one sample
    # conv1 (5x5, 1->6) + relu  -> (44, 44*8)
    o1 = _conv_relu(a1, lhs1_ref, c1, b1r)
    o1_ref[...] = o1.astype(bf16)           # VMEM scratch: bounds live range / spills
    # pool1 -> (22, 22*8)
    a2 = _pool(o1_ref[...], dr1e, dr1o, dc1, 8)
    # conv2 (3x3, 6->6) + relu -> (20, 20*8); pool2 -> (10, 10*8)
    o2 = _conv_relu(a2, lhs2_ref, c2, b2r)
    a3 = _pool(o2.astype(bf16), dr2e, dr2o, dc2, 8)
    # conv3 (3x3, 6->16) + relu -> (8, 8*16); pool3 -> (4, 4*16)
    o3 = _conv_relu(a3, lhs3_ref, c3, b3r)
    a4 = _pool(o3.astype(bf16), dr3e, dr3o, dc3, 16)           # (4, 64) f32

    # fc1: repack the 4 pooled rows into one (1, 256) lane vector -> single K=256 GEMM.
    for py in range(4):
        fc_ref[0:1, py * 64:(py + 1) * 64] = a4[py:py + 1, :]
    h = jnp.dot(fc_ref[0:1, :].astype(bf16), w1[...], preferred_element_type=f32)
    h = jnp.maximum(h + b1f[...], 0.0)                         # (1, 120)
    h = jnp.dot(h.astype(bf16), w2[...], preferred_element_type=f32)
    h = jnp.maximum(h + b2f[...], 0.0)                         # (1, 48)
    logits = jnp.dot(h.astype(bf16), w3[...], preferred_element_type=f32) + b3f[...]
    out_ref[...] = jnp.broadcast_to(logits, (8, 128))          # lane-dense full-tile store


_WEIGHT_NAMES = ["c1", "c2", "c3", "b1r", "b2r", "b3r",
                 "dr1e", "dr1o", "dr2e", "dr2o", "dr3e", "dr3o",
                 "dc1", "dc2", "dc3",
                 "w1", "b1f", "w2", "b2f", "w3", "b3f"]


def net_forward(prepped, x):
    """x: (N, 1, 48, 48) f32 -> logits (N, 3)."""
    n = x.shape[0]
    assert x.shape[1:] == (1, 48, 48), x.shape
    xs = x.reshape(n, 48, 48).astype(jnp.float32)
    weights = [prepped[k] for k in _WEIGHT_NAMES]

    in_specs = [pl.BlockSpec((None, 48, 48), lambda i: (i, 0, 0))]
    # Weights: full-array blocks with constant index maps -> fetched once,
    # VMEM-resident across the whole (parallel) batch grid.
    in_specs += [pl.BlockSpec(w.shape, lambda i: (0, 0)) for w in weights]

    grid_spec = pltpu.PrefetchScalarGridSpec(
        num_scalar_prefetch=0,
        grid=(n,),
        in_specs=in_specs,
        out_specs=pl.BlockSpec((None, 8, 128), lambda i: (i, 0, 0)),
        scratch_shapes=[
            pltpu.VMEM((44, 352), jnp.bfloat16),   # conv1 output
            pltpu.VMEM((44, 240), jnp.float32),    # conv1 deep-K LHS pack
            pltpu.VMEM((20, 528), jnp.float32),    # conv2 deep-K LHS pack
            pltpu.VMEM((8, 240), jnp.float32),     # conv3 deep-K LHS pack
            pltpu.VMEM((8, 256), jnp.float32),     # fc1 lane-repack buffer
        ],
    )
    out = pl.pallas_call(
        _net_kernel,
        out_shape=jax.ShapeDtypeStruct((n, 8, 128), jnp.float32),
        grid_spec=grid_spec,
        compiler_params=pltpu.CompilerParams(
            dimension_semantics=("parallel",)),    # batch split across TCs on v7x
        cost_estimate=pl.CostEstimate(flops=30_000_000, transcendentals=0,
                                      bytes_accessed=900_000),
    )(xs, *weights)
    return out[:, 0, :3]


# --------------------------------------------------------------------------
# Parameters (deterministic init, PyTorch shapes / semantics)
# --------------------------------------------------------------------------
def init_params(key):
    ks = jax.random.split(key, 12)
    f32 = jnp.float32

    def w(k, shape, fan_in):
        bound = 1.0 / jnp.sqrt(jnp.array(fan_in, f32))
        return jax.random.uniform(k, shape, f32, -bound, bound)

    return {
        "conv1_w": w(ks[0], (6, 1, 5, 5), 1 * 5 * 5),
        "conv1_b": w(ks[1], (6,), 1 * 5 * 5),
        "conv2_w": w(ks[2], (6, 6, 3, 3), 6 * 3 * 3),
        "conv2_b": w(ks[3], (6,), 6 * 3 * 3),
        "conv3_w": w(ks[4], (16, 6, 3, 3), 6 * 3 * 3),
        "conv3_b": w(ks[5], (16,), 6 * 3 * 3),
        "fc1_w": w(ks[6], (120, 16 * 4 * 4), 16 * 4 * 4),
        "fc1_b": w(ks[7], (120,), 16 * 4 * 4),
        "fc2_w": w(ks[8], (48, 120), 120),
        "fc2_b": w(ks[9], (48,), 120),
        "fc3_w": w(ks[10], (3, 48), 48),
        "fc3_b": w(ks[11], (3,), 48),
    }


# --------------------------------------------------------------------------
# Pure-JAX f32 reference (PyTorch-faithful) for the in-script correctness check
# --------------------------------------------------------------------------
def reference_forward(params, x):
    def conv(h, w, b):
        y = jax.lax.conv_general_dilated(
            h, w, window_strides=(1, 1), padding="VALID",
            dimension_numbers=("NCHW", "OIHW", "NCHW"))
        return jax.nn.relu(y + b[None, :, None, None])

    def pool(h):
        return jax.lax.reduce_window(h, -jnp.inf, jax.lax.max,
                                     (1, 1, 2, 2), (1, 1, 2, 2), "VALID")

    h = pool(conv(x, params["conv1_w"], params["conv1_b"]))
    h = pool(conv(h, params["conv2_w"], params["conv2_b"]))
    h = pool(conv(h, params["conv3_w"], params["conv3_b"]))
    h = h.reshape(h.shape[0], -1)
    h = jax.nn.relu(h @ params["fc1_w"].T + params["fc1_b"])
    h = jax.nn.relu(h @ params["fc2_w"].T + params["fc2_b"])
    return h @ params["fc3_w"].T + params["fc3_b"]


if __name__ == "__main__":
    key = jax.random.PRNGKey(0)
    pkey, xkey = jax.random.split(key)
    params = init_params(pkey)
    prepped = prepare_params(params)
    # Batch=2, 1 channel, 48x48 (spatial size implied by fc1's 16*4*4 input).
    x = jax.random.normal(xkey, (2, 1, 48, 48), dtype=jnp.float32)

    out = jax.jit(net_forward)(prepped, x)
    out = jax.block_until_ready(out)
    assert out.shape == (2, 3), out.shape

    ref = reference_forward(params, x)
    # Tolerance sized for bf16 matmul operands (f32 accumulation) vs f32 reference.
    rel = float(jnp.max(jnp.abs(out - ref)) / (jnp.max(jnp.abs(ref)) + 1e-6))
    assert rel < 5e-2, f"mismatch vs reference, rel err {rel}"

    print("KERNEL_OK")
</pallas_src>

<mosaic_0001>
module attributes {stable_mosaic.version = 11 : i64} {
  func.func @_net_kernel(%arg0: i32, %arg1: memref<1x48x48xf32, #tpu.memory_space<vmem>>, %arg2: memref<240x352xbf16, #tpu.memory_space<vmem>>, %arg3: memref<528x160xbf16, #tpu.memory_space<vmem>>, %arg4: memref<240x128xbf16, #tpu.memory_space<vmem>>, %arg5: memref<1x352xf32, #tpu.memory_space<vmem>>, %arg6: memref<1x160xf32, #tpu.memory_space<vmem>>, %arg7: memref<1x128xf32, #tpu.memory_space<vmem>>, %arg8: memref<22x44xbf16, #tpu.memory_space<vmem>>, %arg9: memref<22x44xbf16, #tpu.memory_space<vmem>>, %arg10: memref<10x20xbf16, #tpu.memory_space<vmem>>, %arg11: memref<10x20xbf16, #tpu.memory_space<vmem>>, %arg12: memref<4x8xbf16, #tpu.memory_space<vmem>>, %arg13: memref<4x8xbf16, #tpu.memory_space<vmem>>, %arg14: memref<344x176xbf16, #tpu.memory_space<vmem>>, %arg15: memref<152x80xbf16, #tpu.memory_space<vmem>>, %arg16: memref<112x64xbf16, #tpu.memory_space<vmem>>, %arg17: memref<256x120xbf16, #tpu.memory_space<vmem>>, %arg18: memref<1x120xf32, #tpu.memory_space<vmem>>, %arg19: memref<120x48xbf16, #tpu.memory_space<vmem>>, %arg20: memref<1x48xf32, #tpu.memory_space<vmem>>, %arg21: memref<48x128xbf16, #tpu.memory_space<vmem>>, %arg22: memref<1x128xf32, #tpu.memory_space<vmem>>, %arg23: memref<1x8x128xf32, #tpu.memory_space<vmem>>, %arg24: memref<44x352xbf16, #tpu.memory_space<vmem>>, %arg25: memref<44x240xf32, #tpu.memory_space<vmem>>, %arg26: memref<20x528xf32, #tpu.memory_space<vmem>>, %arg27: memref<8x240xf32, #tpu.memory_space<vmem>>, %arg28: memref<8x256xf32, #tpu.memory_space<vmem>>) attributes {dimension_semantics = [#tpu.dimension_semantics<parallel>], iteration_bounds = array<i64: 2>, scalar_prefetch = 0 : i64, scratch_operands = 5 : i64, tpu.core_type = #tpu.core_type<tc>, window_params = [{transform_indices = @transform_0, window_bounds = array<i64: 1, 48, 48>}, {pipeline_mode = #tpu.pipeline_mode<synchronous>, transform_indices = @transform_1, window_bounds = array<i64: 240, 352>}, {pipeline_mode = #tpu.pipeline_mode<synchronous>, transform_indices = @transform_2, window_bounds = array<i64: 528, 160>}, {pipeline_mode = #tpu.pipeline_mode<synchronous>, transform_indices = @transform_3, window_bounds = array<i64: 240, 128>}, {pipeline_mode = #tpu.pipeline_mode<synchronous>, transform_indices = @transform_4, window_bounds = array<i64: 1, 352>}, {pipeline_mode = #tpu.pipeline_mode<synchronous>, transform_indices = @transform_5, window_bounds = array<i64: 1, 160>}, {pipeline_mode = #tpu.pipeline_mode<synchronous>, transform_indices = @transform_6, window_bounds = array<i64: 1, 128>}, {pipeline_mode = #tpu.pipeline_mode<synchronous>, transform_indices = @transform_7, window_bounds = array<i64: 22, 44>}, {pipeline_mode = #tpu.pipeline_mode<synchronous>, transform_indices = @transform_8, window_bounds = array<i64: 22, 44>}, {pipeline_mode = #tpu.pipeline_mode<synchronous>, transform_indices = @transform_9, window_bounds = array<i64: 10, 20>}, {pipeline_mode = #tpu.pipeline_mode<synchronous>, transform_indices = @transform_10, window_bounds = array<i64: 10, 20>}, {pipeline_mode = #tpu.pipeline_mode<synchronous>, transform_indices = @transform_11, window_bounds = array<i64: 4, 8>}, {pipeline_mode = #tpu.pipeline_mode<synchronous>, transform_indices = @transform_12, window_bounds = array<i64: 4, 8>}, {pipeline_mode = #tpu.pipeline_mode<synchronous>, transform_indices = @transform_13, window_bounds = array<i64: 344, 176>}, {pipeline_mode = #tpu.pipeline_mode<synchronous>, transform_indices = @transform_14, window_bounds = array<i64: 152, 80>}, {pipeline_mode = #tpu.pipeline_mode<synchronous>, transform_indices = @transform_15, window_bounds = array<i64: 112, 64>}, {pipeline_mode = #tpu.pipeline_mode<synchronous>, transform_indices = @transform_16, window_bounds = array<i64: 256, 120>}, {pipeline_mode = #tpu.pipeline_mode<synchronous>, transform_indices = @transform_17, window_bounds = array<i64: 1, 120>}, {pipeline_mode = #tpu.pipeline_mode<synchronous>, transform_indices = @transform_18, window_bounds = array<i64: 120, 48>}, {pipeline_mode = #tpu.pipeline_mode<synchronous>, transform_indices = @transform_19, window_bounds = array<i64: 1, 48>}, {pipeline_mode = #tpu.pipeline_mode<synchronous>, transform_indices = @transform_20, window_bounds = array<i64: 48, 128>}, {pipeline_mode = #tpu.pipeline_mode<synchronous>, transform_indices = @transform_21, window_bounds = array<i64: 1, 128>}, {transform_indices = @transform_22, window_bounds = array<i64: 1, 8, 128>}]} {
    %c0 = arith.constant 0 : index
    %c0_0 = arith.constant 0 : index
    %c0_1 = arith.constant 0 : index
    %0 = vector.load %arg1[%c0, %c0_0, %c0_1] : memref<1x48x48xf32, #tpu.memory_space<vmem>>, vector<1x48x48xf32>
    %1 = vector.shape_cast %0 : vector<1x48x48xf32> to vector<48x48xf32>
    %2 = vector.extract_strided_slice %1 {offsets = [0, 0], sizes = [44, 48], strides = [1, 1]} : vector<48x48xf32> to vector<44x48xf32>
    %c0_2 = arith.constant 0 : index
    %c0_3 = arith.constant 0 : index
    %3 = vector.load %arg25[%c0_2, %c0_3] : memref<44x240xf32, #tpu.memory_space<vmem>>, vector<44x48xf32>
    tpu.vector_store %arg25[%c0_2, %c0_3], %2 {strides = array<i32>} : memref<44x240xf32, #tpu.memory_space<vmem>>, vector<44x48xf32>,
    %4 = vector.extract_strided_slice %1 {offsets = [1, 0], sizes = [44, 48], strides = [1, 1]} : vector<48x48xf32> to vector<44x48xf32>
    %c0_4 = arith.constant 0 : index
    %c48 = arith.constant 48 : index
    %5 = vector.load %arg25[%c0_4, %c48] : memref<44x240xf32, #tpu.memory_space<vmem>>, vector<44x48xf32>
    tpu.vector_store %arg25[%c0_4, %c48], %4 {strides = array<i32>} : memref<44x240xf32, #tpu.memory_space<vmem>>, vector<44x48xf32>,
    %6 = vector.extract_strided_slice %1 {offsets = [2, 0], sizes = [44, 48], strides = [1, 1]} : vector<48x48xf32> to vector<44x48xf32>
    %c0_5 = arith.constant 0 : index
    %c96 = arith.constant 96 : index
    %7 = vector.load %arg25[%c0_5, %c96] : memref<44x240xf32, #tpu.memory_space<vmem>>, vector<44x48xf32>
    tpu.vector_store %arg25[%c0_5, %c96], %6 {strides = array<i32>} : memref<44x240xf32, #tpu.memory_space<vmem>>, vector<44x48xf32>,
    %8 = vector.extract_strided_slice %1 {offsets = [3, 0], sizes = [44, 48], strides = [1, 1]} : vector<48x48xf32> to vector<44x48xf32>
    %c0_6 = arith.constant 0 : index
    %c144 = arith.constant 144 : index
    %9 = vector.load %arg25[%c0_6, %c144] : memref<44x240xf32, #tpu.memory_space<vmem>>, vector<44x48xf32>
    tpu.vector_store %arg25[%c0_6, %c144], %8 {strides = array<i32>} : memref<44x240xf32, #tpu.memory_space<vmem>>, vector<44x48xf32>,
    %10 = vector.extract_strided_slice %1 {offsets = [4, 0], sizes = [44, 48], strides = [1, 1]} : vector<48x48xf32> to vector<44x48xf32>
    %c0_7 = arith.constant 0 : index
    %c192 = arith.constant 192 : index
    %11 = vector.load %arg25[%c0_7, %c192] : memref<44x240xf32, #tpu.memory_space<vmem>>, vector<44x48xf32>
    tpu.vector_store %arg25[%c0_7, %c192], %10 {strides = array<i32>} : memref<44x240xf32, #tpu.memory_space<vmem>>, vector<44x48xf32>,
    %c0_8 = arith.constant 0 : index
    %c0_9 = arith.constant 0 : index
    %12 = vector.load %arg25[%c0_8, %c0_9] : memref<44x240xf32, #tpu.memory_space<vmem>>, vector<44x240xf32>
    %13 = arith.truncf %12 : vector<44x240xf32> to vector<44x240xbf16>
    %c0_10 = arith.constant 0 : index
    %c0_11 = arith.constant 0 : index
    %14 = vector.load %arg2[%c0_10, %c0_11] : memref<240x352xbf16, #tpu.memory_space<vmem>>, vector<240x352xbf16>
    %cst = arith.constant dense<0.000000e+00> : vector<44x352xf32>
    %15 = tpu.matmul %13, %14, %cst {dimension_numbers = #tpu.dot_dimension_numbers<[1], [0], [0], [1], [0, 0, 1, 1], [], []>} : vector<44x240xbf16>, vector<240x352xbf16>, vector<44x352xf32> -> vector<44x352xf32>
    %c0_12 = arith.constant 0 : index
    %c0_13 = arith.constant 0 : index
    %16 = vector.load %arg5[%c0_12, %c0_13] : memref<1x352xf32, #tpu.memory_space<vmem>>, vector<1x352xf32>
    %17 = vector.broadcast %16 : vector<1x352xf32> to vector<44x352xf32>
    %18 = arith.addf %15, %17 : vector<44x352xf32>
    %cst_14 = arith.constant 0.000000e+00 : f32
    %19 = vector.broadcast %cst_14 : f32 to vector<44x352xf32>
    %20 = arith.maximumf %18, %19 : vector<44x352xf32>
    %21 = arith.truncf %20 : vector<44x352xf32> to vector<44x352xbf16>
    %c0_15 = arith.constant 0 : index
    %c0_16 = arith.constant 0 : index
    %22 = vector.load %arg24[%c0_15, %c0_16] : memref<44x352xbf16, #tpu.memory_space<vmem>>, vector<44x352xbf16>
    tpu.vector_store %arg24[%c0_15, %c0_16], %21 {strides = array<i32>} : memref<44x352xbf16, #tpu.memory_space<vmem>>, vector<44x352xbf16>,
    %c0_17 = arith.constant 0 : index
    %c0_18 = arith.constant 0 : index
    %23 = vector.load %arg24[%c0_17, %c0_18] : memref<44x352xbf16, #tpu.memory_space<vmem>>, vector<44x352xbf16>
    %c0_19 = arith.constant 0 : index
    %c0_20 = arith.constant 0 : index
    %24 = vector.load %arg8[%c0_19, %c0_20] : memref<22x44xbf16, #tpu.memory_space<vmem>>, vector<22x44xbf16>
    %cst_21 = arith.constant dense<0.000000e+00> : vector<22x352xf32>
    %25 = tpu.matmul %24, %23, %cst_21 {dimension_numbers = #tpu.dot_dimension_numbers<[1], [0], [0], [1], [0, 0, 1, 1], [], []>} : vector<22x44xbf16>, vector<44x352xbf16>, vector<22x352xf32> -> vector<22x352xf32>
    %c0_22 = arith.constant 0 : index
    %c0_23 = arith.constant 0 : index
    %26 = vector.load %arg9[%c0_22, %c0_23] : memref<22x44xbf16, #tpu.memory_space<vmem>>, vector<22x44xbf16>
    %cst_24 = arith.constant dense<0.000000e+00> : vector<22x352xf32>
    %27 = tpu.matmul %26, %23, %cst_24 {dimension_numbers = #tpu.dot_dimension_numbers<[1], [0], [0], [1], [0, 0, 1, 1], [], []>} : vector<22x44xbf16>, vector<44x352xbf16>, vector<22x352xf32> -> vector<22x352xf32>
    %28 = arith.maximumf %25, %27 : vector<22x352xf32>
    %29 = vector.extract_strided_slice %28 {offsets = [0, 0], sizes = [22, 344], strides = [1, 1]} : vector<22x352xf32> to vector<22x344xf32>
    %30 = vector.extract_strided_slice %28 {offsets = [0, 8], sizes = [22, 344], strides = [1, 1]} : vector<22x352xf32> to vector<22x344xf32>
    %31 = arith.maximumf %29, %30 : vector<22x344xf32>
    %32 = arith.truncf %31 : vector<22x344xf32> to vector<22x344xbf16>
    %c0_25 = arith.constant 0 : index
    %c0_26 = arith.constant 0 : index
    %33 = vector.load %arg14[%c0_25, %c0_26] : memref<344x176xbf16, #tpu.memory_space<vmem>>, vector<344x176xbf16>
    %cst_27 = arith.constant dense<0.000000e+00> : vector<22x176xf32>
    %34 = tpu.matmul %32, %33, %cst_27 {dimension_numbers = #tpu.dot_dimension_numbers<[1], [0], [0], [1], [0, 0, 1, 1], [], []>} : vector<22x344xbf16>, vector<344x176xbf16>, vector<22x176xf32> -> vector<22x176xf32>
    %35 = vector.extract_strided_slice %34 {offsets = [0, 0], sizes = [20, 176], strides = [1, 1]} : vector<22x176xf32> to vector<20x176xf32>
    %c0_28 = arith.constant 0 : index
    %c0_29 = arith.constant 0 : index
    %36 = vector.load %arg26[%c0_28, %c0_29] : memref<20x528xf32, #tpu.memory_space<vmem>>, vector<20x176xf32>
    tpu.vector_store %arg26[%c0_28, %c0_29], %35 {strides = array<i32>} : memref<20x528xf32, #tpu.memory_space<vmem>>, vector<20x176xf32>,
    %37 = vector.extract_strided_slice %34 {offsets = [1, 0], sizes = [20, 176], strides = [1, 1]} : vector<22x176xf32> to vector<20x176xf32>
    %c0_30 = arith.constant 0 : index
    %c176 = arith.constant 176 : index
    %38 = vector.load %arg26[%c0_30, %c176] : memref<20x528xf32, #tpu.memory_space<vmem>>, vector<20x176xf32>
    tpu.vector_store %arg26[%c0_30, %c176], %37 {strides = array<i32>} : memref<20x528xf32, #tpu.memory_space<vmem>>, vector<20x176xf32>,
    %39 = vector.extract_strided_slice %34 {offsets = [2, 0], sizes = [20, 176], strides = [1, 1]} : vector<22x176xf32> to vector<20x176xf32>
    %c0_31 = arith.constant 0 : index
    %c352 = arith.constant 352 : index
    %40 = vector.load %arg26[%c0_31, %c352] : memref<20x528xf32, #tpu.memory_space<vmem>>, vector<20x176xf32>
    tpu.vector_store %arg26[%c0_31, %c352], %39 {strides = array<i32>} : memref<20x528xf32, #tpu.memory_space<vmem>>, vector<20x176xf32>,
    %c0_32 = arith.constant 0 : index
    %c0_33 = arith.constant 0 : index
    %41 = vector.load %arg26[%c0_32, %c0_33] : memref<20x528xf32, #tpu.memory_space<vmem>>, vector<20x528xf32>
    %42 = arith.truncf %41 : vector<20x528xf32> to vector<20x528xbf16>
    %c0_34 = arith.constant 0 : index
    %c0_35 = arith.constant 0 : index
    %43 = vector.load %arg3[%c0_34, %c0_35] : memref<528x160xbf16, #tpu.memory_space<vmem>>, vector<528x160xbf16>
    %cst_36 = arith.constant dense<0.000000e+00> : vector<20x160xf32>
    %44 = tpu.matmul %42, %43, %cst_36 {dimension_numbers = #tpu.dot_dimension_numbers<[1], [0], [0], [1], [0, 0, 1, 1], [], []>} : vector<20x528xbf16>, vector<528x160xbf16>, vector<20x160xf32> -> vector<20x160xf32>
    %c0_37 = arith.constant 0 : index
    %c0_38 = arith.constant 0 : index
    %45 = vector.load %arg6[%c0_37, %c0_38] : memref<1x160xf32, #tpu.memory_space<vmem>>, vector<1x160xf32>
    %46 = vector.broadcast %45 : vector<1x160xf32> to vector<20x160xf32>
    %47 = arith.addf %44, %46 : vector<20x160xf32>
    %cst_39 = arith.constant 0.000000e+00 : f32
    %48 = vector.broadcast %cst_39 : f32 to vector<20x160xf32>
    %49 = arith.maximumf %47, %48 : vector<20x160xf32>
    %50 = arith.truncf %49 : vector<20x160xf32> to vector<20x160xbf16>
    %c0_40 = arith.constant 0 : index
    %c0_41 = arith.constant 0 : index
    %51 = vector.load %arg10[%c0_40, %c0_41] : memref<10x20xbf16, #tpu.memory_space<vmem>>, vector<10x20xbf16>
    %cst_42 = arith.constant dense<0.000000e+00> : vector<10x160xf32>
    %52 = tpu.matmul %51, %50, %cst_42 {dimension_numbers = #tpu.dot_dimension_numbers<[1], [0], [0], [1], [0, 0, 1, 1], [], []>} : vector<10x20xbf16>, vector<20x160xbf16>, vector<10x160xf32> -> vector<10x160xf32>
    %c0_43 = arith.constant 0 : index
    %c0_44 = arith.constant 0 : index
    %53 = vector.load %arg11[%c0_43, %c0_44] : memref<10x20xbf16, #tpu.memory_space<vmem>>, vector<10x20xbf16>
    %cst_45 = arith.constant dense<0.000000e+00> : vector<10x160xf32>
    %54 = tpu.matmul %53, %50, %cst_45 {dimension_numbers = #tpu.dot_dimension_numbers<[1], [0], [0], [1], [0, 0, 1, 1], [], []>} : vector<10x20xbf16>, vector<20x160xbf16>, vector<10x160xf32> -> vector<10x160xf32>
    %55 = arith.maximumf %52, %54 : vector<10x160xf32>
    %56 = vector.extract_strided_slice %55 {offsets = [0, 0], sizes = [10, 152], strides = [1, 1]} : vector<10x160xf32> to vector<10x152xf32>
    %57 = vector.extract_strided_slice %55 {offsets = [0, 8], sizes = [10, 152], strides = [1, 1]} : vector<10x160xf32> to vector<10x152xf32>
    %58 = arith.maximumf %56, %57 : vector<10x152xf32>
    %59 = arith.truncf %58 : vector<10x152xf32> to vector<10x152xbf16>
    %c0_46 = arith.constant 0 : index
    %c0_47 = arith.constant 0 : index
    %60 = vector.load %arg15[%c0_46, %c0_47] : memref<152x80xbf16, #tpu.memory_space<vmem>>, vector<152x80xbf16>
    %cst_48 = arith.constant dense<0.000000e+00> : vector<10x80xf32>
    %61 = tpu.matmul %59, %60, %cst_48 {dimension_numbers = #tpu.dot_dimension_numbers<[1], [0], [0], [1], [0, 0, 1, 1], [], []>} : vector<10x152xbf16>, vector<152x80xbf16>, vector<10x80xf32> -> vector<10x80xf32>
    %62 = vector.extract_strided_slice %61 {offsets = [0, 0], sizes = [8, 80], strides = [1, 1]} : vector<10x80xf32> to vector<8x80xf32>
    %c0_49 = arith.constant 0 : index
    %c0_50 = arith.constant 0 : index
    %63 = vector.load %arg27[%c0_49, %c0_50] : memref<8x240xf32, #tpu.memory_space<vmem>>, vector<8x80xf32>
    tpu.vector_store %arg27[%c0_49, %c0_50], %62 {strides = array<i32>} : memref<8x240xf32, #tpu.memory_space<vmem>>, vector<8x80xf32>,
    %64 = vector.extract_strided_slice %61 {offsets = [1, 0], sizes = [8, 80], strides = [1, 1]} : vector<10x80xf32> to vector<8x80xf32>
    %c0_51 = arith.constant 0 : index
    %c80 = arith.constant 80 : index
    %65 = vector.load %arg27[%c0_51, %c80] : memref<8x240xf32, #tpu.memory_space<vmem>>, vector<8x80xf32>
    tpu.vector_store %arg27[%c0_51, %c80], %64 {strides = array<i32>} : memref<8x240xf32, #tpu.memory_space<vmem>>, vector<8x80xf32>,
    %66 = vector.extract_strided_slice %61 {offsets = [2, 0], sizes = [8, 80], strides = [1, 1]} : vector<10x80xf32> to vector<8x80xf32>
    %c0_52 = arith.constant 0 : index
    %c160 = arith.constant 160 : index
    %67 = vector.load %arg27[%c0_52, %c160] : memref<8x240xf32, #tpu.memory_space<vmem>>, vector<8x80xf32>
    tpu.vector_store %arg27[%c0_52, %c160], %66 {strides = array<i32>} : memref<8x240xf32, #tpu.memory_space<vmem>>, vector<8x80xf32>,
    %c0_53 = arith.constant 0 : index
    %c0_54 = arith.constant 0 : index
    %68 = vector.load %arg27[%c0_53, %c0_54] : memref<8x240xf32, #tpu.memory_space<vmem>>, vector<8x240xf32>
    %69 = arith.truncf %68 : vector<8x240xf32> to vector<8x240xbf16>
    %c0_55 = arith.constant 0 : index
    %c0_56 = arith.constant 0 : index
    %70 = vector.load %arg4[%c0_55, %c0_56] : memref<240x128xbf16, #tpu.memory_space<vmem>>, vector<240x128xbf16>
    %cst_57 = arith.constant dense<0.000000e+00> : vector<8x128xf32>
    %71 = tpu.matmul %69, %70, %cst_57 {dimension_numbers = #tpu.dot_dimension_numbers<[1], [0], [0], [1], [0, 0, 1, 1], [], []>} : vector<8x240xbf16>, vector<240x128xbf16>, vector<8x128xf32> -> vector<8x128xf32>
    %c0_58 = arith.constant 0 : index
    %c0_59 = arith.constant 0 : index
    %72 = vector.load %arg7[%c0_58, %c0_59] : memref<1x128xf32, #tpu.memory_space<vmem>>, vector<1x128xf32>
    %73 = vector.broadcast %72 : vector<1x128xf32> to vector<8x128xf32>
    %74 = arith.addf %71, %73 : vector<8x128xf32>
    %cst_60 = arith.constant 0.000000e+00 : f32
    %75 = vector.broadcast %cst_60 : f32 to vector<8x128xf32>
    %76 = arith.maximumf %74, %75 : vector<8x128xf32>
    %77 = arith.truncf %76 : vector<8x128xf32> to vector<8x128xbf16>
    %c0_61 = arith.constant 0 : index
    %c0_62 = arith.constant 0 : index
    %78 = vector.load %arg12[%c0_61, %c0_62] : memref<4x8xbf16, #tpu.memory_space<vmem>>, vector<4x8xbf16>
    %cst_63 = arith.constant dense<0.000000e+00> : vector<4x128xf32>
    %79 = tpu.matmul %78, %77, %cst_63 {dimension_numbers = #tpu.dot_dimension_numbers<[1], [0], [0], [1], [0, 0, 1, 1], [], []>} : vector<4x8xbf16>, vector<8x128xbf16>, vector<4x128xf32> -> vector<4x128xf32>
    %c0_64 = arith.constant 0 : index
    %c0_65 = arith.constant 0 : index
    %80 = vector.load %arg13[%c0_64, %c0_65] : memref<4x8xbf16, #tpu.memory_space<vmem>>, vector<4x8xbf16>
    %cst_66 = arith.constant dense<0.000000e+00> : vector<4x128xf32>
    %81 = tpu.matmul %80, %77, %cst_66 {dimension_numbers = #tpu.dot_dimension_numbers<[1], [0], [0], [1], [0, 0, 1, 1], [], []>} : vector<4x8xbf16>, vector<8x128xbf16>, vector<4x128xf32> -> vector<4x128xf32>
    %82 = arith.maximumf %79, %81 : vector<4x128xf32>
    %83 = vector.extract_strided_slice %82 {offsets = [0, 0], sizes = [4, 112], strides = [1, 1]} : vector<4x128xf32> to vector<4x112xf32>
    %84 = vector.extract_strided_slice %82 {offsets = [0, 16], sizes = [4, 112], strides = [1, 1]} : vector<4x128xf32> to vector<4x112xf32>
    %85 = arith.maximumf %83, %84 : vector<4x112xf32>
    %86 = arith.truncf %85 : vector<4x112xf32> to vector<4x112xbf16>
    %c0_67 = arith.constant 0 : index
    %c0_68 = arith.constant 0 : index
    %87 = vector.load %arg16[%c0_67, %c0_68] : memref<112x64xbf16, #tpu.memory_space<vmem>>, vector<112x64xbf16>
    %cst_69 = arith.constant dense<0.000000e+00> : vector<4x64xf32>
    %88 = tpu.matmul %86, %87, %cst_69 {dimension_numbers = #tpu.dot_dimension_numbers<[1], [0], [0], [1], [0, 0, 1, 1], [], []>} : vector<4x112xbf16>, vector<112x64xbf16>, vector<4x64xf32> -> vector<4x64xf32>
    %89 = vector.extract_strided_slice %88 {offsets = [0, 0], sizes = [1, 64], strides = [1, 1]} : vector<4x64xf32> to vector<1x64xf32>
    %c0_70 = arith.constant 0 : index
    %c0_71 = arith.constant 0 : index
    %90 = vector.load %arg28[%c0_70, %c0_71] : memref<8x256xf32, #tpu.memory_space<vmem>>, vector<1x64xf32>
    tpu.vector_store %arg28[%c0_70, %c0_71], %89 {strides = array<i32>} : memref<8x256xf32, #tpu.memory_space<vmem>>, vector<1x64xf32>,
    %91 = vector.extract_strided_slice %88 {offsets = [1, 0], sizes = [1, 64], strides = [1, 1]} : vector<4x64xf32> to vector<1x64xf32>
    %c0_72 = arith.constant 0 : index
    %c64 = arith.constant 64 : index
    %92 = vector.load %arg28[%c0_72, %c64] : memref<8x256xf32, #tpu.memory_space<vmem>>, vector<1x64xf32>
    tpu.vector_store %arg28[%c0_72, %c64], %91 {strides = array<i32>} : memref<8x256xf32, #tpu.memory_space<vmem>>, vector<1x64xf32>,
    %93 = vector.extract_strided_slice %88 {offsets = [2, 0], sizes = [1, 64], strides = [1, 1]} : vector<4x64xf32> to vector<1x64xf32>
    %c0_73 = arith.constant 0 : index
    %c128 = arith.constant 128 : index
    %94 = vector.load %arg28[%c0_73, %c128] : memref<8x256xf32, #tpu.memory_space<vmem>>, vector<1x64xf32>
    tpu.vector_store %arg28[%c0_73, %c128], %93 {strides = array<i32>} : memref<8x256xf32, #tpu.memory_space<vmem>>, vector<1x64xf32>,
    %95 = vector.extract_strided_slice %88 {offsets = [3, 0], sizes = [1, 64], strides = [1, 1]} : vector<4x64xf32> to vector<1x64xf32>
    %c0_74 = arith.constant 0 : index
    %c192_75 = arith.constant 192 : index
    %96 = vector.load %arg28[%c0_74, %c192_75] : memref<8x256xf32, #tpu.memory_space<vmem>>, vector<1x64xf32>
    tpu.vector_store %arg28[%c0_74, %c192_75], %95 {strides = array<i32>} : memref<8x256xf32, #tpu.memory_space<vmem>>, vector<1x64xf32>,
    %c0_76 = arith.constant 0 : index
    %c0_77 = arith.constant 0 : index
    %97 = vector.load %arg28[%c0_76, %c0_77] : memref<8x256xf32, #tpu.memory_space<vmem>>, vector<1x256xf32>
    %98 = arith.truncf %97 : vector<1x256xf32> to vector<1x256xbf16>
    %c0_78 = arith.constant 0 : index
    %c0_79 = arith.constant 0 : index
    %99 = vector.load %arg17[%c0_78, %c0_79] : memref<256x120xbf16, #tpu.memory_space<vmem>>, vector<256x120xbf16>
    %cst_80 = arith.constant dense<0.000000e+00> : vector<1x120xf32>
    %100 = tpu.matmul %98, %99, %cst_80 {dimension_numbers = #tpu.dot_dimension_numbers<[1], [0], [0], [1], [0, 0, 1, 1], [], []>} : vector<1x256xbf16>, vector<256x120xbf16>, vector<1x120xf32> -> vector<1x120xf32>
    %c0_81 = arith.constant 0 : index
    %c0_82 = arith.constant 0 : index
    %101 = vector.load %arg18[%c0_81, %c0_82] : memref<1x120xf32, #tpu.memory_space<vmem>>, vector<1x120xf32>
    %102 = arith.addf %100, %101 : vector<1x120xf32>
    %cst_83 = arith.constant 0.000000e+00 : f32
    %103 = vector.broadcast %cst_83 : f32 to vector<1x120xf32>
    %104 = arith.maximumf %102, %103 : vector<1x120xf32>
    %105 = arith.truncf %104 : vector<1x120xf32> to vector<1x120xbf16>
    %c0_84 = arith.constant 0 : index
    %c0_85 = arith.constant 0 : index
    %106 = vector.load %arg19[%c0_84, %c0_85] : memref<120x48xbf16, #tpu.memory_space<vmem>>, vector<120x48xbf16>
    %cst_86 = arith.constant dense<0.000000e+00> : vector<1x48xf32>
    %107 = tpu.matmul %105, %106, %cst_86 {dimension_numbers = #tpu.dot_dimension_numbers<[1], [0], [0], [1], [0, 0, 1, 1], [], []>} : vector<1x120xbf16>, vector<120x48xbf16>, vector<1x48xf32> -> vector<1x48xf32>
    %c0_87 = arith.constant 0 : index
    %c0_88 = arith.constant 0 : index
    %108 = vector.load %arg20[%c0_87, %c0_88] : memref<1x48xf32, #tpu.memory_space<vmem>>, vector<1x48xf32>
    %109 = arith.addf %107, %108 : vector<1x48xf32>
    %cst_89 = arith.constant 0.000000e+00 : f32
    %110 = vector.broadcast %cst_89 : f32 to vector<1x48xf32>
    %111 = arith.maximumf %109, %110 : vector<1x48xf32>
    %112 = arith.truncf %111 : vector<1x48xf32> to vector<1x48xbf16>
    %c0_90 = arith.constant 0 : index
    %c0_91 = arith.constant 0 : index
    %113 = vector.load %arg21[%c0_90, %c0_91] : memref<48x128xbf16, #tpu.memory_space<vmem>>, vector<48x128xbf16>
    %cst_92 = arith.constant dense<0.000000e+00> : vector<1x128xf32>
    %114 = tpu.matmul %112, %113, %cst_92 {dimension_numbers = #tpu.dot_dimension_numbers<[1], [0], [0], [1], [0, 0, 1, 1], [], []>} : vector<1x48xbf16>, vector<48x128xbf16>, vector<1x128xf32> -> vector<1x128xf32>
    %c0_93 = arith.constant 0 : index
    %c0_94 = arith.constant 0 : index
    %115 = vector.load %arg22[%c0_93, %c0_94] : memref<1x128xf32, #tpu.memory_space<vmem>>, vector<1x128xf32>
    %116 = arith.addf %114, %115 : vector<1x128xf32>
    %117 = vector.shape_cast %116 : vector<1x128xf32> to vector<1x128xf32>
    %118 = vector.broadcast %117 : vector<1x128xf32> to vector<8x128xf32>
    %c0_95 = arith.constant 0 : index
    %c0_96 = arith.constant 0 : index
    %c0_97 = arith.constant 0 : index
    %119 = vector.load %arg23[%c0_95, %c0_96, %c0_97] : memref<1x8x128xf32, #tpu.memory_space<vmem>>, vector<1x8x128xf32>
    %120 = vector.shape_cast %119 : vector<1x8x128xf32> to vector<8x128xf32>
    %121 = vector.shape_cast %118 : vector<8x128xf32> to vector<1x8x128xf32>
    tpu.vector_store %arg23[%c0_95, %c0_96, %c0_97], %121 {strides = array<i32>} : memref<1x8x128xf32, #tpu.memory_space<vmem>>, vector<1x8x128xf32>,
    return
  }
  func.func @transform_0(%arg0: i32) -> (i32, i32, i32) {
    %c0_i32 = arith.constant 0 : i32
    %c0_i32_0 = arith.constant 0 : i32
    %c0_i32_1 = arith.constant 0 : i32
    return %arg0, %c0_i32, %c0_i32_0 : i32, i32, i32
  }
  func.func @transform_1(%arg0: i32) -> (i32, i32) {
    %c0_i32 = arith.constant 0 : i32
    %c0_i32_0 = arith.constant 0 : i32
    %c0_i32_1 = arith.constant 0 : i32
    return %c0_i32, %c0_i32_0 : i32, i32
  }
  func.func @transform_2(%arg0: i32) -> (i32, i32) {
    %c0_i32 = arith.constant 0 : i32
    %c0_i32_0 = arith.constant 0 : i32
    %c0_i32_1 = arith.constant 0 : i32
    return %c0_i32, %c0_i32_0 : i32, i32
  }
  func.func @transform_3(%arg0: i32) -> (i32, i32) {
    %c0_i32 = arith.constant 0 : i32
    %c0_i32_0 = arith.constant 0 : i32
    %c0_i32_1 = arith.constant 0 : i32
    return %c0_i32, %c0_i32_0 : i32, i32
  }
  func.func @transform_4(%arg0: i32) -> (i32, i32) {
    %c0_i32 = arith.constant 0 : i32
    %c0_i32_0 = arith.constant 0 : i32
    %c0_i32_1 = arith.constant 0 : i32
    return %c0_i32, %c0_i32_0 : i32, i32
  }
  func.func @transform_5(%arg0: i32) -> (i32, i32) {
    %c0_i32 = arith.constant 0 : i32
    %c0_i32_0 = arith.constant 0 : i32
    %c0_i32_1 = arith.constant 0 : i32
    return %c0_i32, %c0_i32_0 : i32, i32
  }
  func.func @transform_6(%arg0: i32) -> (i32, i32) {
    %c0_i32 = arith.constant 0 : i32
    %c0_i32_0 = arith.constant 0 : i32
    %c0_i32_1 = arith.constant 0 : i32
    return %c0_i32, %c0_i32_0 : i32, i32
  }
  func.func @transform_7(%arg0: i32) -> (i32, i32) {
    %c0_i32 = arith.constant 0 : i32
    %c0_i32_0 = arith.constant 0 : i32
    %c0_i32_1 = arith.constant 0 : i32
    return %c0_i32, %c0_i32_0 : i32, i32
  }
  func.func @transform_8(%arg0: i32) -> (i32, i32) {
    %c0_i32 = arith.constant 0 : i32
    %c0_i32_0 = arith.constant 0 : i32
    %c0_i32_1 = arith.constant 0 : i32
    return %c0_i32, %c0_i32_0 : i32, i32
  }
  func.func @transform_9(%arg0: i32) -> (i32, i32) {
    %c0_i32 = arith.constant 0 : i32
    %c0_i32_0 = arith.constant 0 : i32
    %c0_i32_1 = arith.constant 0 : i32
    return %c0_i32, %c0_i32_0 : i32, i32
  }
  func.func @transform_10(%arg0: i32) -> (i32, i32) {
    %c0_i32 = arith.constant 0 : i32
    %c0_i32_0 = arith.constant 0 : i32
    %c0_i32_1 = arith.constant 0 : i32
    return %c0_i32, %c0_i32_0 : i32, i32
  }
  func.func @transform_11(%arg0: i32) -> (i32, i32) {
    %c0_i32 = arith.constant 0 : i32
    %c0_i32_0 = arith.constant 0 : i32
    %c0_i32_1 = arith.constant 0 : i32
    return %c0_i32, %c0_i32_0 : i32, i32
  }
  func.func @transform_12(%arg0: i32) -> (i32, i32) {
    %c0_i32 = arith.constant 0 : i32
    %c0_i32_0 = arith.constant 0 : i32
    %c0_i32_1 = arith.constant 0 : i32
    return %c0_i32, %c0_i32_0 : i32, i32
  }
  func.func @transform_13(%arg0: i32) -> (i32, i32) {
    %c0_i32 = arith.constant 0 : i32
    %c0_i32_0 = arith.constant 0 : i32
    %c0_i32_1 = arith.constant 0 : i32
    return %c0_i32, %c0_i32_0 : i32, i32
  }
  func.func @transform_14(%arg0: i32) -> (i32, i32) {
    %c0_i32 = arith.constant 0 : i32
    %c0_i32_0 = arith.constant 0 : i32
    %c0_i32_1 = arith.constant 0 : i32
    return %c0_i32, %c0_i32_0 : i32, i32
  }
  func.func @transform_15(%arg0: i32) -> (i32, i32) {
    %c0_i32 = arith.constant 0 : i32
    %c0_i32_0 = arith.constant 0 : i32
    %c0_i32_1 = arith.constant 0 : i32
    return %c0_i32, %c0_i32_0 : i32, i32
  }
  func.func @transform_16(%arg0: i32) -> (i32, i32) {
    %c0_i32 = arith.constant 0 : i32
    %c0_i32_0 = arith.constant 0 : i32
    %c0_i32_1 = arith.constant 0 : i32
    return %c0_i32, %c0_i32_0 : i32, i32
  }
  func.func @transform_17(%arg0: i32) -> (i32, i32) {
    %c0_i32 = arith.constant 0 : i32
    %c0_i32_0 = arith.constant 0 : i32
    %c0_i32_1 = arith.constant 0 : i32
    return %c0_i32, %c0_i32_0 : i32, i32
  }
  func.func @transform_18(%arg0: i32) -> (i32, i32) {
    %c0_i32 = arith.constant 0 : i32
    %c0_i32_0 = arith.constant 0 : i32
    %c0_i32_1 = arith.constant 0 : i32
    return %c0_i32, %c0_i32_0 : i32, i32
  }
  func.func @transform_19(%arg0: i32) -> (i32, i32) {
    %c0_i32 = arith.constant 0 : i32
    %c0_i32_0 = arith.constant 0 : i32
    %c0_i32_1 = arith.constant 0 : i32
    return %c0_i32, %c0_i32_0 : i32, i32
  }
  func.func @transform_20(%arg0: i32) -> (i32, i32) {
    %c0_i32 = arith.constant 0 : i32
    %c0_i32_0 = arith.constant 0 : i32
    %c0_i32_1 = arith.constant 0 : i32
    return %c0_i32, %c0_i32_0 : i32, i32
  }
  func.func @transform_21(%arg0: i32) -> (i32, i32) {
    %c0_i32 = arith.constant 0 : i32
    %c0_i32_0 = arith.constant 0 : i32
    %c0_i32_1 = arith.constant 0 : i32
    return %c0_i32, %c0_i32_0 : i32, i32
  }
  func.func @transform_22(%arg0: i32) -> (i32, i32, i32) {
    %c0_i32 = arith.constant 0 : i32
    %c0_i32_0 = arith.constant 0 : i32
    %c0_i32_1 = arith.constant 0 : i32
    return %arg0, %c0_i32, %c0_i32_0 : i32, i32, i32
  }
}

</mosaic_0001>

<bundles_post_ra>
// kernel: net_forward.1
= control target key start
LH: loop header
LB: loop body
LE: loop exit
PB: predicated region body
PF: predicated region fallthrough
CT: control target
= control target key end

     0   :  { %s6543_s0 = inlined_call_operand.vmem [shape: f32[2,48,48], index: 0, kind: input, shape index: {}]   ;;  %s6544_s1 = inlined_call_operand.vmem [shape: bf16[240,352], index: 1, kind: input, shape index: {}]   ;;  %s6545_s2 = inlined_call_operand.vmem [shape: bf16[528,160], index: 2, kind: input, shape index: {}]   ;;  %s6546_s3 = inlined_call_operand.vmem [shape: bf16[240,128], index: 3, kind: input, shape index: {}]   ;;  %s6547_s4 = inlined_call_operand.vmem [shape: f32[1,352], index: 4, kind: input, shape index: {}]   ;;  %s6548_s5 = inlined_call_operand.vmem [shape: f32[1,160], index: 5, kind: input, shape index: {}]   ;;  %s6549_s6 = inlined_call_operand.vmem [shape: f32[1,128], index: 6, kind: input, shape index: {}]   ;;  %s6550_s7 = inlined_call_operand.vmem [shape: bf16[22,44], index: 7, kind: input, shape index: {}]   ;;  %s6551_s8 = inlined_call_operand.vmem [shape: bf16[22,44], index: 8, kind: input, shape index: {}]   ;;  %s6552_s9 = inlined_call_operand.vmem [shape: bf16[10,20], index: 9, kind: input, shape index: {}]   ;;  %s6553_s10 = inlined_call_operand.vmem [shape: bf16[10,20], index: 10, kind: input, shape index: {}]   ;;  %s6554_s11 = inlined_call_operand.vmem [shape: bf16[4,8], index: 11, kind: input, shape index: {}]   ;;  %s6555_s12 = inlined_call_operand.vmem [shape: bf16[4,8], index: 12, kind: input, shape index: {}]   ;;  %s6556_s13 = inlined_call_operand.vmem [shape: bf16[344,176], index: 13, kind: input, shape index: {}]   ;;  %s6557_s14 = inlined_call_operand.vmem [shape: bf16[152,80], index: 14, kind: input, shape index: {}]   ;;  %s6558_s15 = inlined_call_operand.vmem [shape: bf16[112,64], index: 15, kind: input, shape index: {}]   ;;  %s6559_s16 = inlined_call_operand.vmem [shape: bf16[256,120], index: 16, kind: input, shape index: {}]   ;;  %s6560_s17 = inlined_call_operand.vmem [shape: f32[1,120], index: 17, kind: input, shape index: {}]   ;;  %s6561_s18 = inlined_call_operand.vmem [shape: bf16[120,48], index: 18, kind: input, shape index: {}]   ;;  %s6562_s19 = inlined_call_operand.vmem [shape: f32[1,48], index: 19, kind: input, shape index: {}]   ;;  %s6563_s20 = inlined_call_operand.vmem [shape: bf16[48,128], index: 20, kind: input, shape index: {}]   ;;  %s6564_s21 = inlined_call_operand.vmem [shape: f32[1,128], index: 21, kind: input, shape index: {}]   ;;  %s6565_s22 = inlined_call_operand.vmem [shape: f32[2,8,128], index: 22, kind: output, shape index: {}]  }
   0x1   :  { %6575 = sst [smem:[#allocation7_spill]] %s6543_s0 }
   0x2   :  { %6576 = sst [smem:[#allocation8_spill]] %s6544_s1 }
   0x3   :  { %6577 = sst [smem:[#allocation9_spill]] %s6545_s2 }
   0x4   :  { %6578 = sst [smem:[#allocation10_spill]] %s6546_s3  ;;  %s4984_s3 = smov 0  }
   0x5   :  { %6579 = sst [smem:[#allocation11_spill]] %s6547_s4 }
   0x6   :  { %6580 = sst [smem:[#allocation12_spill]] %s6548_s5 }
   0x7   :  { %6581 = sst [smem:[#allocation13_spill]] %s6549_s6 }
   0x8 LB: > { %s3641_s28 = sadd.s32 4294967295, %s4859_s3   ;;  %p3645_p0 = scmp.ge.s32.totalorder %s4859_s3, 1  ;;  %s4859_s3 = sphi %s4984_s3, %s32_s3  }
   0x9   : > { %p612_p1 = scmp.lt.s32.totalorder %s4859_s3, 3 }
   0xb   : > { %p613_p2 = pnand %p3645_p0, %p612_p1 }
   0xc   : > { %p673_p3 = scmp.lt.s32.totalorder (!%p613_p2), %s3641_s28, 1  ;;  %s6582_s0 = sld [smem:[#allocation7_spill]] (!%p613_p2) }
   0xd   : > { %616 = sbr.rel (%p613_p2) target bundleno = 2777 (0xad9), region = 108  ;;  %s6569_s1 = smov (!%p613_p2), 64  }
   0xe   : > { %s4862_s5 = smov (!%p613_p2), 16   ;;  %s6571_s24 = smov (!%p613_p2), 96  }
   0xf   : > { %s4864_s6 = smov (!%p613_p2), 48   ;;  %s6583_s2 = sld [smem:[#allocation8_spill]] (!%p613_p2) }
  0x10   : > { %s6584_s4 = sld [smem:[#allocation11_spill]] (!%p613_p2) }
  0x11   : > { %s6585_s30 = sld [smem:[#allocation9_spill]] (!%p613_p2) }
  0x12   : > { %s6593_s28 = smov (!%p673_p3, %s3641_s28), 1  ;;  %vm825_vm0 = vcmask 1043456   ;;  %vm787_vm1 = vcmask 1044480   ;;  %vm741_vm2 = vcmask 1045504   ;;  %vm703_vm3 = vcmask 1046528   ;;  %s6589_s26 = sld [smem:[#allocation10_spill]] }
  0x13   : > { %s4805_s29 = smul.u32 48, %s6593_s28  ;;  %vm689_vm4 = vcmask 392192   ;;  %vm773_vm5 = vcmask 130048   ;;  %vm817_vm6 = vcmask 523392   ;;  %vm855_vm7 = vcmask 916992   ;;  %s6590_s27 = sld [smem:[#allocation13_spill]] }
  0x14   : > { %vm695_vm8 = vcmask 388096   ;;  %vm1189_vm9 = vcmask 916480   ;;  %vm733_vm10 = vcmask 785792   ;;  %vm771_vm11 = vcmask 1048320  }
  0x15   : > { %s4998_s23 = scalar_lea.vmem %s6582_s0, %s4805_s29  ;;  %v3818_v50 = vld [vmem:[%s6583_s2 + $0x150] sm:$0xf]  ;;  %v4625_v51 = vld [vmem:[%s6583_s2 + $0x158] sm:$0xf0]  ;;  %v4624_v52 = vld [vmem:[%s6583_s2 + $0x154] sm:$0xf] }
  0x16   : > { %v5001_v0 = vld [vmem:[%s4998_s23] sm:$0xff]  ;;  %v5004_v1 = vld [vmem:[%s4998_s23 + $0x8] sm:$0xff]  ;;  %v5013_v8 = vld [vmem:[%s4998_s23 + $0x10] sm:$0xff]  ;;  %v3819_v53 = vor.u32 %v4625_v51, %v3818_v50  ;;  %vm739_vm12 = vcmask 781696   ;;  %vm783_vm13 = vcmask 1044224   ;;  %vm785_vm14 = vcmask 125952  }
  0x17   : > { %v826_v2 = vrot.slane %v5001_v0, 4  ;;  %v827_v3 = vrot.slane %v5004_v1, 4  ;;  %v788_v4 = vrot.slane %v5001_v0, 3  ;;  %v789_v5 = vrot.slane %v5004_v1, 3  ;;  %v5028_v18 = vld [vmem:[%s4998_s23 + $0x18] sm:$0xff]  ;;  %v5031_v19 = vld [vmem:[%s4998_s23 + $0x20] sm:$0xff] }
  0x18   : > { %v742_v6 = vrot.slane %v5001_v0, 2  ;;  %v743_v7 = vrot.slane %v5004_v1, 2  ;;  %v829_v12 = vrot.slane %v5013_v8, 4  ;;  %v791_v13 = vrot.slane %v5013_v8, 3  ;;  %v5052_v32 = vld [vmem:[%s4998_s23 + $0x28] sm:$0xff]  ;;  %1224 = vmatpush.bf16.msra.mxu1 %v3819_v53  ;;  %692 = vst.msk [vmem:[#allocation3 + $0x20] sm:$0xff] %vm689_vm4, %v5013_v8 }
  0x19   : > { %v828_v9 = vsel %vm825_vm0, %v826_v2, %v827_v3  ;;  %v790_v10 = vsel %vm787_vm1, %v788_v4, %v789_v5  ;;  %v745_v14 = vrot.slane %v5013_v8, 2  ;;  %v793_v20 = vrot.slane %v5028_v18, 3  ;;  %v3820_v54 = vld [vmem:[%s6583_s2 + $0x15c] sm:$0xf0]  ;;  %v3806_v55 = vld [vmem:[%s6583_s2 + $0x138] sm:$0xf] }
  0x1a   : > { %837 = vrot.lane.b32.xlu2 %v828_v9, %s6569_s1  ;;  %799 = vrot.lane.b32.xlu1 %v790_v10, %s4862_s5  ;;  %v744_v11 = vsel %vm741_vm2, %v742_v6, %v743_v7  ;;  %v830_v15 = vsel %vm825_vm0, %v827_v3, %v829_v12  ;;  %v792_v16 = vsel %vm787_vm1, %v789_v5, %v791_v13  ;;  %v747_v21 = vrot.slane %v5028_v18, 2  ;;  %v4622_v56 = vld [vmem:[%s6583_s2 + $0x140] sm:$0xf0]  ;;  %v4621_v58 = vld [vmem:[%s6583_s2 + $0x13c] sm:$0xf]  ;;  %s6588_s0 = smov 120  }
  0x1b   : > { %753 = vrot.lane.b32.xlu0 %v744_v11, %s6571_s24  ;;  %v746_v17 = vsel %vm741_vm2, %v743_v7, %v745_v14  ;;  %v749_v22 = vrot.slane %v5031_v19, 2  ;;  %v794_v23 = vsel %vm787_vm1, %v791_v13, %v793_v20  ;;  %v831_v26 = vrot.slane %v5028_v18, 4  ;;  %v3808_v59 = vld [vmem:[%s6583_s2 + $0x144] sm:$0xf0]  ;;  %v3794_v62 = vld [vmem:[%s6583_s2 + $0x120] sm:$0xf] }
  0x1c   : > { %v748_v25 = vsel %vm741_vm2, %v745_v14, %v747_v21  ;;  %v833_v27 = vrot.slane %v5031_v19, 4  ;;  %v795_v28 = vrot.slane %v5031_v19, 3  ;;  %v751_v33 = vrot.slane %v5052_v32, 2  ;;  %v4619_v63 = vld [vmem:[%s6583_s2 + $0x128] sm:$0xf0]  ;;  %690 = vst.msk [vmem:[#allocation3] sm:$0xff] %vm689_vm4, %v5001_v0 }
  0x1d   : > { %v750_v24 = vsel %vm741_vm2, %v747_v21, %v749_v22  ;;  %v832_v30 = vsel %vm825_vm0, %v829_v12, %v831_v26  ;;  %v705_v34 = vrot.slane %v5004_v1, 1  ;;  %v707_v35 = vrot.slane %v5013_v8, 1  ;;  %v4618_v2 = vld [vmem:[%s6583_s2 + $0x124] sm:$0xf]  ;;  %v3796_v3 = vld [vmem:[%s6583_s2 + $0x12c] sm:$0xf0] }
  0x1e   : > { %v834_v29 = vsel %vm825_vm0, %v831_v26, %v833_v27  ;;  %v796_v31 = vsel %vm787_vm1, %v793_v20, %v795_v28  ;;  %v704_v36 = vrot.slane %v5001_v0, 1  ;;  %v752_v37 = vsel %vm741_vm2, %v749_v22, %v751_v33  ;;  %v3782_v6 = vld [vmem:[%s6583_s2 + $0x108] sm:$0xf]  ;;  %v4616_v7 = vld [vmem:[%s6583_s2 + $0x110] sm:$0xf0]  ;;  %691 = vst.msk [vmem:[#allocation3 + $0x10] sm:$0xff] %vm689_vm4, %v5004_v1 }
  0x1f   : > { %v708_v38 = vsel %vm703_vm3, %v705_v34, %v707_v35  ;;  %v797_v40 = vrot.slane %v5052_v32, 3  ;;  %v709_v42 = vrot.slane %v5028_v18, 1  ;;  %v835_v43 = vrot.slane %v5052_v32, 4  ;;  %v4615_v9 = vld [vmem:[%s6583_s2 + $0x10c] sm:$0xf]  ;;  %693 = vst.msk [vmem:[#allocation3 + $0x30] sm:$0xff] %vm689_vm4, %v5028_v18 }
  0x20   : > { %v706_v39 = vsel %vm703_vm3, %v704_v36, %v705_v34  ;;  %v711_v46 = vrot.slane %v5031_v19, 1  ;;  %v713_v47 = vrot.slane %v5052_v32, 1  ;;  %v3823_v57 = vor.u32 %v4624_v52, %v3820_v54  ;;  %v3784_v11 = vld [vmem:[%s6583_s2 + $0x114] sm:$0xf0]  ;;  %v3770_v14 = vld [vmem:[%s6583_s2 + $0xf0] sm:$0xf] }
  0x21   : > { %v798_v41 = vsel %vm787_vm1, %v795_v28, %v797_v40  ;;  %v710_v44 = vsel %vm703_vm3, %v707_v35, %v709_v42  ;;  %v836_v45 = vsel %vm825_vm0, %v833_v27, %v835_v43  ;;  %v3807_v60 = vor.u32 %v4622_v56, %v3806_v55  ;;  %v3772_v20 = vld [vmem:[%s6583_s2 + $0xfc] sm:$0xf0]  ;;  %v3734_v22 = vld [vmem:[%s6583_s2 + $0xa8] sm:$0xf]  ;;  %v3736_v26 = vld [vmem:[%s6583_s2 + $0xb4] sm:$0xf0] }
  0x22   : > { %839 = vrot.lane.b32.xlu2 %v830_v15, %s6569_s1  ;;  %801 = vrot.lane.b32.xlu1 %v792_v16, %s4862_s5  ;;  %v714_v48 = vsel %vm703_vm3, %v711_v46, %v713_v47  ;;  %v712_v49 = vsel %vm703_vm3, %v709_v42, %v711_v46  ;;  %v3811_v61 = vor.u32 %v4621_v58, %v3808_v59  ;;  %v4613_v15 = vld [vmem:[%s6583_s2 + $0xf8] sm:$0xf0]  ;;  %v4612_v16 = vld [vmem:[%s6583_s2 + $0xf4] sm:$0xf]  ;;  %vm823_vm15 = vcmask 519296   ;;  %s4867_s23 = smov 80  }
  0x23   : > { %755 = vrot.lane.b32.xlu0 %v746_v17, %s6571_s24  ;;  %1272 = vmatpush.bf16.msra.mxu3 %v3823_v57  ;;  %v3795_v4 = vor.u32 %v4619_v63, %v3794_v62  ;;  %v3799_v5 = vor.u32 %v4618_v2, %v3796_v3  ;;  %v3783_v10 = vor.u32 %v4616_v7, %v3782_v6  ;;  %v3758_v27 = vld [vmem:[%s6583_s2 + $0xd8] sm:$0xf]  ;;  %v4610_v28 = vld [vmem:[%s6583_s2 + $0xe0] sm:$0xf0]  ;;  %v3722_v35 = vld [vmem:[%s6583_s2 + $0x90] sm:$0xf] }
  0x24   : > { %1225 = vmatpush.bf16.msra.mxu1 %v3807_v60  ;;  %v3787_v12 = vor.u32 %v4615_v9, %v3784_v11  ;;  %v3771_v17 = vor.u32 %v4613_v15, %v3770_v14  ;;  %v3775_v21 = vor.u32 %v4612_v16, %v3772_v20  ;;  %v4601_v36 = vld [vmem:[%s6583_s2 + $0x98] sm:$0xf0]  ;;  %v4607_v42 = vld [vmem:[%s6583_s2 + $0xc8] sm:$0xf0]  ;;  %v3748_v46 = vld [vmem:[%s6583_s2 + $0xcc] sm:$0xf0] }
  0x25   : > { %v4597_v50 = vld [vmem:[%s6583_s2 + $0x7c] sm:$0xf]  ;;  %v3712_v52 = vld [vmem:[%s6583_s2 + $0x84] sm:$0xf0]  ;;  %v3698_v55 = vld [vmem:[%s6583_s2 + $0x60] sm:$0xf] }
  0x26   : > { %v3715_v53 = vor.u32 %v4597_v50, %v3712_v52  ;;  %v4595_v56 = vld [vmem:[%s6583_s2 + $0x68] sm:$0xf0]  ;;  %v4594_v57 = vld [vmem:[%s6583_s2 + $0x64] sm:$0xf]  ;;  %v3700_v0 = vld [vmem:[%s6583_s2 + $0x6c] sm:$0xf0] }
  0x27   : > { %1273 = vmatpush.bf16.msra.mxu3 %v3811_v61  ;;  %v3699_v8 = vor.u32 %v4595_v56, %v3698_v55  ;;  %694 = vst.msk [vmem:[#allocation3 + $0x40] sm:$0xff] %vm689_vm4, %v5031_v19  ;;  %v3703_v1 = vor.u32 %v4594_v57, %v3700_v0  ;;  %v3686_v58 = vld [vmem:[%s6583_s2 + $0x48] sm:$0xf]  ;;  %v4592_v18 = vld [vmem:[%s6583_s2 + $0x50] sm:$0xf0]  ;;  %vm861_vm1 = vcmask 912896  }
  0x28   : > { %1226 = vmatpush.bf16.msra.mxu1 %v3795_v4  ;;  %v4591_v59 = vld [vmem:[%s6583_s2 + $0x4c] sm:$0xf]  ;;  %v3687_v60 = vor.u32 %v4592_v18, %v3686_v58  ;;  %v3688_v19 = vld [vmem:[%s6583_s2 + $0x54] sm:$0xf0]  ;;  %v3674_v3 = vld [vmem:[%s6583_s2 + $0x30] sm:$0xf] }
  0x29   : > { %v3691_v61 = vor.u32 %v4591_v59, %v3688_v19  ;;  %v4589_v4 = vld [vmem:[%s6583_s2 + $0x38] sm:$0xf0]  ;;  %v3676_v7 = vld [vmem:[%s6583_s2 + $0x3c] sm:$0xf0]  ;;  %v4586_v11 = vld [vmem:[%s6583_s2 + $0x20] sm:$0xf0] }
  0x2a   : > { %803 = vrot.lane.b32.xlu2 %v794_v23, %s4862_s5  ;;  %759 = vrot.lane.b32.xlu1 %v750_v24, %s6571_s24  ;;  %v4604_v23 = vld [vmem:[%s6583_s2 + $0xb0] sm:$0xf0]  ;;  %v4603_v24 = vld [vmem:[%s6583_s2 + $0xac] sm:$0xf]  ;;  %v3675_v6 = vor.u32 %v4589_v4, %v3674_v3  ;;  %696 = vst.msk [vmem:[#allocation3 + $0x50] sm:$0xf] %vm695_vm8, %v5052_v32 }
  0x2b   : > { %757 = vrot.lane.b32.xlu0 %v748_v25, %s6571_s24  ;;  %1274 = vmatpush.bf16.msra.mxu3 %v3799_v5  ;;  %v3735_v25 = vor.u32 %v4604_v23, %v3734_v22  ;;  %v4588_v5 = vld [vmem:[%s6583_s2 + $0x34] sm:$0xf]  ;;  %v4585_v14 = vld [vmem:[%s6583_s2 + $0x1c] sm:$0xf]  ;;  %v3664_v15 = vld [vmem:[%s6583_s2 + $0x24] sm:$0xf0] }
  0x2c   : > { %1227 = vmatpush.bf16.msra.mxu1 %v3783_v10  ;;  %v3679_v9 = vor.u32 %v4588_v5, %v3676_v7  ;;  %v3662_v10 = vld [vmem:[%s6583_s2 + $0x18] sm:$0xf]  ;;  %v4583_v22 = vld [vmem:[%s6583_s2 + $0x8] sm:$0xf0]  ;;  %v4582_v32 = vld [vmem:[%s6583_s2 + $0x4] sm:$0xf] }
  0x2d   : > { %1199 = vmatpush.bf16.msra.mxu0 %v3735_v25  ;;  %v3802_v50 = vld [vmem:[%s6583_s2 + $0x128] sm:$0xf]  ;;  %v4593_v57 = vld [vmem:[%s6583_s2 + $0x58] sm:$0xf0]  ;;  %v3682_v59 = vld [vmem:[%s6583_s2 + $0x38] sm:$0xf] }
  0x2e   : > { %v4617_v58 = vld [vmem:[%s6583_s2 + $0x118] sm:$0xf0]  ;;  %v3778_v19 = vld [vmem:[%s6583_s2 + $0xf8] sm:$0xf]  ;;  %s3647_s29 = sshll.u32 %s6593_s28, 3 }
  0x2f   : > { %1275 = vmatpush.bf16.msra.mxu3 %v3787_v12  ;;  %v3663_v12 = vor.u32 %v4586_v11, %v3662_v10  ;;  %v4587_v10 = vld [vmem:[%s6583_s2 + $0x28] sm:$0xf0] }
  0x30   : > { %1228 = vmatpush.bf16.msra.mxu1 %v3771_v17 }
  0x32   : > { %843 = vrot.lane.b32.xlu2 %v834_v29, %s6569_s1  ;;  %841 = vrot.lane.b32.xlu1 %v832_v30, %s6569_s1  ;;  %v3739_v29 = vor.u32 %v4603_v24, %v3736_v26  ;;  %v3759_v30 = vor.u32 %v4610_v28, %v3758_v27  ;;  %v3652_v24 = vld [vmem:[%s6583_s2 + $0xc] sm:$0xf0]  ;;  %v4605_v27 = vld [vmem:[%s6583_s2 + $0xb8] sm:$0xf0] }
  0x33   : > { %805 = vrot.lane.b32.xlu0 %v796_v31, %s4862_s5  ;;  %1276 = vmatpush.bf16.msra.mxu3 %v3775_v21  ;;  %v4609_v31 = vld [vmem:[%s6583_s2 + $0xdc] sm:$0xf]  ;;  %v3650_v21 = vld [vmem:[%s6583_s2] sm:$0xf]  ;;  %v3655_v25 = vor.u32 %v4582_v32, %v3652_v24  ;;  %v3742_v26 = vld [vmem:[%s6583_s2 + $0xb0] sm:$0xf] }
  0x34   : > { %1247 = vmatpush.bf16.msra.mxu2 %v3739_v29  ;;  %1229 = vmatpush.bf16.msra.mxu1 %v3759_v30  ;;  %v3651_v23 = vor.u32 %v4583_v22, %v3650_v21  ;;  %v3743_v28 = vor.u32 %v4605_v27, %v3742_v26  ;;  %v3730_v29 = vld [vmem:[%s6583_s2 + $0x98] sm:$0xf]  ;;  %v4602_v30 = vld [vmem:[%s6583_s2 + $0xa0] sm:$0xf0]  ;;  %v4608_v21 = vld [vmem:[%s6583_s2 + $0xd0] sm:$0xf0] }
  0x3a   : > { %761 = vrot.lane.b32.xlu2 %v752_v37, %s6571_s24  ;;  %717 = vrot.lane.b32.xlu1 %v708_v38, %s4864_s6  ;;  %v4600_v37 = vld [vmem:[%s6583_s2 + $0x94] sm:$0xf] }
  0x3b   : > { %715 = vrot.lane.b32.xlu0 %v706_v39, %s4864_s6  ;;  %v3723_v39 = vor.u32 %v4601_v36, %v3722_v35 }
  0x3d   : > { %1200 = vmatpush.bf16.msra.mxu0 %v3723_v39 }
  0x42   : > { %809 = vrot.lane.b32.xlu2 %v797_v40, %s4862_s5  ;;  %807 = vrot.lane.b32.xlu1 %v798_v41, %s4862_s5  ;;  %v3724_v40 = vld [vmem:[%s6583_s2 + $0x9c] sm:$0xf0]  ;;  %s6587_s5 = sld [smem:[#allocation12_spill]] }
  0x43   : > { %763 = vrot.lane.b32.xlu0 %v751_v33, %s6571_s24  ;;  %v3760_v33 = vld [vmem:[%s6583_s2 + $0xe4] sm:$0xf0]  ;;  %v3746_v41 = vld [vmem:[%s6583_s2 + $0xc0] sm:$0xf] }
  0x44   : > { %v3763_v34 = vor.u32 %v4609_v31, %v3760_v33  ;;  %v3826_v31 = vld [vmem:[%s6583_s2 + $0x158] sm:$0xf]  ;;  %v3731_v33 = vor.u32 %v4602_v30, %v3730_v29 }
  0x46   : > { %1277 = vmatpush.bf16.msra.mxu3 %v3763_v34  ;;  %v4626_v34 = vld [vmem:[%s6583_s2 + $0x160] sm:$0xf0] }
  0x4a   : > { %719 = vrot.lane.b32.xlu2 %v710_v44, %s4864_s6  ;;  %847 = vrot.lane.b32.xlu1 %v835_v43, %s6569_s1  ;;  %v3727_v43 = vor.u32 %v4600_v37, %v3724_v40  ;;  %v3747_v44 = vor.u32 %v4607_v42, %v3746_v41  ;;  %v3827_v37 = vor.u32 %v4626_v34, %v3826_v31  ;;  %v3718_v40 = vld [vmem:[%s6583_s2 + $0x80] sm:$0xf]  ;;  %v4599_v41 = vld [vmem:[%s6583_s2 + $0x88] sm:$0xf0] }
  0x4b   : > { %845 = vrot.lane.b32.xlu0 %v836_v45, %s6569_s1  ;;  %v4606_v45 = vld [vmem:[%s6583_s2 + $0xc4] sm:$0xf] }
  0x4c   : > { %1248 = vmatpush.bf16.msra.mxu2 %v3727_v43  ;;  %1230 = vmatpush.bf16.msra.mxu1 %v3747_v44  ;;  %v3719_v43 = vor.u32 %v4599_v41, %v3718_v40  ;;  %v3814_v44 = vld [vmem:[%s6583_s2 + $0x140] sm:$0xf] }
  0x50   : > { %1249 = vmatpush.bf16.msra.mxu2 %v3715_v53  ;;  %1295 = vmatpush.bf16.msrb.mxu1 %v3743_v28 }
  0x52   : > { %723 = vrot.lane.b32.xlu1 %v714_v48, %s4864_s6  ;;  %725 = vrot.lane.b32.xlu2 %v713_v47, %s4864_s6  ;;  %v3751_v47 = vor.u32 %v4606_v45, %v3748_v46  ;;  %v3710_v48 = vld [vmem:[%s6583_s2 + $0x78] sm:$0xf]  ;;  %v4623_v45 = vld [vmem:[%s6583_s2 + $0x148] sm:$0xf0] }
  0x53   : > { %721 = vrot.lane.b32.xlu0 %v712_v49, %s4864_s6  ;;  %v4598_v49 = vld [vmem:[%s6583_s2 + $0x80] sm:$0xf0] }
  0x54   : > { %1278 = vmatpush.bf16.msra.mxu3 %v3751_v47  ;;  %v3711_v51 = vor.u32 %v4598_v49, %v3710_v48  ;;  %1250 = vmatpush.bf16.msra.mxu2 %v3703_v1  ;;  %v3815_v47 = vor.u32 %v4623_v45, %v3814_v44  ;;  %v3706_v48 = vld [vmem:[%s6583_s2 + $0x68] sm:$0xf]  ;;  %v4596_v49 = vld [vmem:[%s6583_s2 + $0x70] sm:$0xf0]  ;;  %v3790_v1 = vld [vmem:[%s6583_s2 + $0x110] sm:$0xf] }
  0x55   : > { %1296 = vmatpush.bf16.msrb.mxu1 %v3731_v33  ;;  %v3707_v52 = vor.u32 %v4596_v49, %v3706_v48  ;;  %v3791_v18 = vor.u32 %v4617_v58, %v3790_v1 }
  0x56   : > { %1201 = vmatpush.bf16.msra.mxu0 %v3711_v51  ;;  %v4620_v51 = vld [vmem:[%s6583_s2 + $0x130] sm:$0xf0] }
  0x57   : > { %v3803_v53 = vor.u32 %v4620_v51, %v3802_v50 }
  0x58   : > { %1251 = vmatpush.bf16.msra.mxu2 %v3691_v61  ;;  %1320 = vmatpush.bf16.msrb.mxu3 %v3827_v37 }
  0x59   : > { %1297 = vmatpush.bf16.msrb.mxu1 %v3719_v43 }
  0x5a   : > { %1202 = vmatpush.bf16.msra.mxu0 %v3699_v8  ;;  %v3694_v8 = vld [vmem:[%s6583_s2 + $0x50] sm:$0xf] }
  0x5b   : > { %v3695_v0 = vor.u32 %v4593_v57, %v3694_v8 }
  0x5c   : > { %1252 = vmatpush.bf16.msra.mxu2 %v3679_v9  ;;  %1321 = vmatpush.bf16.msrb.mxu3 %v3815_v47  ;;  %v3670_v9 = vld [vmem:[%s6583_s2 + $0x20] sm:$0xf] }
  0x5d   : > { %1298 = vmatpush.bf16.msrb.mxu1 %v3707_v52 }
  0x5e   : > { %1203 = vmatpush.bf16.msra.mxu0 %v3687_v60  ;;  %v4590_v60 = vld [vmem:[%s6583_s2 + $0x40] sm:$0xf0] }
  0x5f   : > { %v3683_v61 = vor.u32 %v4590_v60, %v3682_v59 }
  0x60   : > { %1322 = vmatpush.bf16.msrb.mxu3 %v3803_v53 }
  0x61   : > { %1299 = vmatpush.bf16.msrb.mxu1 %v3695_v0 }
  0x62   : > { %1204 = vmatpush.bf16.msra.mxu0 %v3675_v6 }
  0x64   : > { %1323 = vmatpush.bf16.msrb.mxu3 %v3791_v18 }
  0x65   : > { %1300 = vmatpush.bf16.msrb.mxu1 %v3683_v61 }
  0x66   : > { %1205 = vmatpush.bf16.msra.mxu0 %v3663_v12  ;;  %v3671_v12 = vor.u32 %v4587_v10, %v3670_v9 }
  0x69   : > { %1301 = vmatpush.bf16.msrb.mxu1 %v3671_v12 }
  0x6a   : > { %1206 = vmatpush.bf16.msra.mxu0 %v3651_v23 }
  0x74   : > { %v5134_v13 = vpop.permute.xlu2 %837 }
  0x7c   : > { %v5181_v38 = vpop.permute.xlu2 %839 }
  0x84   : > { %v5212_v54 = vpop.permute.xlu2 %803 }
  0x8c   : > { %v5246_v62 = vpop.permute.xlu2 %843  ;;  %v800_v63 = vpop.permute.xlu1 %799 }
  0x8d   : > { %v5248_v2 = vpop.permute.xlu0 %753 }
  0x8e   : > { %774 = vst.msk [vmem:[#allocation3 + $0x8] sm:$0xff] %vm773_vm5, %v5248_v2 }
  0x8f   : > { %818 = vst.msk [vmem:[#allocation3 + $0x8] sm:$0xff] %vm817_vm6, %v800_v63 }
  0x90   : > { %856 = vst.msk [vmem:[#allocation3 + $0x8] sm:$0xff] %vm855_vm7, %v5134_v13  ;;  %v3667_v13 = vor.u32 %v4585_v14, %v3664_v15  ;;  %v3766_v14 = vld [vmem:[%s6583_s2 + $0xe0] sm:$0xf] }
  0x92   : > { %1253 = vmatpush.bf16.msra.mxu2 %v3667_v13  ;;  %v3658_v13 = vld [vmem:[%s6583_s2 + $0x8] sm:$0xf] }
  0x94   : > { %v5279_v16 = vpop.permute.xlu2 %761  ;;  %v802_v17 = vpop.permute.xlu1 %801 }
  0x95   : > { %782 = vst.msk [vmem:[#allocation3 + $0x48] sm:$0xff] %vm773_vm5, %v5279_v16  ;;  %v5285_v20 = vpop.permute.xlu0 %755 }
  0x96   : > { %776 = vst.msk [vmem:[#allocation3 + $0x18] sm:$0xff] %vm773_vm5, %v5285_v20  ;;  %1254 = vmatpush.bf16.msra.mxu2 %v3655_v25 }
  0x97   : > { %819 = vst.msk [vmem:[#allocation3 + $0x18] sm:$0xff] %vm817_vm6, %v802_v17  ;;  %v864_v39 = vld [vmem:[#allocation3 + $0x8] sm:$0xff] }
  0x98   : > { %857 = vst.msk [vmem:[#allocation3 + $0x18] sm:$0xff] %vm855_vm7, %v5181_v38  ;;  %v4584_v17 = vld [vmem:[%s6583_s2 + $0x10] sm:$0xf0] }
  0x99   : > { %v3659_v32 = vor.u32 %v4584_v17, %v3658_v13 }
  0x9b   : > { %1302 = vmatpush.bf16.msrb.mxu1 %v3659_v32 }
  0x9c   : > { %v5322_v35 = vpop.permute.xlu2 %809  ;;  %v5324_v36 = vpop.permute.xlu1 %759 }
  0x9d   : > { %780 = vst.msk [vmem:[#allocation3 + $0x38] sm:$0xff] %vm773_vm5, %v5324_v36  ;;  %v758_v38 = vpop.permute.xlu0 %757 }
  0x9e   : > { %778 = vst.msk [vmem:[#allocation3 + $0x28] sm:$0xff] %vm773_vm5, %v758_v38 }
  0x9f   : > { %820 = vst.msk [vmem:[#allocation3 + $0x28] sm:$0xff] %vm817_vm6, %v5212_v54  ;;  %v866_v42 = vld [vmem:[#allocation3 + $0x18] sm:$0xff] }
  0xa0   : > { %v5343_v46 = vpack.c.bf16 %v866_v42, %v864_v39 }
  0xa2   : > { %3828 = vmatmul.msk.bf16.vlgmr.msra.gmra.mxu1 %vm1189_vm9, %v5343_v46  ;;  %3831 = vmatmul.msk.bf16.vlgmr.msra.gmra.mxu3 %vm1189_vm9, %v5343_v46 }
  0xa4   : > { %v720_v54 = vpop.permute.xlu2 %719  ;;  %v842_v55 = vpop.permute.xlu1 %841 }
  0xa5   : > { %736 = vst.msk [vmem:[#allocation3 + $0x20] sm:$0xff] %vm733_vm10, %v720_v54  ;;  %v806_v56 = vpop.permute.xlu0 %805 }
  0xa6   : > { %777 = vst.msk [vmem:[#allocation3 + $0x20] sm:$0xff] %vm771_vm11, %v758_v38 }
  0xa7   : > { %858 = vst.msk [vmem:[#allocation3 + $0x28] sm:$0xff] %vm855_vm7, %v842_v55 }
  0xa8   : > { %821 = vst.msk [vmem:[#allocation3 + $0x38] sm:$0xff] %vm817_vm6, %v806_v56 }
  0xa9   : > { %859 = vst.msk [vmem:[#allocation3 + $0x38] sm:$0xff] %vm855_vm7, %v5246_v62  ;;  %v4614_v62 = vld [vmem:[%s6583_s2 + $0x100] sm:$0xf0] }
  0xaa   : > { %v3779_v3 = vor.u32 %v4614_v62, %v3778_v19 }
  0xac   : > { %v718_v63 = vpop.permute.xlu1 %717  ;;  %v726_v6 = vpop.permute.xlu2 %725  ;;  %1324 = vmatpush.bf16.msrb.mxu3 %v3779_v3 }
  0xad   : > { %735 = vst.msk [vmem:[#allocation3 + $0x10] sm:$0xff] %vm733_vm10, %v718_v63  ;;  %v716_v4 = vpop.permute.xlu0 %715  ;;  %v867_v37 = vld [vmem:[#allocation3 + $0x20] sm:$0xff] }
  0xae   : > { %775 = vst.msk [vmem:[#allocation3 + $0x10] sm:$0xff] %vm771_vm11, %v5285_v20  ;;  %v868_v5 = vld [vmem:[#allocation3 + $0x28] sm:$0xff]  ;;  %v3754_v20 = vld [vmem:[%s6583_s2 + $0xc8] sm:$0xf] }
  0xaf   : > { %734 = vst.msk [vmem:[#allocation3] sm:$0xff] %vm733_vm10, %v716_v4  ;;  %v3755_v23 = vor.u32 %v4608_v21, %v3754_v20 }
  0xb0   : > { %772 = vst.msk [vmem:[#allocation3] sm:$0xff] %vm771_vm11, %v5248_v2  ;;  %v870_v7 = vld [vmem:[#allocation3 + $0x38] sm:$0xff]  ;;  %v4611_v2 = vld [vmem:[%s6583_s2 + $0xe8] sm:$0xf0] }
  0xb1   : > { %v878_v11 = vpack.c.bf16 %v870_v7, %v868_v5  ;;  %740 = vst.msk [vmem:[#allocation3 + $0x50] sm:$0xf] %vm739_vm12, %v726_v6  ;;  %v3767_v15 = vor.u32 %v4611_v2, %v3766_v14  ;;  %vm1632_vm12 = vcmask 982016  }
  0xb3   : > { %3829 = vmatmul.msk.bf16.gmra.mxu1 %vm1189_vm9, %v878_v11  ;;  %3832 = vmatmul.msk.bf16.gmra.mxu3 %vm1189_vm9, %v878_v11 }
  0xb4   : > { %v808_v22 = vpop.permute.xlu1 %807  ;;  %1325 = vmatpush.bf16.msrb.mxu3 %v3767_v15 }
  0xb5   : > { %822 = vst.msk [vmem:[#allocation3 + $0x48] sm:$0xff] %vm817_vm6, %v808_v22  ;;  %v764_v24 = vpop.permute.xlu0 %763  ;;  %v865_v25 = vld [vmem:[#allocation3 + $0x10] sm:$0xff]  ;;  %vm1374_vm6 = vcmask 781312  }
  0xb6   : > { %784 = vst.msk [vmem:[#allocation3 + $0x50] sm:$0xf] %vm783_vm13, %v764_v24 }
  0xb7   : > { %786 = vst.msk [vmem:[#allocation3 + $0x58] sm:$0xf] %vm785_vm14, %v764_v24  ;;  %v863_v26 = vld [vmem:[#allocation3] sm:$0xff] }
  0xb8   : > { %v875_v27 = vpack.c.bf16 %v865_v25, %v863_v26  ;;  %824 = vst.msk [vmem:[#allocation3 + $0x58] sm:$0xf] %vm823_vm15, %v5322_v35  ;;  %1326 = vmatpush.bf16.msrb.mxu3 %v3755_v23  ;;  %vm1921_vm15 = vcmask 719872  }
  0xba   : > { %1207 = vmatmul.bf16.vlgmr.msra.gmra.mxu0 %v875_v27  ;;  %1255 = vmatmul.bf16.vlgmr.msra.gmra.mxu2 %v875_v27 }
  0xbc   : > { %v848_v28 = vpop.permute.xlu1 %847 }
  0xbd   : > { %862 = vst.msk [vmem:[#allocation3 + $0x58] sm:$0xf] %vm861_vm1, %v848_v28  ;;  %v846_v29 = vpop.permute.xlu0 %845  ;;  %v873_v40 = vld [vmem:[#allocation3 + $0x50] sm:$0xf]  ;;  %vm2091_vm1 = vcmask 1043840  }
  0xbe   : > { %860 = vst.msk [vmem:[#allocation3 + $0x48] sm:$0xff] %vm855_vm7, %v846_v29  ;;  %vm1385_vm7 = vcmask 779264  }
  0xc4   : > { %v724_v30 = vpop.permute.xlu1 %723  ;;  %v874_v31 = vld [vmem:[#allocation3 + $0x58] sm:$0xf] }
  0xc5   : > { %738 = vst.msk [vmem:[#allocation3 + $0x40] sm:$0xff] %vm733_vm10, %v724_v30  ;;  %v722_v33 = vpop.permute.xlu0 %721  ;;  %v872_v34 = vld [vmem:[#allocation3 + $0x48] sm:$0xff] }
  0xc6   : > { %781 = vst.msk [vmem:[#allocation3 + $0x40] sm:$0xff] %vm771_vm11, %v5279_v16  ;;  %v880_v35 = vpack.c.bf16 %v874_v31, %v872_v34 }
  0xc7   : > { %737 = vst.msk [vmem:[#allocation3 + $0x30] sm:$0xff] %vm733_vm10, %v722_v33  ;;  %vm1455_vm10 = vcmask 359424  }
  0xc8   : > { %779 = vst.msk [vmem:[#allocation3 + $0x30] sm:$0xff] %vm771_vm11, %v5324_v36  ;;  %3830 = vmatmul.msk.bf16.gmra.mxu1 %vm1189_vm9, %v880_v35  ;;  %3833 = vmatmul.msk.bf16.gmra.mxu3 %vm1189_vm9, %v880_v35 }
  0xcd   : > { %v871_v16 = vld [vmem:[#allocation3 + $0x40] sm:$0xff] }
  0xce   : > { %v879_v41 = vpack.c.bf16 %v873_v40, %v871_v16 }
  0xcf   : > { %v869_v38 = vld [vmem:[#allocation3 + $0x30] sm:$0xff] }
  0xd0   : > { %v877_v39 = vpack.c.bf16 %v869_v38, %v867_v37 }
  0xd2   : > { %1212 = vmatmul.bf16.gmra.mxu0 %v877_v39  ;;  %1260 = vmatmul.bf16.gmra.mxu2 %v877_v39 }
  0xd8   : > { %1303 = vmatmul.bf16.vlgmr.msrb.gmra.mxu1 %v875_v27  ;;  %3834 = vmatmul.msk.bf16.vlgmr.msrb.gmra.mxu3 %vm1189_vm9, %v5343_v46  ;;  %v941_v46 = vld [vmem:[%s6584_s4] sm:$0x7]  ;;  %s6573_s4 = smov 120  }
  0xd9   : > { %v5443_v47 = vperm.slane %v941_v46, 0  ;;  %v5446_v51 = vperm.slane %v941_v46, 1  ;;  %v5453_v15 = vperm.slane %v941_v46, 2 }
  0xe2   : > { %1217 = vmatmul.bf16.gmra.mxu0 %v879_v41  ;;  %1265 = vmatmul.bf16.gmra.mxu2 %v879_v41 }
  0xe8   : > { %1308 = vmatmul.bf16.gmra.mxu1 %v877_v39  ;;  %3835 = vmatmul.msk.bf16.gmra.mxu3 %vm1189_vm9, %v878_v11 }
  0xf8   : > { %1313 = vmatmul.bf16.gmra.mxu1 %v879_v41  ;;  %3836 = vmatmul.msk.bf16.gmra.mxu3 %vm1189_vm9, %v880_v35 }
 0x11f   : > { %v1232_v36 = vpop.f32.mrf.mxu1 }
 0x125   : > { %v1280_v42 = vpop.f32.mrf.mxu3 }
 0x127   : > { %v1234_v43 = vpop.f32.mrf.mxu1 }
 0x12d   : > { %v1282_v44 = vpop.f32.mrf.mxu3 }
 0x130   : > { %v1237_v45 = vpop.f32.mrf.mxu1 }
 0x136   : > { %v1285_v49 = vpop.f32.mrf.mxu3 }
 0x137   : > { %v1208_v48 = vpop.f32.mrf.mxu0 }
 0x138   : > { %v1209_v50 = vadd.f32 %v1208_v48, %v5443_v47  ;;  %v1239_v52 = vpop.f32.mrf.mxu1 }
 0x13a   : > { %v1233_v54 = vadd.f32 %v1232_v36, %v1209_v50 }
 0x13c   : > { %v1343_v57 = vmax.f32 %v1233_v54, 0.0 }
 0x13d   : > { %v1256_v53 = vpop.f32.mrf.mxu2 }
 0x13e   : > { %v1257_v55 = vadd.f32 %v1256_v53, %v5446_v51  ;;  %v1287_v58 = vpop.f32.mrf.mxu3 }
 0x13f   : > { %v1210_v56 = vpop.f32.mrf.mxu0 }
 0x140   : > { %v1281_v8 = vadd.f32 %v1280_v42, %v1257_v55  ;;  %v1211_v1 = vadd.f32 %v1210_v56, %v5443_v47 }
 0x142   : > { %v1344_v0 = vmax.f32 %v1281_v8, 0.0  ;;  %v1235_v19 = vadd.f32 %v1234_v43, %v1211_v1 }
 0x144   : > { %v1361_v18 = vpack.c.bf16 %v1344_v0, %v1343_v57  ;;  %v1346_v63 = vmax.f32 %v1235_v19, 0.0 }
 0x145   : > { %v1258_v59 = vpop.f32.mrf.mxu2  ;;  %v1242_v60 = vpop.f32.mrf.mxu1 }
 0x146   : > { %1373 = vst [vmem:[#allocation2] sm:$0xff] %v1361_v18  ;;  %v1259_v61 = vadd.f32 %v1258_v59, %v5446_v51 }
 0x148   : > { %v1283_v62 = vadd.f32 %v1282_v44, %v1259_v61 }
 0x14a   : > { %v1347_v3 = vmax.f32 %v1283_v62, 0.0 }
 0x14b   : > { %v1290_v4 = vpop.f32.mrf.mxu3 }
 0x14c   : > { %v1363_v5 = vpack.c.bf16 %v1347_v3, %v1346_v63 }
 0x14d   : > { %v1244_v6 = vpop.f32.mrf.mxu1 }
 0x14e   : > { %1376 = vst [vmem:[#allocation2 + $0xc] sm:$0xff] %v1363_v5 }
 0x14f   : > { %v1213_v7 = vpop.f32.mrf.mxu0 }
 0x150   : > { %v1214_v9 = vadd.f32 %v1213_v7, %v5443_v47 }
 0x152   : > { %v1238_v14 = vadd.f32 %v1237_v45, %v1214_v9 }
 0x153   : > { %v1292_v10 = vpop.f32.mrf.mxu3 }
 0x154   : > { %v1349_v20 = vmax.f32 %v1238_v14, 0.0 }
 0x155   : > { %v1261_v11 = vpop.f32.mrf.mxu2  ;;  %v1304_v12 = vpop.f32.mrf.mxu1 }
 0x156   : > { %v1262_v2 = vadd.f32 %v1261_v11, %v5446_v51  ;;  %v1305_v22 = vadd.f32 %v1304_v12, %v5453_v15 }
 0x157   : > { %v1215_v13 = vpop.f32.mrf.mxu0 }
 0x158   : > { %v1286_v17 = vadd.f32 %v1285_v49, %v1262_v2  ;;  %v1216_v32 = vadd.f32 %v1215_v13, %v5443_v47 }
 0x15a   : > { %v1350_v21 = vmax.f32 %v1286_v17, 0.0  ;;  %v1240_v28 = vadd.f32 %v1239_v52, %v1216_v32 }
 0x15b   : > { %v1328_v23 = vpop.f32.mrf.mxu3 }
 0x15c   : > { %v1365_v24 = vpack.c.bf16 %v1350_v21, %v1349_v20  ;;  %v1329_v25 = vadd.f32 %v1328_v23, %v1305_v22  ;;  %v1352_v35 = vmax.f32 %v1240_v28, 0.0 }
 0x15d   : > { %v1263_v26 = vpop.f32.mrf.mxu2  ;;  %v1306_v27 = vpop.f32.mrf.mxu1 }
 0x15e   : > { %1378 = vst [vmem:[#allocation2 + $0x18] sm:$0xff] %v1365_v24  ;;  %v1345_v29 = vmax.f32 %v1329_v25, 0.0  ;;  %v1264_v30 = vadd.f32 %v1263_v26, %v5446_v51  ;;  %v1307_v38 = vadd.f32 %v1306_v27, %v5453_v15 }
 0x15f   : > { %v1218_v31 = vpop.f32.mrf.mxu0 }
 0x160   : > { %v1362_v33 = vpack.c.bf16 %v1345_v29, %v1345_v29  ;;  %v1288_v34 = vadd.f32 %v1287_v58, %v1264_v30  ;;  %v1219_v39 = vadd.f32 %v1218_v31, %v5443_v47 }
 0x162   : > { %1375 = vst.msk [vmem:[#allocation2 + $0x8] sm:$0xf] %vm1374_vm6, %v1362_v33  ;;  %v1353_v37 = vmax.f32 %v1288_v34, 0.0  ;;  %v1243_v43 = vadd.f32 %v1242_v60, %v1219_v39  ;;  %v4628_v33 = vld [vmem:[#allocation2 + $0x8] sm:$0xf0] }
 0x163   : > { %v1330_v16 = vpop.f32.mrf.mxu3  ;;  %v3845_v34 = vld [vmem:[#allocation2 + $0xc] sm:$0xf0] }
 0x164   : > { %v1367_v40 = vpack.c.bf16 %v1353_v37, %v1352_v35  ;;  %v1331_v41 = vadd.f32 %v1330_v16, %v1307_v38  ;;  %v1355_v50 = vmax.f32 %v1243_v43, 0.0  ;;  %v3843_v37 = vld [vmem:[#allocation2] sm:$0xf]  ;;  %v4627_v38 = vld [vmem:[#allocation2 + $0x4] sm:$0xf] }
 0x165   : > { %v1266_v36 = vpop.f32.mrf.mxu2  ;;  %v1309_v42 = vpop.f32.mrf.mxu1  ;;  %v3855_v26 = vld [vmem:[#allocation2 + $0x18] sm:$0xf]  ;;  %v4630_v27 = vld [vmem:[#allocation2 + $0x1c] sm:$0xf]  ;;  %v3844_v39 = vor.u32 %v4628_v33, %v3843_v37  ;;  %v3848_v16 = vor.u32 %v4627_v38, %v3845_v34  ;;  %v1401_v43 = vld [vmem:[%s6550_s7 + $0x8] sm:$0x7] }
 0x166   : > { %1380 = vst [vmem:[#allocation2 + $0x24] sm:$0xff] %v1367_v40  ;;  %v1348_v44 = vmax.f32 %v1331_v41, 0.0  ;;  %v1267_v45 = vadd.f32 %v1266_v36, %v5446_v51  ;;  %v1310_v53 = vadd.f32 %v1309_v42, %v5453_v15  ;;  %v4637_v41 = vld [vmem:[%s6551_s8] sm:$0xff] }
 0x167   : > { %v1220_v46 = vpop.f32.mrf.mxu0 }
 0x168   : > { %v1364_v48 = vpack.c.bf16 %v1348_v44, %v1348_v44  ;;  %v1291_v49 = vadd.f32 %v1290_v4, %v1267_v45  ;;  %v1221_v54 = vadd.f32 %v1220_v46, %v5443_v47  ;;  %v1527_v45 = vld [vmem:[%s6551_s8 + $0x8] sm:$0x7] }
 0x16a   : > { %1377 = vst.msk [vmem:[#allocation2 + $0x14] sm:$0xf] %vm1374_vm6, %v1364_v48  ;;  %v1356_v52 = vmax.f32 %v1291_v49, 0.0  ;;  %v1245_v1 = vadd.f32 %v1244_v6, %v1221_v54  ;;  %v1407_v49 = vunpack.c.l.b16 %v1401_v43 }
 0x16b   : > { %v1333_v55 = vpop.f32.mrf.mxu3 }
 0x16c   : > { %v1369_v56 = vpack.c.bf16 %v1356_v52, %v1355_v50  ;;  %v1334_v8 = vadd.f32 %v1333_v55, %v1310_v53  ;;  %v1358_v19 = vmax.f32 %v1245_v1, 0.0  ;;  %v1533_v52 = vunpack.c.l.b16 %v1527_v45 }
 0x16d   : > { %v1268_v57 = vpop.f32.mrf.mxu2  ;;  %v1311_v0 = vpop.f32.mrf.mxu1  ;;  %v4631_v23 = vld [vmem:[#allocation2 + $0x20] sm:$0xf0]  ;;  %v3857_v24 = vld [vmem:[#allocation2 + $0x24] sm:$0xf0]  ;;  %v1409_v54 = vpack.c.b16 %v1407_v49, %v1407_v49  ;;  %v5570_v49 = vld [vmem:[%s6556_s13 + $0x150] sm:$0xff] }
 0x16e   : > { %1382 = vst [vmem:[#allocation2 + $0x30] sm:$0xff] %v1369_v56  ;;  %v1351_v58 = vmax.f32 %v1334_v8, 0.0  ;;  %v1269_v18 = vadd.f32 %v1268_v57, %v5446_v51  ;;  %v1312_v62 = vadd.f32 %v1311_v0, %v5453_v15  ;;  %v3856_v29 = vor.u32 %v4631_v23, %v3855_v26  ;;  %v3851_v56 = vld [vmem:[#allocation2 + $0x8] sm:$0xf] }
 0x16f   : > { %v3860_v30 = vor.u32 %v4630_v27, %v3857_v24  ;;  %v1535_v8 = vpack.c.b16 %v1533_v52, %v1533_v52  ;;  %v4667_v23 = vld [vmem:[%s6556_s13 + $0xe4] sm:$0xf0]  ;;  %v4650_v24 = vld [vmem:[%s6556_s13 + $0x64] sm:$0xf] }
 0x170   : > { %v1366_v59 = vpack.c.bf16 %v1351_v58, %v1351_v58  ;;  %v1293_v60 = vadd.f32 %v1292_v10, %v1269_v18 }
 0x171   : > { %v4629_v55 = vld [vmem:[#allocation2 + $0x10] sm:$0xf0] }
 0x172   : > { %1379 = vst.msk [vmem:[#allocation2 + $0x20] sm:$0xf] %vm1374_vm6, %v1366_v59  ;;  %v1359_v61 = vmax.f32 %v1293_v60, 0.0  ;;  %v3852_v57 = vor.u32 %v4629_v55, %v3851_v56  ;;  %v3999_v55 = vld [vmem:[%s6556_s13 + $0xd0] sm:$0xf] }
 0x173   : > { %v1335_v63 = vpop.f32.mrf.mxu3 }
 0x174   : > { %v1371_v47 = vpack.c.bf16 %v1359_v61, %v1358_v19  ;;  %v1336_v3 = vadd.f32 %v1335_v63, %v1312_v62 }
 0x175   : > { %v1314_v4 = vpop.f32.mrf.mxu1  ;;  %v3867_v10 = vld [vmem:[#allocation2 + $0x30] sm:$0xf]  ;;  %v4633_v12 = vld [vmem:[#allocation2 + $0x34] sm:$0xf] }
 0x176   : > { %1384 = vst [vmem:[#allocation2 + $0x3c] sm:$0x33] %v1371_v47  ;;  %v1354_v5 = vmax.f32 %v1336_v3, 0.0  ;;  %v1315_v6 = vadd.f32 %v1314_v4, %v5453_v15 }
 0x178   : > { %v1368_v7 = vpack.c.bf16 %v1354_v5, %v1354_v5  ;;  %v3951_v5 = vld [vmem:[%s6556_s13 + $0x70] sm:$0xf] }
 0x179   : > { %v3863_v50 = vld [vmem:[#allocation2 + $0x20] sm:$0xf] }
 0x17a   : > { %1381 = vst.msk [vmem:[#allocation2 + $0x2c] sm:$0xf] %vm1374_vm6, %v1368_v7  ;;  %v4653_v7 = vld [vmem:[%s6556_s13 + $0x74] sm:$0xf0] }
 0x17b   : > { %v1338_v51 = vpop.f32.mrf.mxu3 }
 0x17c   : > { %v1339_v9 = vadd.f32 %v1338_v51, %v1315_v6  ;;  %v4015_v6 = vld [vmem:[%s6556_s13 + $0xf0] sm:$0xf]  ;;  %v3952_v51 = vor.u32 %v4653_v7, %v3951_v5  ;;  %v3929_v5 = vld [vmem:[%s6556_s13 + $0x48] sm:$0xf0] }
 0x17d   : > { %v4634_v11 = vld [vmem:[#allocation2 + $0x38] sm:$0x30]  ;;  %v3869_v14 = vld [vmem:[#allocation2 + $0x3c] sm:$0x30]  ;;  %v1316_v20 = vpop.f32.mrf.mxu1 }
 0x17e   : > { %v1357_v2 = vmax.f32 %v1339_v9, 0.0  ;;  %v3868_v13 = vor.u32 %v4634_v11, %v3867_v10  ;;  %v3872_v17 = vor.u32 %v4633_v12, %v3869_v14  ;;  %v1317_v25 = vadd.f32 %v1316_v20, %v5453_v15  ;;  %v4636_v15 = vld [vmem:[%s6550_s7] sm:$0xff]  ;;  %v4669_v9 = vld [vmem:[%s6556_s13 + $0xf4] sm:$0xf0]  ;;  %v4652_v10 = vld [vmem:[%s6556_s13 + $0x74] sm:$0xf] }
 0x17f   : > { %v3953_v11 = vld [vmem:[%s6556_s13 + $0x78] sm:$0xf0]  ;;  %v4016_v14 = vor.u32 %v4669_v9, %v4015_v6  ;;  %v4007_v20 = vld [vmem:[%s6556_s13 + $0xe0] sm:$0xf]  ;;  %v4677_v9 = vld [vmem:[%s6556_s13 + $0x134] sm:$0xf0] }
 0x180   : > { %v1370_v21 = vpack.c.bf16 %v1357_v2, %v1357_v2  ;;  %v1463_v22 = vsel %vm741_vm2, %v3868_v13, 0  ;;  %v1466_v32 = vsel %vm741_vm2, %v3872_v17, 0  ;;  %v3956_v2 = vor.u32 %v4652_v10, %v3953_v11  ;;  %v3943_v13 = vld [vmem:[%s6556_s13 + $0x60] sm:$0xf]  ;;  %v4651_v17 = vld [vmem:[%s6556_s13 + $0x64] sm:$0xf0] }
 0x181   : > { %1476 = vmatpush.bf16.msrb.mxu0 %v1463_v22  ;;  %1494 = vmatpush.bf16.msrb.mxu2 %v1466_v32  ;;  %v4632_v48 = vld [vmem:[#allocation2 + $0x28] sm:$0xf0]  ;;  %v4008_v27 = vor.u32 %v4667_v23, %v4007_v20  ;;  %v3919_v11 = vld [vmem:[%s6556_s13 + $0x30] sm:$0xf]  ;;  %v3921_v20 = vld [vmem:[%s6556_s13 + $0x38] sm:$0xf0] }
 0x182   : > { %1383 = vst.msk [vmem:[#allocation2 + $0x38] sm:$0xf] %vm1374_vm6, %v1370_v21  ;;  %1565 = vmatpush.bf16.msra.mxu1 %v1466_v32  ;;  %v3864_v53 = vor.u32 %v4632_v48, %v3863_v50  ;;  %v3944_v32 = vor.u32 %v4651_v17, %v3943_v13  ;;  %v1833_v50 = vunpack.c.l.b16 %v5570_v49  ;;  %v4661_v13 = vld [vmem:[%s6556_s13 + $0xb4] sm:$0xf0]  ;;  %v4644_v17 = vld [vmem:[%s6556_s13 + $0x34] sm:$0xf] }
 0x183   : > { %v1340_v28 = vpop.f32.mrf.mxu3  ;;  %v3924_v23 = vor.u32 %v4644_v17, %v3921_v20  ;;  %v4057_v17 = vld [vmem:[%s6556_s13 + $0x148] sm:$0xf0] }
 0x184   : > { %v1341_v31 = vadd.f32 %v1340_v28, %v1317_v25  ;;  %v3945_v25 = vld [vmem:[%s6556_s13 + $0x68] sm:$0xf0]  ;;  %v1877_v52 = vpack.c.b16 %v1833_v50, %v1833_v50 }
 0x185   : > { %1477 = vmatpush.bf16.msrb.mxu0 %v3856_v29  ;;  %1495 = vmatpush.bf16.msrb.mxu2 %v3860_v30  ;;  %v3948_v28 = vor.u32 %v4650_v24, %v3945_v25  ;;  %v4039_v24 = vld [vmem:[%s6556_s13 + $0x120] sm:$0xf]  ;;  %v4675_v25 = vld [vmem:[%s6556_s13 + $0x124] sm:$0xf0] }
 0x186   : > { %v1360_v35 = vmax.f32 %v1341_v31, 0.0  ;;  %1566 = vmatpush.bf16.msra.mxu1 %v3860_v30  ;;  %v1929_v56 = vsel %vm825_vm0, %v1877_v52, 0  ;;  %v4657_v52 = vld [vmem:[%s6556_s13 + $0x94] sm:$0xf0] }
 0x188   : > { %v1372_v40 = vpack.c.bf16 %v1360_v35, %v1360_v35 }
 0x189   : > { %1478 = vmatpush.bf16.msrb.mxu0 %v3844_v39  ;;  %1496 = vmatpush.bf16.msrb.mxu2 %v3848_v16  ;;  %v3875_v36 = vld [vmem:[#allocation2 + $0x38] sm:$0xf] }
 0x18a   : > { %1386 = vst.msk [vmem:[#allocation2 + $0x44] sm:$0x3] %vm1385_vm7, %v1372_v40  ;;  %1567 = vmatpush.bf16.msra.mxu1 %v3848_v16  ;;  %vm2087_vm7 = vcmask 785408  }
 0x18c   : > { %3877 = vmatmul.msk.bf16.vlgmr.msrb.gmra.mxu0 %vm1455_vm10, %v4636_v15  ;;  %3879 = vmatmul.msk.bf16.vlgmr.msrb.gmra.mxu2 %vm1455_vm10, %v4636_v15 }
 0x18d   : > { %1547 = vmatpush.bf16.msra.mxu2 %v1463_v22  ;;  %3889 = vmatmul.msk.bf16.vlgmr.msra.gmra.mxu1 %vm1455_vm10, %v4637_v41 }
 0x18e   : > { %1972 = vmatpush.bf16.msrb.mxu1 %v1929_v56 }
 0x191   : > { %1548 = vmatpush.bf16.msra.mxu2 %v3856_v29  ;;  %v4635_v42 = vld [vmem:[#allocation2 + $0x40] sm:$0x30] }
 0x192   : > { %v3876_v44 = vor.u32 %v4635_v42, %v3875_v36 }
 0x194   : > { %v1469_v46 = vsel %vm741_vm2, %v3876_v44, 0 }
 0x195   : > { %1549 = vmatpush.bf16.msra.mxu2 %v3844_v39  ;;  %1512 = vmatpush.bf16.msra.mxu0 %v1469_v46 }
 0x196   : > { %1583 = vmatpush.bf16.msra.mxu3 %v1469_v46 }
 0x199   : > { %1513 = vmatpush.bf16.msra.mxu0 %v3864_v53  ;;  %1952 = vmatpush.bf16.msrb.mxu2 %v4016_v14  ;;  %v3983_v14 = vld [vmem:[%s6556_s13 + $0xb0] sm:$0xf] }
 0x19a   : > { %1584 = vmatpush.bf16.msra.mxu3 %v3864_v53  ;;  %v3935_v53 = vld [vmem:[%s6556_s13 + $0x50] sm:$0xf] }
 0x19c   : > { %3878 = vmatmul.msk.bf16.gmra.mxu0 %vm1455_vm10, %v1409_v54  ;;  %3880 = vmatmul.msk.bf16.gmra.mxu2 %vm1455_vm10, %v1409_v54 }
 0x19d   : > { %1514 = vmatpush.bf16.msra.mxu0 %v3852_v57  ;;  %3890 = vmatmul.msk.bf16.gmra.mxu1 %vm1455_vm10, %v1535_v8 }
 0x19e   : > { %1585 = vmatpush.bf16.msra.mxu3 %v3852_v57  ;;  %1953 = vmatpush.bf16.msrb.mxu2 %v4008_v27  ;;  %v4665_v57 = vld [vmem:[%s6556_s13 + $0xd4] sm:$0xf0]  ;;  %v3911_v27 = vld [vmem:[%s6556_s13 + $0x20] sm:$0xf] }
 0x1a1   : > { %3891 = vmatmul.msk.bf16.vlgmr.msra.gmra.mxu3 %vm1455_vm10, %v4637_v41  ;;  %1934 = vmatpush.bf16.msrb.mxu0 %v3952_v51  ;;  %v4047_v51 = vld [vmem:[%s6556_s13 + $0x130] sm:$0xf] }
 0x1a2   : > { %1988 = vmatpush.bf16.msrb.mxu3 %v3956_v2  ;;  %v4048_v10 = vor.u32 %v4677_v9, %v4047_v51  ;;  %v4664_v51 = vld [vmem:[%s6556_s13 + $0xd4] sm:$0xf]  ;;  %v4001_v9 = vld [vmem:[%s6556_s13 + $0xd8] sm:$0xf0] }
 0x1a5   : > { %1935 = vmatpush.bf16.msrb.mxu0 %v3944_v32  ;;  %v3984_v32 = vor.u32 %v4661_v13, %v3983_v14  ;;  %v4678_v13 = vld [vmem:[%s6556_s13 + $0x144] sm:$0xf] }
 0x1a6   : > { %1989 = vmatpush.bf16.msrb.mxu3 %v3948_v28  ;;  %v4643_v28 = vld [vmem:[%s6556_s13 + $0x24] sm:$0xf0] }
 0x1ac   : > { %3881 = vmatmul.msk.bf16.vlgmr.msra.gmra.mxu0 %vm1455_vm10, %v4636_v15  ;;  %3887 = vmatmul.msk.bf16.vlgmr.msra.gmra.mxu2 %vm1455_vm10, %v4637_v41 }
 0x1b1   : > { %3892 = vmatmul.msk.bf16.gmra.mxu3 %vm1455_vm10, %v1535_v8 }
 0x1bc   : > { %3882 = vmatmul.msk.bf16.gmra.mxu0 %vm1455_vm10, %v1409_v54  ;;  %3888 = vmatmul.msk.bf16.gmra.mxu2 %vm1455_vm10, %v1535_v8  ;;  %v4649_v54 = vld [vmem:[%s6556_s13 + $0x54] sm:$0xf0]  ;;  %vm3165_vm10 = vcmask 64512  }
 0x1bd   : > { %v3936_v8 = vor.u32 %v4649_v54, %v3935_v53  ;;  %v4640_v53 = vld [vmem:[%s6556_s13 + $0x14] sm:$0xf]  ;;  %v3905_v54 = vld [vmem:[%s6556_s13 + $0x18] sm:$0xf0] }
 0x1be   : > { %v3908_v56 = vor.u32 %v4640_v53, %v3905_v54 }
 0x1bf   : > { %1936 = vmatpush.bf16.msrb.mxu0 %v3936_v8  ;;  %v4023_v8 = vld [vmem:[%s6556_s13 + $0x100] sm:$0xf] }
 0x209   : > { %v1480_v0 = vpop.f32.mrf.mxu0 }
 0x20a   : > { %v1569_v1 = vpop.f32.mrf.mxu1 }
 0x20f   : > { %v1498_v58 = vpop.f32.mrf.mxu2 }
 0x210   : > { %v5526_v21 = vmax.f32 %v1498_v58, %v1569_v1  ;;  %v4000_v1 = vor.u32 %v4665_v57, %v3999_v55  ;;  %v3937_v58 = vld [vmem:[%s6556_s13 + $0x58] sm:$0xf0]  ;;  %v4671_v57 = vld [vmem:[%s6556_s13 + $0x104] sm:$0xf0] }
 0x211   : > { %v1482_v18 = vpop.f32.mrf.mxu0 }
 0x212   : > { %v1571_v59 = vpop.f32.mrf.mxu1  ;;  %1954 = vmatpush.bf16.msrb.mxu2 %v4000_v1  ;;  %v3895_v1 = vld [vmem:[%s6556_s13] sm:$0xf] }
 0x217   : > { %v1500_v60 = vpop.f32.mrf.mxu2 }
 0x218   : > { %v5542_v33 = vmax.f32 %v1500_v60, %v1571_v59  ;;  %v4679_v59 = vld [vmem:[%s6556_s13 + $0x144] sm:$0xf0] }
 0x219   : > { %v1485_v19 = vpop.f32.mrf.mxu0 }
 0x21a   : > { %v1574_v61 = vpop.f32.mrf.mxu1 }
 0x21f   : > { %v1503_v62 = vpop.f32.mrf.mxu2 }
 0x220   : > { %v5553_v15 = vmax.f32 %v1503_v62, %v1574_v61  ;;  %v3927_v61 = vld [vmem:[%s6556_s13 + $0x40] sm:$0xf]  ;;  %v4647_v62 = vld [vmem:[%s6556_s13 + $0x44] sm:$0xf0] }
 0x221   : > { %v1487_v63 = vpop.f32.mrf.mxu0 }
 0x222   : > { %v1576_v3 = vpop.f32.mrf.mxu1  ;;  %v3991_v63 = vld [vmem:[%s6556_s13 + $0xc0] sm:$0xf] }
 0x223   : > { %v4663_v3 = vld [vmem:[%s6556_s13 + $0xc4] sm:$0xf0] }
 0x224   : > { %v1587_v47 = vpop.f32.mrf.mxu3  ;;  %v3992_v7 = vor.u32 %v4663_v3, %v3991_v63  ;;  %v4017_v3 = vld [vmem:[%s6556_s13 + $0xf8] sm:$0xf0] }
 0x226   : > { %1955 = vmatpush.bf16.msrb.mxu2 %v3992_v7  ;;  %v4009_v7 = vld [vmem:[%s6556_s13 + $0xe8] sm:$0xf0] }
 0x227   : > { %v1505_v4 = vpop.f32.mrf.mxu2 }
 0x228   : > { %v4646_v4 = vld [vmem:[%s6556_s13 + $0x44] sm:$0xf] }
 0x229   : > { %v1516_v12 = vpop.f32.mrf.mxu0  ;;  %v3932_v6 = vor.u32 %v4646_v4, %v3929_v5  ;;  %v4666_v5 = vld [vmem:[%s6556_s13 + $0xe4] sm:$0xf] }
 0x22a   : > { %v5528_v22 = vmax.f32 %v1516_v12, %v1587_v47  ;;  %v3928_v47 = vor.u32 %v4647_v62, %v3927_v61  ;;  %v4645_v12 = vld [vmem:[%s6556_s13 + $0x34] sm:$0xf0]  ;;  %1956 = vmatpush.bf16.msrb.mxu2 %v3984_v32  ;;  %v3897_v61 = vld [vmem:[%s6556_s13 + $0x8] sm:$0xf0]  ;;  %v4060_v32 = vor.u32 %v4678_v13, %v4057_v17 }
 0x22b   : > { %v3920_v2 = vor.u32 %v4645_v12, %v3919_v11  ;;  %v4004_v11 = vor.u32 %v4664_v51, %v4001_v9  ;;  %v4662_v12 = vld [vmem:[%s6556_s13 + $0xc4] sm:$0xf] }
 0x22c   : > { %v1589_v26 = vpop.f32.mrf.mxu3  ;;  %v4822_v29 = vpack.i.bf16 %v5528_v22, %v5526_v21  ;;  %1937 = vmatpush.bf16.msrb.mxu0 %v3928_v47  ;;  %v4668_v47 = vld [vmem:[%s6556_s13 + $0xf4] sm:$0xf] }
 0x22d   : > { %v4020_v4 = vor.u32 %v4668_v47, %v4017_v3 }
 0x22e   : > { %4823 = vrot.lane.b32.xlu0 %v4822_v29, %s6573_s4  ;;  %v3975_v29 = vld [vmem:[%s6556_s13 + $0xa0] sm:$0xf] }
 0x22f   : > { %v1551_v30 = vpop.f32.mrf.mxu2 }
 0x230   : > { %v5549_v39 = vmax.f32 %v1480_v0, %v1551_v30  ;;  %v4648_v0 = vld [vmem:[%s6556_s13 + $0x54] sm:$0xf]  ;;  %1938 = vmatpush.bf16.msrb.mxu0 %v3920_v2  ;;  %v3912_v30 = vor.u32 %v4643_v28, %v3911_v27  ;;  %v3993_v2 = vld [vmem:[%s6556_s13 + $0xc8] sm:$0xf0]  ;;  %v4049_v27 = vld [vmem:[%s6556_s13 + $0x138] sm:$0xf0] }
 0x231   : > { %v1518_v31 = vpop.f32.mrf.mxu0  ;;  %v3940_v60 = vor.u32 %v4648_v0, %v3937_v58  ;;  %v4024_v0 = vor.u32 %v4671_v57, %v4023_v8  ;;  %v4639_v58 = vld [vmem:[%s6556_s13 + $0x4] sm:$0xf0]  ;;  %v3996_v20 = vor.u32 %v4662_v12, %v3993_v2 }
 0x232   : > { %v5544_v34 = vmax.f32 %v1518_v31, %v1589_v26  ;;  %v4040_v26 = vor.u32 %v4675_v25, %v4039_v24  ;;  %v4659_v31 = vld [vmem:[%s6556_s13 + $0xa4] sm:$0xf0]  ;;  %v3985_v24 = vld [vmem:[%s6556_s13 + $0xb8] sm:$0xf0]  ;;  %v4676_v25 = vld [vmem:[%s6556_s13 + $0x134] sm:$0xf] }
 0x233   : > { %1990 = vmatpush.bf16.msrb.mxu3 %v3940_v60  ;;  %v4655_v60 = vld [vmem:[%s6556_s13 + $0x84] sm:$0xf0]  ;;  %v4052_v28 = vor.u32 %v4676_v25, %v4049_v27 }
 0x234   : > { %v1592_v35 = vpop.f32.mrf.mxu3  ;;  %v4827_v37 = vpack.i.bf16 %v5544_v34, %v5542_v33  ;;  %1939 = vmatpush.bf16.msrb.mxu0 %v3912_v30  ;;  %v3977_v30 = vld [vmem:[%s6556_s13 + $0xa8] sm:$0xf0]  ;;  %v4689_v27 = vld [vmem:[%s6585_s30 + $0x44] sm:$0xf0] }
 0x236   : > { %4828 = vrot.lane.b32.xlu1 %v4827_v37, %s6573_s4  ;;  %v3913_v37 = vld [vmem:[%s6556_s13 + $0x28] sm:$0xf0] }
 0x237   : > { %v1553_v38 = vpop.f32.mrf.mxu2  ;;  %1991 = vmatpush.bf16.msrb.mxu3 %v3932_v6  ;;  %v4012_v6 = vor.u32 %v4666_v5, %v4009_v7 }
 0x238   : > { %v5551_v16 = vmax.f32 %v1482_v18, %v1553_v38  ;;  %v4055_v18 = vld [vmem:[%s6556_s13 + $0x140] sm:$0xf]  ;;  %v3976_v38 = vor.u32 %v4659_v31, %v3975_v29  ;;  %v4658_v29 = vld [vmem:[%s6556_s13 + $0xa4] sm:$0xf] }
 0x239   : > { %v1521_v40 = vpop.f32.mrf.mxu0  ;;  %v4674_v31 = vld [vmem:[%s6556_s13 + $0x124] sm:$0xf] }
 0x23a   : > { %v4832_v41 = vpack.i.bf16 %v5551_v16, %v5549_v39  ;;  %v5557_v36 = vmax.f32 %v1521_v40, %v1592_v35  ;;  %v4642_v35 = vld [vmem:[%s6556_s13 + $0x24] sm:$0xf]  ;;  %1957 = vmatpush.bf16.msrb.mxu2 %v3976_v38  ;;  %v4041_v38 = vld [vmem:[%s6556_s13 + $0x128] sm:$0xf0] }
 0x23b   : > { %1992 = vmatpush.bf16.msrb.mxu3 %v3924_v23  ;;  %v3916_v40 = vor.u32 %v4642_v35, %v3913_v37  ;;  %v4660_v23 = vld [vmem:[%s6556_s13 + $0xb4] sm:$0xf]  ;;  %v3980_v37 = vor.u32 %v4658_v29, %v3977_v30  ;;  %v4091_v29 = vld [vmem:[%s6585_s30 + $0x30] sm:$0xf]  ;;  %v4687_v30 = vld [vmem:[%s6585_s30 + $0x34] sm:$0xf0] }
 0x23c   : > { %v1594_v42 = vpop.f32.mrf.mxu3  ;;  %v4837_v43 = vpack.i.bf16 %v5557_v36, %v5553_v15  ;;  %4833 = vrot.lane.b32.xlu2 %v4832_v41, %s6573_s4  ;;  %v4031_v41 = vld [vmem:[%s6556_s13 + $0x110] sm:$0xf] }
 0x23d   : > { %v4673_v42 = vld [vmem:[%s6556_s13 + $0x114] sm:$0xf0] }
 0x23e   : > { %4838 = vrot.lane.b32.xlu0 %v4837_v43, %s6573_s4  ;;  %v4032_v43 = vor.u32 %v4673_v42, %v4031_v41  ;;  %v4656_v41 = vld [vmem:[%s6556_s13 + $0x94] sm:$0xf]  ;;  %v3969_v42 = vld [vmem:[%s6556_s13 + $0x98] sm:$0xf0] }
 0x23f   : > { %v1556_v44 = vpop.f32.mrf.mxu2  ;;  %1993 = vmatpush.bf16.msrb.mxu3 %v3916_v40  ;;  %v4044_v40 = vor.u32 %v4674_v31, %v4041_v38  ;;  %v4092_v31 = vor.u32 %v4687_v30, %v4091_v29 }
 0x240   : > { %v5563_v45 = vmax.f32 %v1485_v19, %v1556_v44  ;;  %v4056_v19 = vor.u32 %v4679_v59, %v4055_v18  ;;  %v3903_v44 = vld [vmem:[%s6556_s13 + $0x10] sm:$0xf]  ;;  %v3959_v18 = vld [vmem:[%s6556_s13 + $0x80] sm:$0xf]  ;;  %v3896_v59 = vor.u32 %v4639_v58, %v3895_v1  ;;  %v4025_v1 = vld [vmem:[%s6556_s13 + $0x108] sm:$0xf0] }
 0x241   : > { %v1523_v46 = vpop.f32.mrf.mxu0  ;;  %v3960_v62 = vor.u32 %v4655_v60, %v3959_v18 }
 0x242   : > { %1626 = vrot.lane.b32.xlu1 %v5563_v45, %s6573_s4  ;;  %1973 = vmatpush.bf16.msrb.mxu1 %v4056_v19  ;;  %v4641_v46 = vld [vmem:[%s6556_s13 + $0x14] sm:$0xf0]  ;;  %v4638_v19 = vld [vmem:[%s6556_s13 + $0x4] sm:$0xf]  ;;  %s6586_s4 = smov 96  }
 0x243   : > { %v3904_v50 = vor.u32 %v4641_v46, %v3903_v44  ;;  %1994 = vmatpush.bf16.msrb.mxu3 %v3908_v56  ;;  %v3900_v63 = vor.u32 %v4638_v19, %v3897_v61  ;;  %v4672_v44 = vld [vmem:[%s6556_s13 + $0x114] sm:$0xf]  ;;  %v4033_v46 = vld [vmem:[%s6556_s13 + $0x118] sm:$0xf0]  ;;  %v3961_v56 = vld [vmem:[%s6556_s13 + $0x88] sm:$0xf0] }
 0x244   : > { %v4036_v54 = vor.u32 %v4672_v44, %v4033_v46  ;;  %v4681_v44 = vld [vmem:[%s6585_s30 + $0x4] sm:$0xf0] }
 0x245   : > { %1940 = vmatpush.bf16.msrb.mxu0 %v3904_v50 }
 0x246   : > { %1974 = vmatpush.bf16.msrb.mxu1 %v4048_v10  ;;  %v1834_v10 = vunpack.c.h.b16 %v5570_v49 }
 0x247   : > { %v1558_v48 = vpop.f32.mrf.mxu2  ;;  %1995 = vmatpush.bf16.msrb.mxu3 %v3900_v63 }
 0x248   : > { %v3967_v48 = vld [vmem:[%s6556_s13 + $0x90] sm:$0xf]  ;;  %v1878_v14 = vpack.c.b16 %v1834_v10, %v1834_v10 }
 0x249   : > { %v3968_v55 = vor.u32 %v4657_v52, %v3967_v48  ;;  %1941 = vmatpush.bf16.msrb.mxu0 %v3896_v59  ;;  %v3972_v52 = vor.u32 %v4656_v41, %v3969_v42  ;;  %v4683_v41 = vld [vmem:[%s6585_s30 + $0x14] sm:$0xf0] }
 0x24a   : > { %1975 = vmatpush.bf16.msrb.mxu1 %v4040_v26  ;;  %v1932_v49 = vsel %vm825_vm0, %v1878_v14, 0  ;;  %v3988_v26 = vor.u32 %v4660_v23, %v3985_v24  ;;  %v4107_v23 = vld [vmem:[%s6585_s30 + $0x50] sm:$0xf]  ;;  %v4691_v24 = vld [vmem:[%s6585_s30 + $0x54] sm:$0xf0] }
 0x24b   : > { %1958 = vmatpush.bf16.msrb.mxu2 %v3968_v55  ;;  %v4654_v55 = vld [vmem:[%s6556_s13 + $0x84] sm:$0xf]  ;;  %v4108_v25 = vor.u32 %v4691_v24, %v4107_v23 }
 0x24c   : > { %v3964_v61 = vor.u32 %v4654_v55, %v3961_v56 }
 0x24d   : > { %2006 = vmatpush.bf16.msra.mxu0 %v4020_v4 }
 0x24e   : > { %1976 = vmatpush.bf16.msrb.mxu1 %v4032_v43 }
 0x24f   : > { %1959 = vmatpush.bf16.msrb.mxu2 %v3960_v62 }
 0x251   : > { %2007 = vmatpush.bf16.msra.mxu0 %v4012_v6 }
 0x252   : > { %1977 = vmatpush.bf16.msrb.mxu1 %v4024_v0  ;;  %v4670_v0 = vld [vmem:[%s6556_s13 + $0x104] sm:$0xf] }
 0x253   : > { %2026 = vmatpush.bf16.msra.mxu2 %v1932_v49  ;;  %v4028_v3 = vor.u32 %v4670_v0, %v4025_v1  ;;  %v4123_v49 = vld [vmem:[%s6585_s30 + $0x70] sm:$0xf] }
 0x255   : > { %2008 = vmatpush.bf16.msra.mxu0 %v4004_v11 }
 0x257   : > { %2027 = vmatpush.bf16.msra.mxu2 %v4060_v32 }
 0x259   : > { %2009 = vmatpush.bf16.msra.mxu0 %v3996_v20  ;;  %v4695_v20 = vld [vmem:[%s6585_s30 + $0x74] sm:$0xf0] }
 0x25b   : > { %2028 = vmatpush.bf16.msra.mxu2 %v4052_v28 }
 0x25d   : > { %2010 = vmatpush.bf16.msra.mxu0 %v3988_v26  ;;  %v4099_v26 = vld [vmem:[%s6585_s30 + $0x40] sm:$0xf] }
 0x25e   : > { %v4100_v28 = vor.u32 %v4689_v27, %v4099_v26 }
 0x25f   : > { %2029 = vmatpush.bf16.msra.mxu2 %v4044_v40  ;;  %v4075_v40 = vld [vmem:[%s6585_s30 + $0x10] sm:$0xf] }
 0x260   : > { %v4076_v42 = vor.u32 %v4683_v41, %v4075_v40  ;;  %v4187_v41 = vld [vmem:[%s6585_s30 + $0xf0] sm:$0xf] }
 0x261   : > { %2011 = vmatpush.bf16.msra.mxu0 %v3980_v37  ;;  %v4685_v37 = vld [vmem:[%s6585_s30 + $0x24] sm:$0xf0] }
 0x263   : > { %2030 = vmatpush.bf16.msra.mxu2 %v4036_v54 }
 0x265   : > { %2012 = vmatpush.bf16.msra.mxu0 %v3972_v52 }
 0x267   : > { %2031 = vmatpush.bf16.msra.mxu2 %v4028_v3 }
 0x269   : > { %2013 = vmatpush.bf16.msra.mxu0 %v3964_v61 }
 0x296   : > { %v4834_v43 = vpop.permute.xlu2 %4833 }
 0x297   : > { %v4835_v53 = vunpack.i.l.bf16 %v4834_v43  ;;  %v4836_v8 = vunpack.i.h.bf16 %v4834_v43  ;;  %v4067_v43 = vld [vmem:[%s6585_s30] sm:$0xf] }
 0x298   : > { %v4068_v46 = vor.u32 %v4681_v44, %v4067_v43  ;;  %v4179_v43 = vld [vmem:[%s6585_s30 + $0xe0] sm:$0xf] }
 0x2a0   : > { %v4824_v35 = vpop.permute.xlu0 %4823 }
 0x2a1   : > { %v4826_v48 = vunpack.i.h.bf16 %v4824_v35  ;;  %v4825_v50 = vunpack.i.l.bf16 %v4824_v35  ;;  %v4083_v35 = vld [vmem:[%s6585_s30 + $0x20] sm:$0xf] }
 0x2a2   : > { %v4084_v38 = vor.u32 %v4685_v37, %v4083_v35 }
 0x2a3   : > { %v1633_v58 = vsel %vm1632_vm12, %v4835_v53, %v4825_v50  ;;  %v1634_v18 = vsel %vm1632_vm12, %v4825_v50, %v4826_v48  ;;  %v1650_v19 = vmax.f32 %v5528_v22, %v4826_v48 }
 0x2a4   : > { %v1648_v4 = vmax.f32 %v5549_v39, %v1633_v58  ;;  %v1649_v5 = vmax.f32 %v5526_v21, %v1634_v18 }
 0x2a8   : > { %v4829_v57 = vpop.permute.xlu1 %4828 }
 0x2a9   : > { %v4831_v59 = vunpack.i.h.bf16 %v4829_v57  ;;  %v4830_v60 = vunpack.i.l.bf16 %v4829_v57 }
 0x2ab   : > { %v1653_v62 = vmax.f32 %v5544_v34, %v4831_v59  ;;  %v1635_v63 = vsel %vm1632_vm12, %v4836_v8, %v4830_v60  ;;  %v1636_v47 = vsel %vm1632_vm12, %v4830_v60, %v4831_v59 }
 0x2ac   : > { %v1651_v7 = vmax.f32 %v5551_v16, %v1635_v63  ;;  %v1652_v6 = vmax.f32 %v5542_v33, %v1636_v47 }
 0x2ad   : > { %v1659_v22 = vpack.c.bf16 %v1653_v62, %v1650_v19 }
 0x2ae   : > { %v1658_v51 = vpack.c.bf16 %v1652_v6, %v1649_v5  ;;  %v1657_v9 = vpack.c.bf16 %v1651_v7, %v1648_v4 }
 0x2af   : > { %4061 = vmatmul.msk.bf16.vlgmr.msrb.gmra.mxu1 %vm1921_vm15, %v1659_v22 }
 0x2b0   : > { %1960 = vmatmul.bf16.vlgmr.msrb.gmra.mxu2 %v1658_v51  ;;  %v4839_v34 = vpop.permute.xlu0 %4838  ;;  %1942 = vmatmul.bf16.vlgmr.msrb.gmra.mxu0 %v1657_v9 }
 0x2b1   : > { %1996 = vmatmul.bf16.vlgmr.msrb.gmra.mxu3 %v1657_v9  ;;  %v4841_v10 = vunpack.i.h.bf16 %v4839_v34  ;;  %v4840_v11 = vunpack.i.l.bf16 %v4839_v34 }
 0x2b3   : > { %v1638_v16 = vsel %vm1632_vm12, %v4840_v11, %v4841_v10  ;;  %v1656_v33 = vmax.f32 %v5557_v36, %v4841_v10  ;;  %v4124_v36 = vor.u32 %v4695_v20, %v4123_v49 }
 0x2b4   : > { %v1627_v39 = vpop.permute.xlu1 %1626  ;;  %v1655_v14 = vmax.f32 %v5553_v15, %v1638_v16  ;;  %v4115_v15 = vld [vmem:[%s6585_s30 + $0x60] sm:$0xf] }
 0x2b5   : > { %v1637_v21 = vsel %vm1632_vm12, %v1627_v39, %v4840_v11  ;;  %v1662_v2 = vpack.c.bf16 %v1656_v33, %v1656_v33  ;;  %2570 = vmatpush.bf16.msra.mxu1 %v4124_v36 }
 0x2b6   : > { %v1654_v12 = vmax.f32 %v5563_v45, %v1637_v21  ;;  %v1661_v17 = vpack.c.bf16 %v1655_v14, %v1655_v14  ;;  %v4693_v45 = vld [vmem:[%s6585_s30 + $0x64] sm:$0xf0] }
 0x2b7   : > { %v4116_v32 = vor.u32 %v4693_v45, %v4115_v15 }
 0x2b8   : > { %v1660_v13 = vpack.c.bf16 %v1654_v12, %v1654_v12 }
 0x2b9   : > { %2571 = vmatpush.bf16.msra.mxu1 %v4116_v32 }
 0x2bd   : > { %2572 = vmatpush.bf16.msra.mxu1 %v4108_v25 }
 0x2bf   : > { %4062 = vmatmul.msk.bf16.gmra.mxu1 %vm1921_vm15, %v1662_v2 }
 0x2c0   : > { %1947 = vmatmul.bf16.gmra.mxu0 %v1660_v13  ;;  %1965 = vmatmul.bf16.gmra.mxu2 %v1661_v17 }
 0x2c1   : > { %2001 = vmatmul.bf16.gmra.mxu3 %v1660_v13  ;;  %2573 = vmatpush.bf16.msra.mxu1 %v4100_v28 }
 0x2c5   : > { %2574 = vmatpush.bf16.msra.mxu1 %v4092_v31 }
 0x2c9   : > { %2575 = vmatpush.bf16.msra.mxu1 %v4084_v38 }
 0x2cd   : > { %2576 = vmatpush.bf16.msra.mxu1 %v4076_v42  ;;  %v4711_v42 = vld [vmem:[%s6585_s30 + $0xf4] sm:$0xf0] }
 0x2ce   : > { %v4188_v44 = vor.u32 %v4711_v42, %v4187_v41 }
 0x2d0   : > { %2014 = vmatmul.bf16.vlgmr.msra.gmra.mxu0 %v1658_v51  ;;  %4063 = vmatmul.msk.bf16.vlgmr.msra.gmra.mxu2 %vm1921_vm15, %v1659_v22 }
 0x2d1   : > { %2577 = vmatpush.bf16.msra.mxu1 %v4068_v46  ;;  %v4709_v46 = vld [vmem:[%s6585_s30 + $0xe4] sm:$0xf0]  ;;  %2588 = vmatpush.bf16.msra.mxu3 %v4188_v44 }
 0x2d2   : > { %v4721_v44 = vld [vmem:[%s6585_s30 + $0x144] sm:$0xf0] }
 0x2e0   : > { %2019 = vmatmul.bf16.gmra.mxu0 %v1661_v17  ;;  %4064 = vmatmul.msk.bf16.gmra.mxu2 %vm1921_vm15, %v1662_v2  ;;  %vm3281_vm15 = vcmask 516096  }
 0x32c   : > { %v1979_v48 = vpop.f32.mrf.mxu1 }
 0x32d   : > { %v1943_v50 = vpop.f32.mrf.mxu0 }
 0x333   : > { %v1961_v52 = vpop.f32.mrf.mxu2 }
 0x334   : > { %v1962_v53 = vadd.f32 %v1961_v52, %v1943_v50  ;;  %v1997_v54 = vpop.f32.mrf.mxu3  ;;  %v1981_v55 = vpop.f32.mrf.mxu1  ;;  %v4171_v50 = vld [vmem:[%s6585_s30 + $0xd0] sm:$0xf]  ;;  %v4707_v52 = vld [vmem:[%s6585_s30 + $0xd4] sm:$0xf0] }
 0x335   : > { %v1945_v56 = vpop.f32.mrf.mxu0 }
 0x336   : > { %v1980_v8 = vadd.f32 %v1979_v48, %v1962_v53  ;;  %v4180_v48 = vor.u32 %v4709_v46, %v4179_v43  ;;  %v4172_v53 = vor.u32 %v4707_v52, %v4171_v50  ;;  %v4227_v43 = vld [vmem:[%s6585_s30 + $0x140] sm:$0xf]  ;;  %v4688_v46 = vld [vmem:[%s6585_s30 + $0x44] sm:$0xf]  ;;  %v4101_v50 = vld [vmem:[%s6585_s30 + $0x48] sm:$0xf0] }
 0x337   : > { %v4259_v52 = vld [vmem:[%s6585_s30 + $0x180] sm:$0xf] }
 0x338   : > { %v2054_v60 = vrot.slane %v1980_v8, 1  ;;  %v2094_v51 = vrot.slane %v1980_v8, 2  ;;  %2589 = vmatpush.bf16.msra.mxu3 %v4180_v48  ;;  %v4228_v48 = vor.u32 %v4721_v44, %v4227_v43  ;;  %v4722_v44 = vld [vmem:[%s6585_s30 + $0x154] sm:$0xf] }
 0x33b   : > { %v1963_v57 = vpop.f32.mrf.mxu2 }
 0x33c   : > { %v1964_v0 = vadd.f32 %v1963_v57, %v1945_v56  ;;  %v1999_v1 = vpop.f32.mrf.mxu3  ;;  %v1984_v58 = vpop.f32.mrf.mxu1  ;;  %2590 = vmatpush.bf16.msra.mxu3 %v4172_v53  ;;  %v4703_v57 = vld [vmem:[%s6585_s30 + $0xb4] sm:$0xf0]  ;;  %v4729_v53 = vld [vmem:[%s6585_s30 + $0x184] sm:$0xf0] }
 0x33d   : > { %v1948_v18 = vpop.f32.mrf.mxu0 }
 0x33e   : > { %v1982_v59 = vadd.f32 %v1981_v55, %v1964_v0  ;;  %v4705_v55 = vld [vmem:[%s6585_s30 + $0xc4] sm:$0xf0] }
 0x340   : > { %v2055_v19 = vrot.slane %v1982_v59, 1  ;;  %v5859_v61 = vpack.c.bf16 %v1982_v59, %v1980_v8  ;;  %v2095_v6 = vrot.slane %v1982_v59, 2  ;;  %v4155_v8 = vld [vmem:[%s6585_s30 + $0xb0] sm:$0xf]  ;;  %v4307_v59 = vld [vmem:[%s6585_s30 + $0x1e0] sm:$0xf] }
 0x341   : > { %v4156_v0 = vor.u32 %v4703_v57, %v4155_v8  ;;  %v4719_v8 = vld [vmem:[%s6585_s30 + $0x134] sm:$0xf0]  ;;  %v4686_v57 = vld [vmem:[%s6585_s30 + $0x34] sm:$0xf] }
 0x342   : > { %v2056_v62 = vsel %vm703_vm3, %v2054_v60, %v2055_v19  ;;  %2578 = vmatmul.bf16.vlgmr.msra.gmra.mxu1 %v5859_v61  ;;  %v2096_v34 = vsel %vm741_vm2, %v2094_v51, %v2095_v6  ;;  %v4741_v60 = vld [vmem:[%s6585_s30 + $0x1e4] sm:$0xf0] }
 0x343   : > { %v1966_v63 = vpop.f32.mrf.mxu2  ;;  %2064 = vrot.lane.b32.xlu2 %v2056_v62, %s4864_s6  ;;  %v4701_v62 = vld [vmem:[%s6585_s30 + $0xa4] sm:$0xf0] }
 0x344   : > { %v1967_v47 = vadd.f32 %v1966_v63, %v1948_v18  ;;  %v2002_v3 = vpop.f32.mrf.mxu3  ;;  %v1986_v4 = vpop.f32.mrf.mxu1  ;;  %v4308_v63 = vor.u32 %v4741_v60, %v4307_v59 }
 0x345   : > { %v1950_v5 = vpop.f32.mrf.mxu0  ;;  %v4139_v4 = vld [vmem:[%s6585_s30 + $0x90] sm:$0xf] }
 0x346   : > { %v1985_v7 = vadd.f32 %v1984_v58, %v1967_v47  ;;  %v4743_v58 = vld [vmem:[%s6585_s30 + $0x1f4] sm:$0xf0] }
 0x347   : > { %v4699_v5 = vld [vmem:[%s6585_s30 + $0x94] sm:$0xf0] }
 0x348   : > { %2046 = vst [vmem:[#allocation4 + $0x50] sm:$0xf] %v1985_v7  ;;  %v2060_v22 = vrot.slane %v1985_v7, 1  ;;  %v2100_v21 = vrot.slane %v1985_v7, 2  ;;  %v4140_v7 = vor.u32 %v4699_v5, %v4139_v4  ;;  %v4684_v4 = vld [vmem:[%s6585_s30 + $0x24] sm:$0xf] }
 0x34a   : > { %2072 = vrot.lane.b32.xlu1 %v2060_v22, %s4864_s6  ;;  %v2061_v9 = vsel %vm703_vm3, %v2055_v19, %v2060_v22  ;;  %v2101_v12 = vsel %vm741_vm2, %v2095_v6, %v2100_v21  ;;  %v4147_v19 = vld [vmem:[%s6585_s30 + $0xa0] sm:$0xf]  ;;  %v4299_v6 = vld [vmem:[%s6585_s30 + $0x1d0] sm:$0xf]  ;;  %v4739_v22 = vld [vmem:[%s6585_s30 + $0x1d4] sm:$0xf0] }
 0x34b   : > { %v1968_v10 = vpop.f32.mrf.mxu2  ;;  %2068 = vrot.lane.b32.xlu0 %v2061_v9, %s4864_s6  ;;  %2104 = vrot.lane.b32.xlu2 %v2096_v34, %s6586_s4  ;;  %v4148_v47 = vor.u32 %v4701_v62, %v4147_v19  ;;  %v4300_v51 = vor.u32 %v4739_v22, %v4299_v6  ;;  %v4291_v9 = vld [vmem:[%s6585_s30 + $0x1c0] sm:$0xf]  ;;  %v4737_v34 = vld [vmem:[%s6585_s30 + $0x1c4] sm:$0xf0] }
 0x34c   : > { %v2004_v11 = vpop.f32.mrf.mxu3  ;;  %v4131_v10 = vld [vmem:[%s6585_s30 + $0x80] sm:$0xf]  ;;  %v4085_v6 = vld [vmem:[%s6585_s30 + $0x28] sm:$0xf0] }
 0x34d   : > { %v2015_v39 = vpop.f32.mrf.mxu0  ;;  %v4697_v11 = vld [vmem:[%s6585_s30 + $0x84] sm:$0xf0]  ;;  %v4088_v22 = vor.u32 %v4684_v4, %v4085_v6  ;;  %v4718_v4 = vld [vmem:[%s6585_s30 + $0x134] sm:$0xf] }
 0x34e   : > { %v2016_v14 = vadd.f32 %v2015_v39, %v1997_v54  ;;  %v4163_v54 = vld [vmem:[%s6585_s30 + $0xc0] sm:$0xf]  ;;  %v4292_v39 = vor.u32 %v4737_v34, %v4291_v9  ;;  %v4317_v9 = vld [vmem:[%s6585_s30 + $0x1f8] sm:$0xf0] }
 0x34f   : > { %v2147_v16 = vld [vmem:[#allocation4 + $0x50] sm:$0xf]  ;;  %v4164_v56 = vor.u32 %v4705_v55, %v4163_v54  ;;  %v4104_v54 = vor.u32 %v4688_v46, %v4101_v50  ;;  %v4260_v55 = vor.u32 %v4729_v53, %v4259_v52  ;;  %v4237_v46 = vld [vmem:[%s6585_s30 + $0x158] sm:$0xf0]  ;;  %v4710_v50 = vld [vmem:[%s6585_s30 + $0xf4] sm:$0xf] }
 0x350   : > { %v5869_v33 = vpack.c.bf16 %v2147_v16, %v2147_v16  ;;  %v4283_v16 = vld [vmem:[%s6585_s30 + $0x1b0] sm:$0xf]  ;;  %v4189_v52 = vld [vmem:[%s6585_s30 + $0xf8] sm:$0xf0] }
 0x351   : > { %2591 = vmatpush.bf16.msra.mxu3 %v4164_v56  ;;  %v4219_v56 = vld [vmem:[%s6585_s30 + $0x130] sm:$0xf]  ;;  %v4192_v53 = vor.u32 %v4710_v50, %v4189_v52  ;;  %v4197_v50 = vld [vmem:[%s6585_s30 + $0x108] sm:$0xf0]  ;;  %v4700_v52 = vld [vmem:[%s6585_s30 + $0xa4] sm:$0xf] }
 0x352   : > { %2108 = vrot.lane.b32.xlu1 %v2101_v12, %s6586_s4  ;;  %2583 = vmatmul.bf16.gmra.mxu1 %v5869_v33  ;;  %v4735_v12 = vld [vmem:[%s6585_s30 + $0x1b4] sm:$0xf0] }
 0x353   : > { %v2033_v2 = vpop.f32.mrf.mxu2 }
 0x354   : > { %v2034_v13 = vadd.f32 %v2033_v2, %v2016_v14  ;;  %v4251_v14 = vld [vmem:[%s6585_s30 + $0x170] sm:$0xf]  ;;  %v4727_v2 = vld [vmem:[%s6585_s30 + $0x174] sm:$0xf0] }
 0x355   : > { %v2017_v17 = vpop.f32.mrf.mxu0  ;;  %2592 = vmatpush.bf16.msra.mxu3 %v4156_v0  ;;  %v4220_v0 = vor.u32 %v4719_v8, %v4219_v56  ;;  %v4720_v56 = vld [vmem:[%s6585_s30 + $0x144] sm:$0xf] }
 0x356   : > { %2043 = vst.msk [vmem:[#allocation4 + $0x8] sm:$0xff] %vm689_vm4, %v2034_v13  ;;  %v2018_v49 = vadd.f32 %v2017_v17, %v1999_v1  ;;  %v2097_v45 = vrot.slane %v2034_v13, 2  ;;  %v2057_v29 = vrot.slane %v2034_v13, 1  ;;  %v4315_v1 = vld [vmem:[%s6585_s30 + $0x1f0] sm:$0xf]  ;;  %v4284_v17 = vor.u32 %v4735_v12, %v4283_v16 }
 0x357   : > { %v4316_v18 = vor.u32 %v4743_v58, %v4315_v1  ;;  %v4694_v13 = vld [vmem:[%s6585_s30 + $0x74] sm:$0xf]  ;;  %v4093_v1 = vld [vmem:[%s6585_s30 + $0x38] sm:$0xf0]  ;;  %v4323_v58 = vld [vmem:[%s6585_s30 + $0x200] sm:$0xf] }
 0x358   : > { %v4096_v59 = vor.u32 %v4686_v57, %v4093_v1  ;;  %v4203_v16 = vld [vmem:[%s6585_s30 + $0x110] sm:$0xf]  ;;  %v4715_v12 = vld [vmem:[%s6585_s30 + $0x114] sm:$0xf0]  ;;  %v4229_v57 = vld [vmem:[%s6585_s30 + $0x148] sm:$0xf0] }
 0x359   : > { %2624 = vmatpush.bf16.msrb.mxu2 %v4316_v18  ;;  %2593 = vmatpush.bf16.msra.mxu3 %v4148_v47  ;;  %v4745_v18 = vld [vmem:[%s6585_s30 + $0x204] sm:$0xf0]  ;;  %v4181_v1 = vld [vmem:[%s6585_s30 + $0xe8] sm:$0xf0] }
 0x35a   : > { %v4324_v60 = vor.u32 %v4745_v18, %v4323_v58  ;;  %v4717_v47 = vld [vmem:[%s6585_s30 + $0x124] sm:$0xf0]  ;;  %v4232_v58 = vor.u32 %v4720_v56, %v4229_v57 }
 0x35b   : > { %v2035_v20 = vpop.f32.mrf.mxu2 }
 0x35c   : > { %v2036_v36 = vadd.f32 %v2035_v20, %v2018_v49  ;;  %v4252_v49 = vor.u32 %v4727_v2, %v4251_v14  ;;  %v4125_v20 = vld [vmem:[%s6585_s30 + $0x78] sm:$0xf0]  ;;  %2649 = vmatpush.bf16.msrb.mxu1 %v4324_v60  ;;  %v4682_v14 = vld [vmem:[%s6585_s30 + $0x14] sm:$0xf]  ;;  %v4204_v2 = vor.u32 %v4715_v12, %v4203_v16  ;;  %v4213_v16 = vld [vmem:[%s6585_s30 + $0x128] sm:$0xf0] }
 0x35d   : > { %v2020_v15 = vpop.f32.mrf.mxu0  ;;  %2625 = vmatpush.bf16.msrb.mxu2 %v4308_v63  ;;  %2594 = vmatpush.bf16.msra.mxu3 %v4140_v7  ;;  %v4211_v63 = vld [vmem:[%s6585_s30 + $0x120] sm:$0xf]  ;;  %v4285_v60 = vld [vmem:[%s6585_s30 + $0x1b8] sm:$0xf0]  ;;  %v4704_v12 = vld [vmem:[%s6585_s30 + $0xc4] sm:$0xf] }
 0x35e   : > { %v2098_v32 = vrot.slane %v2036_v36, 2  ;;  %2045 = vst.msk [vmem:[#allocation4 + $0x30] sm:$0xff] %vm689_vm4, %v2036_v36  ;;  %v2021_v24 = vadd.f32 %v2020_v15, %v2002_v3  ;;  %v2058_v26 = vrot.slane %v2036_v36, 1  ;;  %v4128_v36 = vor.u32 %v4694_v13, %v4125_v20  ;;  %2606 = vmatpush.bf16.msrb.mxu0 %v4252_v49  ;;  %v4275_v15 = vld [vmem:[%s6585_s30 + $0x1a0] sm:$0xf] }
 0x35f   : > { %v4212_v7 = vor.u32 %v4717_v47, %v4211_v63  ;;  %v4077_v13 = vld [vmem:[%s6585_s30 + $0x18] sm:$0xf0]  ;;  %v4740_v49 = vld [vmem:[%s6585_s30 + $0x1e4] sm:$0xf]  ;;  %v4309_v20 = vld [vmem:[%s6585_s30 + $0x1e8] sm:$0xf0] }
 0x360   : > { %v2099_v23 = vsel %vm741_vm2, %v2097_v45, %v2098_v32  ;;  %v2059_v37 = vsel %vm703_vm3, %v2057_v29, %v2058_v26  ;;  %v4733_v45 = vld [vmem:[%s6585_s30 + $0x1a4] sm:$0xf0]  ;;  %v4723_v29 = vld [vmem:[%s6585_s30 + $0x154] sm:$0xf0] }
 0x361   : > { %2106 = vrot.lane.b32.xlu0 %v2099_v23, %s6586_s4  ;;  %2626 = vmatpush.bf16.msrb.mxu2 %v4300_v51  ;;  %v4725_v23 = vld [vmem:[%s6585_s30 + $0x164] sm:$0xf0]  ;;  %v4742_v51 = vld [vmem:[%s6585_s30 + $0x1f4] sm:$0xf] }
 0x363   : > { %v2038_v25 = vpop.f32.mrf.mxu2 }
 0x364   : > { %v2039_v27 = vadd.f32 %v2038_v25, %v2021_v24  ;;  %v4692_v24 = vld [vmem:[%s6585_s30 + $0x64] sm:$0xf]  ;;  %v4276_v25 = vor.u32 %v4733_v45, %v4275_v15  ;;  %v4245_v45 = vld [vmem:[%s6585_s30 + $0x168] sm:$0xf0] }
 0x365   : > { %v2022_v28 = vpop.f32.mrf.mxu0  ;;  %2627 = vmatpush.bf16.msrb.mxu2 %v4292_v39  ;;  %v4253_v39 = vld [vmem:[%s6585_s30 + $0x178] sm:$0xf0]  ;;  %v4724_v15 = vld [vmem:[%s6585_s30 + $0x164] sm:$0xf] }
 0x366   : > { %v2062_v30 = vrot.slane %v2039_v27, 1  ;;  %v2102_v31 = vrot.slane %v2039_v27, 2  ;;  %2047 = vst.msk [vmem:[#allocation4 + $0x58] sm:$0xf] %vm695_vm8, %v2039_v27  ;;  %vm2085_vm8 = vcmask 1047936  }
 0x367   : > { %v4117_v27 = vld [vmem:[%s6585_s30 + $0x68] sm:$0xf0]  ;;  %v4235_v28 = vld [vmem:[%s6585_s30 + $0x150] sm:$0xf] }
 0x368   : > { %v2063_v35 = vsel %vm703_vm3, %v2058_v26, %v2062_v30  ;;  %v2103_v38 = vsel %vm741_vm2, %v2098_v32, %v2102_v31  ;;  %v4243_v32 = vld [vmem:[%s6585_s30 + $0x160] sm:$0xf] }
 0x369   : > { %2070 = vrot.lane.b32.xlu1 %v2063_v35, %s4864_s6  ;;  %2066 = vrot.lane.b32.xlu0 %v2059_v37, %s4864_s6  ;;  %v4244_v26 = vor.u32 %v4725_v23, %v4243_v32  ;;  %v4109_v35 = vld [vmem:[%s6585_s30 + $0x58] sm:$0xf0]  ;;  %v4236_v37 = vor.u32 %v4723_v29, %v4235_v28 }
 0x36a   : > { %2110 = vrot.lane.b32.xlu2 %v2103_v38, %s6586_s4  ;;  %2628 = vmatpush.bf16.msrb.mxu2 %v4284_v17  ;;  %v4267_v38 = vld [vmem:[%s6585_s30 + $0x190] sm:$0xf]  ;;  %v4080_v17 = vor.u32 %v4682_v14, %v4077_v13  ;;  %v4165_v14 = vld [vmem:[%s6585_s30 + $0xc8] sm:$0xf0] }
 0x36b   : > { %v2040_v40 = vpop.f32.mrf.mxu2  ;;  %2607 = vmatpush.bf16.msrb.mxu0 %v4244_v26  ;;  %v4195_v26 = vld [vmem:[%s6585_s30 + $0x100] sm:$0xf] }
 0x36c   : > { %v4731_v40 = vld [vmem:[%s6585_s30 + $0x194] sm:$0xf0] }
 0x36d   : > { %v4268_v42 = vor.u32 %v4731_v40, %v4267_v38  ;;  %v4738_v40 = vld [vmem:[%s6585_s30 + $0x1d4] sm:$0xf] }
 0x36e   : > { %2629 = vmatpush.bf16.msrb.mxu2 %v4276_v25  ;;  %v4248_v25 = vor.u32 %v4724_v15, %v4245_v45 }
 0x36f   : > { %2608 = vmatpush.bf16.msrb.mxu0 %v4236_v37 }
 0x371   : > { %2074 = vrot.lane.b32.xlu1 %v2062_v30, %s4864_s6  ;;  %2114 = vrot.lane.b32.xlu0 %v2102_v31, %s6586_s4  ;;  %v4120_v30 = vor.u32 %v4692_v24, %v4117_v27  ;;  %v4690_v31 = vld [vmem:[%s6585_s30 + $0x54] sm:$0xf]  ;;  %v4713_v27 = vld [vmem:[%s6585_s30 + $0x104] sm:$0xf0] }
 0x372   : > { %2112 = vrot.lane.b32.xlu2 %v2100_v21, %s6586_s4  ;;  %v4132_v21 = vor.u32 %v4697_v11, %v4131_v10  ;;  %v4112_v41 = vor.u32 %v4690_v31, %v4109_v35  ;;  %2630 = vmatpush.bf16.msrb.mxu2 %v4268_v42  ;;  %v4320_v10 = vor.u32 %v4742_v51, %v4317_v9  ;;  %v4726_v11 = vld [vmem:[%s6585_s30 + $0x174] sm:$0xf]  ;;  %v4680_v31 = vld [vmem:[%s6585_s30 + $0x4] sm:$0xf]  ;;  %v4069_v35 = vld [vmem:[%s6585_s30 + $0x8] sm:$0xf0]  ;;  %s681_s4 = scalar_lea.vmem %s6565_s22, %s3647_s29 }
 0x373   : > { %2609 = vmatpush.bf16.msrb.mxu0 %v4228_v48  ;;  %v4072_v38 = vor.u32 %v4680_v31, %v4069_v35  ;;  %v4240_v48 = vor.u32 %v4722_v44, %v4237_v46  ;;  %v4173_v51 = vld [vmem:[%s6585_s30 + $0xd8] sm:$0xf0] }
 0x374   : > { %2595 = vmatpush.bf16.msra.mxu3 %v4132_v21  ;;  %v4256_v21 = vor.u32 %v4726_v11, %v4253_v39  ;;  %2714 = vmatpush.bf16.msra.mxu1 %v4320_v10  ;;  %v4732_v10 = vld [vmem:[%s6585_s30 + $0x1a4] sm:$0xf]  ;;  %v4277_v11 = vld [vmem:[%s6585_s30 + $0x1a8] sm:$0xf0] }
 0x375   : > { %v4716_v39 = vld [vmem:[%s6585_s30 + $0x124] sm:$0xf] }
 0x376   : > { %2631 = vmatpush.bf16.msrb.mxu2 %v4260_v55  ;;  %v4293_v55 = vld [vmem:[%s6585_s30 + $0x1c8] sm:$0xf0] }
 0x377   : > { %2610 = vmatpush.bf16.msrb.mxu0 %v4220_v0  ;;  %v4708_v0 = vld [vmem:[%s6585_s30 + $0xe4] sm:$0xf] }
 0x378   : > { %2660 = vmatpush.bf16.msrb.mxu3 %v4128_v36  ;;  %v4312_v36 = vor.u32 %v4740_v49, %v4309_v20  ;;  %v4184_v18 = vor.u32 %v4708_v0, %v4181_v1  ;;  %v4168_v49 = vor.u32 %v4704_v12, %v4165_v14  ;;  %v4730_v20 = vld [vmem:[%s6585_s30 + $0x194] sm:$0xf]  ;;  %v4133_v1 = vld [vmem:[%s6585_s30 + $0x88] sm:$0xf0] }
 0x37a   : > { %2696 = vmatpush.bf16.msra.mxu2 %v4256_v21  ;;  %2715 = vmatpush.bf16.msra.mxu1 %v4312_v36  ;;  %v4280_v21 = vor.u32 %v4732_v10, %v4277_v11  ;;  %v4269_v36 = vld [vmem:[%s6585_s30 + $0x198] sm:$0xf0] }
 0x37b   : > { %2611 = vmatpush.bf16.msrb.mxu0 %v4212_v7  ;;  %v4221_v7 = vld [vmem:[%s6585_s30 + $0x138] sm:$0xf0] }
 0x37c   : > { %2661 = vmatpush.bf16.msrb.mxu3 %v4120_v30  ;;  %v4196_v30 = vor.u32 %v4713_v27, %v4195_v26  ;;  %v4224_v6 = vor.u32 %v4718_v4, %v4221_v7  ;;  %v4714_v26 = vld [vmem:[%s6585_s30 + $0x114] sm:$0xf]  ;;  %v4205_v27 = vld [vmem:[%s6585_s30 + $0x118] sm:$0xf0] }
 0x37e   : > { %2697 = vmatpush.bf16.msra.mxu2 %v4248_v25 }
 0x37f   : > { %2612 = vmatpush.bf16.msrb.mxu0 %v4204_v2 }
 0x380   : > { %2662 = vmatpush.bf16.msrb.mxu3 %v4112_v41  ;;  %v4301_v41 = vld [vmem:[%s6585_s30 + $0x1d8] sm:$0xf0] }
 0x381   : > { %v4304_v43 = vor.u32 %v4738_v40, %v4301_v41  ;;  %v4261_v40 = vld [vmem:[%s6585_s30 + $0x188] sm:$0xf0]  ;;  %v4712_v41 = vld [vmem:[%s6585_s30 + $0x104] sm:$0xf] }
 0x382   : > { %2698 = vmatpush.bf16.msra.mxu2 %v4240_v48  ;;  %v4200_v56 = vor.u32 %v4712_v41, %v4197_v50 }
 0x383   : > { %2613 = vmatpush.bf16.msrb.mxu0 %v4196_v30  ;;  %2716 = vmatpush.bf16.msra.mxu1 %v4304_v43  ;;  %v4157_v30 = vld [vmem:[%s6585_s30 + $0xb8] sm:$0xf0] }
 0x384   : > { %2663 = vmatpush.bf16.msrb.mxu3 %v4104_v54  ;;  %v4736_v54 = vld [vmem:[%s6585_s30 + $0x1c4] sm:$0xf] }
 0x385   : > { %v4296_v8 = vor.u32 %v4736_v54, %v4293_v55 }
 0x386   : > { %2699 = vmatpush.bf16.msra.mxu2 %v4232_v58 }
 0x387   : > { %2678 = vmatpush.bf16.msra.mxu0 %v4192_v53  ;;  %2717 = vmatpush.bf16.msra.mxu1 %v4296_v8  ;;  %v4149_v8 = vld [vmem:[%s6585_s30 + $0xa8] sm:$0xf0] }
 0x388   : > { %2664 = vmatpush.bf16.msrb.mxu3 %v4096_v59  ;;  %v4734_v59 = vld [vmem:[%s6585_s30 + $0x1b4] sm:$0xf]  ;;  %v4152_v57 = vor.u32 %v4700_v52, %v4149_v8 }
 0x389   : > { %v4288_v47 = vor.u32 %v4734_v59, %v4285_v60 }
 0x38a   : > { %2700 = vmatpush.bf16.msra.mxu2 %v4224_v6 }
 0x38b   : > { %2679 = vmatpush.bf16.msra.mxu0 %v4184_v18  ;;  %2718 = vmatpush.bf16.msra.mxu1 %v4288_v47  ;;  %v4325_v18 = vld [vmem:[%s6585_s30 + $0x208] sm:$0xf0] }
 0x38c   : > { %2665 = vmatpush.bf16.msrb.mxu3 %v4088_v22  ;;  %v4706_v22 = vld [vmem:[%s6585_s30 + $0xd4] sm:$0xf] }
 0x38d   : > { %v4176_v9 = vor.u32 %v4706_v22, %v4173_v51 }
 0x38f   : > { %2680 = vmatpush.bf16.msra.mxu0 %v4176_v9  ;;  %2719 = vmatpush.bf16.msra.mxu1 %v4280_v21 }
 0x390   : > { %2666 = vmatpush.bf16.msrb.mxu3 %v4080_v17  ;;  %v4216_v17 = vor.u32 %v4716_v39, %v4213_v16 }
 0x392   : > { %2701 = vmatpush.bf16.msra.mxu2 %v4216_v17 }
 0x393   : > { %2681 = vmatpush.bf16.msra.mxu0 %v4168_v49 }
 0x394   : > { %2667 = vmatpush.bf16.msrb.mxu3 %v4072_v38  ;;  %v4728_v38 = vld [vmem:[%s6585_s30 + $0x184] sm:$0xf] }
 0x395   : > { %v4264_v48 = vor.u32 %v4728_v38, %v4261_v40 }
 0x39d   : > { %v5936_v3 = vpop.permute.xlu2 %2064 }
 0x39e   : > { %2086 = vst.msk [vmem:[#allocation4 + $0x8] sm:$0xff] %vm2085_vm8, %v5936_v3 }
 0x3a5   : > { %v6054_v19 = vpop.permute.xlu2 %2104  ;;  %v2138_v24 = vld [vmem:[#allocation4 + $0x8] sm:$0xff] }
 0x3bc   : > { %v6056_v62 = vpop.permute.xlu1 %2072 }
 0x3bd   : > { %2092 = vst.msk [vmem:[#allocation4 + $0x58] sm:$0xf] %vm2091_vm1, %v6056_v62  ;;  %v6068_v5 = vpop.permute.xlu0 %2068 }
 0x3be   : > { %2089 = vst.msk [vmem:[#allocation4 + $0x30] sm:$0xff] %vm2085_vm8, %v6068_v5 }
 0x3bf   : > { %v6081_v34 = vpop.f32.mrf.mxu1 }
 0x3c4   : > { %v2111_v32 = vpop.permute.xlu2 %2110  ;;  %v6113_v23 = vpop.permute.xlu1 %2108  ;;  %v2148_v13 = vld [vmem:[#allocation4 + $0x58] sm:$0xf] }
 0x3c5   : > { %2133 = vst.msk [vmem:[#allocation4 + $0x48] sm:$0xff] %vm773_vm5, %v2111_v32  ;;  %v6124_v28 = vsel %vm2087_vm7, %v6113_v23, %v2111_v32  ;;  %v2143_v29 = vld [vmem:[#allocation4 + $0x30] sm:$0xff]  ;;  %v4272_v32 = vor.u32 %v4730_v20, %v4269_v36 }
 0x3c6   : > { %v6132_v37 = vpack.c.bf16 %v2143_v29, %v2138_v24  ;;  %v6223_v24 = vpack.c.bf16 %v2148_v13, %v2148_v13  ;;  %v4702_v29 = vld [vmem:[%s6585_s30 + $0xb4] sm:$0xf] }
 0x3c7   : > { %v6140_v42 = vpop.f32.mrf.mxu1  ;;  %2720 = vmatpush.bf16.msra.mxu1 %v4272_v32  ;;  %v4160_v35 = vor.u32 %v4702_v29, %v4157_v30 }
 0x3c8   : > { %2596 = vmatmul.bf16.vlgmr.msra.gmra.mxu3 %v6132_v37 }
 0x3c9   : > { %2682 = vmatpush.bf16.msra.mxu0 %v4160_v35 }
 0x3cb   : > { %2721 = vmatpush.bf16.msra.mxu1 %v4264_v48 }
 0x3cc   : > { %v2146_v31 = vld [vmem:[#allocation4 + $0x48] sm:$0xff]  ;;  %v2113_v58 = vpop.permute.xlu2 %2112 }
 0x3cd   : > { %2683 = vmatpush.bf16.msra.mxu0 %v4152_v57 }
 0x3cf   : > { %v6179_v63 = vpop.f32.mrf.mxu1 }
 0x3d3   : > { %v2107_v2 = vpop.permute.xlu0 %2106 }
 0x3d4   : > { %v2116_v15 = vsel %vm2087_vm7, %v6054_v19, %v2107_v2  ;;  %2130 = vst.msk [vmem:[#allocation4 + $0x20] sm:$0xff] %vm773_vm5, %v2107_v2 }
 0x3d5   : > { %v6221_v45 = vpack.c.bf16 %v6124_v28, %v2116_v15  ;;  %v4208_v28 = vor.u32 %v4714_v26, %v4205_v27 }
 0x3d7   : > { %v2586_v25 = vpop.f32.mrf.mxu1  ;;  %2632 = vmatmul.bf16.vlgmr.msrb.gmra.mxu2 %v6221_v45 }
 0x3d8   : > { %2601 = vmatmul.bf16.gmra.mxu3 %v6223_v24  ;;  %2702 = vmatpush.bf16.msra.mxu2 %v4208_v28 }
 0x3db   : > { %v2071_v43 = vpop.permute.xlu1 %2070  ;;  %v2067_v44 = vpop.permute.xlu0 %2066  ;;  %v2141_v46 = vld [vmem:[#allocation4 + $0x20] sm:$0xff] }
 0x3dc   : > { %v2077_v53 = vsel %vm689_vm4, %v6068_v5, %v2071_v43  ;;  %v2076_v54 = vsel %vm689_vm4, %v5936_v3, %v2067_v44  ;;  %v2156_v55 = vpack.c.bf16 %v2146_v31, %v2141_v46  ;;  %2703 = vmatpush.bf16.msra.mxu2 %v4200_v56  ;;  %v4698_v3 = vld [vmem:[%s6585_s30 + $0x94] sm:$0xf]  ;;  %v4141_v5 = vld [vmem:[%s6585_s30 + $0x98] sm:$0xf0] }
 0x3dd   : > { %2090 = vst.msk [vmem:[#allocation4 + $0x38] sm:$0xff] %vm2087_vm7, %v2077_v53  ;;  %v4144_v0 = vor.u32 %v4698_v3, %v4141_v5 }
 0x3de   : > { %2131 = vst.msk [vmem:[#allocation4 + $0x38] sm:$0xff] %vm771_vm11, %v6113_v23  ;;  %4329 = vmatmul.msk.bf16.vlgmr.msrb.gmra.mxu1 %vm773_vm5, %v2156_v55  ;;  %v4696_v23 = vld [vmem:[%s6585_s30 + $0x84] sm:$0xf] }
 0x3df   : > { %2088 = vst.msk [vmem:[#allocation4 + $0x10] sm:$0xff] %vm2087_vm7, %v2076_v54  ;;  %2684 = vmatpush.bf16.msra.mxu0 %v4144_v0  ;;  %v4136_v47 = vor.u32 %v4696_v23, %v4133_v1 }
 0x3e0   : > { %2128 = vst.msk [vmem:[#allocation4 + $0x10] sm:$0xff] %vm771_vm11, %v6054_v19  ;;  %v4744_v19 = vld [vmem:[%s6585_s30 + $0x204] sm:$0xf]  ;;  %vm2767_vm11 = vcmask 162816  }
 0x3e1   : > { %v4328_v4 = vor.u32 %v4744_v19, %v4325_v18  ;;  %v4746_v19 = vld [vmem:[%s6552_s9] sm:$0x10] }
 0x3e2   : > { %v4747_v18 = vld [vmem:[%s6553_s10] sm:$0x10] }
 0x3e3   : > { %v2075_v59 = vpop.permute.xlu1 %2074  ;;  %v2115_v60 = vpop.permute.xlu0 %2114  ;;  %2739 = vmatpush.bf16.msra.mxu3 %v4328_v4  ;;  %2685 = vmatpush.bf16.msra.mxu0 %v4136_v47 }
 0x3e4   : > { %v2078_v7 = vsel %vm689_vm4, %v6056_v62, %v2075_v59  ;;  %v2118_v6 = vsel %vm2087_vm7, %v2113_v58, %v2115_v60  ;;  %2136 = vst.msk [vmem:[#allocation4 + $0x70] sm:$0xf] %vm785_vm14, %v2115_v60  ;;  %vm2983_vm14 = vcmask 654336  }
 0x3e5   : > { %2093 = vst.msk [vmem:[#allocation4 + $0x60] sm:$0xf] %vm1374_vm6, %v2078_v7  ;;  %v2144_v22 = vld [vmem:[#allocation4 + $0x38] sm:$0xff]  ;;  %vm3003_vm6 = vcmask 916736  }
 0x3e6   : > { %2134 = vst.msk [vmem:[#allocation4 + $0x60] sm:$0xf] %vm783_vm13, %v2113_v58  ;;  %v4341_v58 = vld [vmem:[%s6553_s10] sm:$0xf]  ;;  %vm2948_vm13 = vcmask 195584  }
 0x3e7   : > { %2135 = vst [vmem:[#allocation4 + $0x68] sm:$0xf] %v2118_v6  ;;  %v2139_v51 = vld [vmem:[#allocation4 + $0x10] sm:$0xff]  ;;  %v4342_v47 = vor.u32 %v4747_v18, %v4341_v58  ;;  %v4749_v58 = vld [vmem:[%s6557_s14 + $0x8] sm:$0xff]  ;;  %v4756_v18 = vld [vmem:[%s6557_s14 + $0x40] sm:$0xff] }
 0x3e8   : > { %v2154_v9 = vpack.c.bf16 %v2144_v22, %v2139_v51  ;;  %2668 = vmatmul.bf16.vlgmr.msrb.gmra.mxu3 %v5859_v61 }
 0x3ea   : > { %2614 = vmatmul.bf16.vlgmr.msrb.gmra.mxu0 %v2154_v9 }
 0x3eb   : > { %v2151_v10 = vld [vmem:[#allocation4 + $0x70] sm:$0xf] }
 0x3ec   : > { %v2161_v11 = vpack.c.bf16 %v2151_v10, %v2151_v10 }
 0x3ed   : > { %v2149_v21 = vld [vmem:[#allocation4 + $0x60] sm:$0xf] }
 0x3ee   : > { %4330 = vmatmul.msk.bf16.gmra.mxu1 %vm773_vm5, %v2161_v11  ;;  %v2150_v62 = vld [vmem:[#allocation4 + $0x68] sm:$0xf]  ;;  %v2159_v16 = vpack.c.bf16 %v2149_v21, %v2149_v21 }
 0x3ef   : > { %v2160_v39 = vpack.c.bf16 %v2150_v62, %v2150_v62 }
 0x3f1   : > { %2637 = vmatmul.bf16.gmra.mxu2 %v2160_v39 }
 0x3f8   : > { %2673 = vmatmul.bf16.gmra.mxu3 %v5869_v33  ;;  %v2228_v33 = vld [vmem:[%s6587_s5] sm:$0x3] }
 0x3f9   : > { %v2230_v13 = vperm.slane %v2228_v33, 0  ;;  %v2231_v51 = vperm.slane %v2228_v33, 1 }
 0x3fa   : > { %2619 = vmatmul.bf16.gmra.mxu0 %v2159_v16 }
 0x3fb   : > { %v2585_v41 = vadd.f32 %v6179_v63, %v2230_v13  ;;  %v4335_v63 = vld [vmem:[%s6552_s9] sm:$0xf] }
 0x3fc   : > { %v4336_v60 = vor.u32 %v4746_v19, %v4335_v63 }
 0x3fe   : > { %2722 = vmatmul.bf16.vlgmr.msra.gmra.mxu1 %v6221_v45 }
 0x401   : > { %2704 = vmatmul.bf16.vlgmr.msra.gmra.mxu2 %v2154_v9 }
 0x408   : > { %4331 = vmatmul.msk.bf16.vlgmr.msra.gmra.mxu3 %vm773_vm5, %v2156_v55 }
 0x40a   : > { %2686 = vmatmul.bf16.vlgmr.msra.gmra.mxu0 %v6132_v37  ;;  %v2580_v37 = vadd.f32 %v6081_v34, %v2230_v13 }
 0x40e   : > { %2727 = vmatmul.bf16.gmra.mxu1 %v2160_v39 }
 0x411   : > { %2709 = vmatmul.bf16.gmra.mxu2 %v2159_v16 }
 0x418   : > { %4332 = vmatmul.msk.bf16.gmra.mxu3 %vm773_vm5, %v2161_v11  ;;  %vm2771_vm5 = vcmask 1041408  }
 0x41a   : > { %2691 = vmatmul.bf16.gmra.mxu0 %v6223_v24  ;;  %v2582_v24 = vadd.f32 %v6140_v42, %v2230_v13 }
 0x44b   : > { %v2597_v61 = vpop.f32.mrf.mxu3 }
 0x44c   : > { %v2598_v15 = vadd.f32 %v2597_v61, %v2580_v37 }
 0x453   : > { %v2599_v12 = vpop.f32.mrf.mxu3 }
 0x454   : > { %v2600_v27 = vadd.f32 %v2599_v12, %v2582_v24 }
 0x45a   : > { %v2633_v17 = vpop.f32.mrf.mxu2 }
 0x45b   : > { %v2602_v14 = vpop.f32.mrf.mxu3  ;;  %v2651_v2 = vpop.f32.mrf.mxu1 }
 0x45c   : > { %v2603_v44 = vadd.f32 %v2602_v14, %v2585_v41 }
 0x462   : > { %v2635_v26 = vpop.f32.mrf.mxu2 }
 0x463   : > { %v2604_v49 = vpop.f32.mrf.mxu3  ;;  %v2653_v20 = vpop.f32.mrf.mxu1 }
 0x467   : > { %v2615_v36 = vpop.f32.mrf.mxu0 }
 0x468   : > { %v2616_v45 = vadd.f32 %v2615_v36, %v2598_v15 }
 0x46a   : > { %v2634_v28 = vadd.f32 %v2633_v17, %v2616_v45 }
 0x46b   : > { %v2656_v32 = vpop.f32.mrf.mxu1  ;;  %v2669_v25 = vpop.f32.mrf.mxu3 }
 0x46c   : > { %v2652_v31 = vadd.f32 %v2651_v2, %v2634_v28  ;;  %v2670_v11 = vadd.f32 %v2669_v25, %v2231_v51 }
 0x46e   : > { %v2750_v46 = vmax.f32 %v2652_v31, 0.0 }
 0x46f   : > { %v2617_v29 = vpop.f32.mrf.mxu0 }
 0x470   : > { %v2618_v30 = vadd.f32 %v2617_v29, %v2600_v27 }
 0x472   : > { %v2636_v35 = vadd.f32 %v2635_v26, %v2618_v30 }
 0x473   : > { %v2658_v38 = vpop.f32.mrf.mxu1  ;;  %v2671_v40 = vpop.f32.mrf.mxu3 }
 0x474   : > { %v2654_v43 = vadd.f32 %v2653_v20, %v2636_v35  ;;  %v2638_v34 = vpop.f32.mrf.mxu2  ;;  %v2672_v10 = vadd.f32 %v2671_v40, %v2231_v51 }
 0x476   : > { %v2752_v48 = vmax.f32 %v2654_v43, 0.0 }
 0x477   : > { %v2620_v50 = vpop.f32.mrf.mxu0 }
 0x478   : > { %v2621_v52 = vadd.f32 %v2620_v50, %v2603_v44  ;;  %v2756_v53 = vpack.c.bf16 %v2752_v48, %v2750_v46  ;;  %v4755_v48 = vld [vmem:[%s6557_s14 + $0x38] sm:$0xff]  ;;  %v4754_v50 = vld [vmem:[%s6557_s14 + $0x30] sm:$0xff] }
 0x47a   : > { %v2639_v42 = vadd.f32 %v2638_v34, %v2621_v52  ;;  %v2890_v52 = vld [vmem:[%s6557_s14 + $0x48] sm:$0xf] }
 0x47b   : > { %v2674_v54 = vpop.f32.mrf.mxu3  ;;  %v2723_v55 = vpop.f32.mrf.mxu1 }
 0x47c   : > { %v2657_v56 = vadd.f32 %v2656_v32, %v2639_v42  ;;  %v2640_v8 = vpop.f32.mrf.mxu2  ;;  %v2675_v12 = vadd.f32 %v2674_v54, %v2231_v51  ;;  %v4753_v54 = vld [vmem:[%s6557_s14 + $0x28] sm:$0xff] }
 0x47d   : > { %v4751_v8 = vld [vmem:[%s6557_s14 + $0x18] sm:$0xff] }
 0x47e   : > { %v2754_v57 = vmax.f32 %v2657_v56, 0.0  ;;  %v4752_v56 = vld [vmem:[%s6557_s14 + $0x20] sm:$0xff] }
 0x47f   : > { %v2622_v3 = vpop.f32.mrf.mxu0 }
 0x480   : > { %v2758_v5 = vpack.c.bf16 %v2754_v57, %v2754_v57  ;;  %v4750_v57 = vld [vmem:[%s6557_s14 + $0x10] sm:$0xff] }
 0x482   : > { %v2773_v0 = vsel %vm2771_vm5, %v2758_v5, 0 }
 0x483   : > { %2784 = vmatpush.bf16.msrb.mxu0 %v2773_v0  ;;  %2822 = vmatpush.bf16.msrb.mxu1 %v2773_v0  ;;  %v2676_v23 = vpop.f32.mrf.mxu3  ;;  %v2725_v1 = vpop.f32.mrf.mxu1 }
 0x484   : > { %v2705_v59 = vpop.f32.mrf.mxu2 }
 0x487   : > { %v2687_v4 = vpop.f32.mrf.mxu0  ;;  %2785 = vmatpush.bf16.msrb.mxu0 %v2756_v53  ;;  %2823 = vmatpush.bf16.msrb.mxu1 %v2756_v53  ;;  %v2928_v53 = vunpack.c.l.b16 %v2890_v52 }
 0x488   : > { %v2688_v61 = vadd.f32 %v2687_v4, %v2670_v11 }
 0x489   : > { %v2938_v42 = vpack.c.b16 %v2928_v53, %v2928_v53 }
 0x48a   : > { %4337 = vmatmul.msk.bf16.vlgmr.msrb.gmra.mxu0 %vm2767_vm11, %v4336_v60  ;;  %4343 = vmatmul.msk.bf16.vlgmr.msrb.gmra.mxu1 %vm2767_vm11, %v4342_v47  ;;  %v2706_v17 = vadd.f32 %v2705_v59, %v2688_v61  ;;  %v4748_v59 = vld [vmem:[%s6557_s14] sm:$0xff] }
 0x48b   : > { %v2728_v7 = vpop.f32.mrf.mxu1  ;;  %v2741_v6 = vpop.f32.mrf.mxu3  ;;  %2955 = vmatpush.bf16.msra.mxu0 %v4755_v48 }
 0x48c   : > { %v2707_v22 = vpop.f32.mrf.mxu2  ;;  %v2724_v45 = vadd.f32 %v2723_v55, %v2706_v17  ;;  %v2953_v55 = vsel %vm825_vm0, %v2938_v42, 0  ;;  %v4852_v42 = vld [vmem:[%s6590_s27] ss:$0 sm:$0xff]  ;;  %s6591_s27 = smov 64  }
 0x48e   : > { %v2742_v26 = vadd.f32 %v2741_v6, %v2724_v45 }
 0x48f   : > { %v2689_v9 = vpop.f32.mrf.mxu0  ;;  %2956 = vmatpush.bf16.msra.mxu0 %v4754_v50 }
 0x490   : > { %v2690_v62 = vadd.f32 %v2689_v9, %v2672_v10  ;;  %v2751_v31 = vmax.f32 %v2742_v26, 0.0  ;;  %v4762_v26 = vld [vmem:[%s6589_s26 + $0x28] sm:$0xff] }
 0x492   : > { %v2708_v14 = vadd.f32 %v2707_v22, %v2690_v62 }
 0x493   : > { %v2730_v39 = vpop.f32.mrf.mxu1  ;;  %v2743_v21 = vpop.f32.mrf.mxu3  ;;  %2957 = vmatpush.bf16.msra.mxu0 %v4753_v54 }
 0x494   : > { %v2710_v16 = vpop.f32.mrf.mxu2  ;;  %v2726_v20 = vadd.f32 %v2725_v1, %v2708_v14 }
 0x496   : > { %v2744_v32 = vadd.f32 %v2743_v21, %v2726_v20 }
 0x497   : > { %v2692_v2 = vpop.f32.mrf.mxu0  ;;  %2958 = vmatpush.bf16.msra.mxu0 %v4752_v56 }
 0x498   : > { %v2693_v13 = vadd.f32 %v2692_v2, %v2675_v12  ;;  %v2753_v28 = vmax.f32 %v2744_v32, 0.0  ;;  %v4771_v32 = vld [vmem:[%s6589_s26 + $0x70] sm:$0xff] }
 0x49a   : > { %v2711_v49 = vadd.f32 %v2710_v16, %v2693_v13  ;;  %v2757_v35 = vpack.c.bf16 %v2753_v28, %v2751_v31  ;;  %v4761_v28 = vld [vmem:[%s6589_s26 + $0x20] sm:$0xff]  ;;  %v4759_v31 = vld [vmem:[%s6589_s26 + $0x10] sm:$0xff] }
 0x49b   : > { %v2746_v37 = vpop.f32.mrf.mxu3  ;;  %2959 = vmatpush.bf16.msra.mxu0 %v4751_v8 }
 0x49c   : > { %v2712_v36 = vpop.f32.mrf.mxu2  ;;  %v2729_v15 = vadd.f32 %v2728_v7, %v2711_v49 }
 0x49e   : > { %v2747_v33 = vadd.f32 %v2746_v37, %v2729_v15 }
 0x49f   : > { %v2694_v24 = vpop.f32.mrf.mxu0  ;;  %2960 = vmatpush.bf16.msra.mxu0 %v4750_v57 }
 0x4a0   : > { %v2755_v25 = vmax.f32 %v2747_v33, 0.0  ;;  %v4764_v33 = vld [vmem:[%s6589_s26 + $0x38] sm:$0xff]  ;;  %v4763_v24 = vld [vmem:[%s6589_s26 + $0x30] sm:$0xff] }
 0x4a1   : > { %3136 = vmatpush.bf16.msra.mxu1 %v4764_v33  ;;  %v4789_v33 = vld [vmem:[%s6559_s16 + $0x50] sm:$0xff] }
 0x4a2   : > { %v2759_v27 = vpack.c.bf16 %v2755_v25, %v2755_v25  ;;  %v4770_v25 = vld [vmem:[%s6589_s26 + $0x68] sm:$0xff] }
 0x4a3   : > { %v2748_v29 = vpop.f32.mrf.mxu3  ;;  %2961 = vmatpush.bf16.msra.mxu0 %v4749_v58  ;;  %v4776_v58 = vld [vmem:[%s6558_s15 + $0x20] sm:$0xff] }
 0x4a4   : > { %v2776_v30 = vsel %vm2771_vm5, %v2759_v27, 0  ;;  %v4769_v27 = vld [vmem:[%s6589_s26 + $0x60] sm:$0xff]  ;;  %v4768_v29 = vld [vmem:[%s6589_s26 + $0x58] sm:$0xff] }
 0x4a5   : > { %2798 = vmatpush.bf16.msrb.mxu2 %v2776_v30  ;;  %2836 = vmatpush.bf16.msrb.mxu3 %v2776_v30  ;;  %v4760_v30 = vld [vmem:[%s6589_s26 + $0x18] sm:$0xff] }
 0x4a6   : > { %3137 = vmatpush.bf16.msra.mxu1 %v4763_v24  ;;  %v4788_v24 = vld [vmem:[%s6559_s16 + $0x48] sm:$0xff] }
 0x4a7   : > { %2962 = vmatpush.bf16.msra.mxu0 %v4748_v59  ;;  %v4774_v59 = vld [vmem:[%s6558_s15 + $0x10] sm:$0xff] }
 0x4a9   : > { %2799 = vmatpush.bf16.msrb.mxu2 %v2757_v35  ;;  %2837 = vmatpush.bf16.msrb.mxu3 %v2757_v35  ;;  %v4767_v35 = vld [vmem:[%s6589_s26 + $0x50] sm:$0xff] }
 0x4aa   : > { %3138 = vmatpush.bf16.msra.mxu1 %v4762_v26  ;;  %v4787_v26 = vld [vmem:[%s6559_s16 + $0x40] sm:$0xff] }
 0x4ac   : > { %4338 = vmatmul.msk.bf16.vlgmr.msrb.gmra.mxu2 %vm2767_vm11, %v4336_v60  ;;  %4344 = vmatmul.msk.bf16.vlgmr.msrb.gmra.mxu3 %vm2767_vm11, %v4342_v47 }
 0x4ad   : > { %2975 = vmatpush.bf16.msra.mxu2 %v2953_v55  ;;  %3150 = vmatpush.bf16.msra.mxu3 %v4771_v32  ;;  %v4780_v32 = vld [vmem:[%s6559_s16 + $0x8] sm:$0xff] }
 0x4ae   : > { %3139 = vmatpush.bf16.msra.mxu1 %v4761_v28  ;;  %v3477_v28 = vld [vmem:[%s6561_s18 + $0x38] sm:$0xf] }
 0x4b1   : > { %2976 = vmatpush.bf16.msra.mxu2 %v4756_v18  ;;  %3151 = vmatpush.bf16.msra.mxu3 %v4770_v25  ;;  %v4775_v18 = vld [vmem:[%s6558_s15 + $0x18] sm:$0xff]  ;;  %v4779_v25 = vld [vmem:[%s6559_s16] sm:$0xff] }
 0x4b2   : > { %3140 = vmatpush.bf16.msra.mxu1 %v4760_v30 }
 0x4b5   : > { %3152 = vmatpush.bf16.msra.mxu3 %v4769_v27 }
 0x4b6   : > { %3141 = vmatpush.bf16.msra.mxu1 %v4759_v31 }
 0x4b9   : > { %3153 = vmatpush.bf16.msra.mxu3 %v4768_v29  ;;  %v3508_v29 = vunpack.c.l.b16 %v3477_v28 }
 0x4bb   : > { %v3516_v30 = vpack.c.b16 %v3508_v29, %v3508_v29 }
 0x4bd   : > { %3154 = vmatpush.bf16.msra.mxu3 %v4767_v35  ;;  %v3528_v31 = vsel %vm825_vm0, %v3516_v30, 0  ;;  %v4801_v35 = vld [vmem:[%s6561_s18 + $0x30] sm:$0xff] }
 0x507   : > { %v2787_v38 = vpop.f32.mrf.mxu0  ;;  %v2825_v40 = vpop.f32.mrf.mxu1 }
 0x508   : > { %v2844_v41 = vmax.f32 %v2787_v38, %v2825_v40  ;;  %v4758_v38 = vld [vmem:[%s6589_s26 + $0x8] sm:$0xff] }
 0x509   : > { %v4766_v40 = vld [vmem:[%s6589_s26 + $0x48] sm:$0xff]  ;;  %3142 = vmatpush.bf16.msra.mxu1 %v4758_v38 }
 0x50a   : > { %3155 = vmatpush.bf16.msra.mxu3 %v4766_v40  ;;  %v4800_v38 = vld [vmem:[%s6561_s18 + $0x28] sm:$0xff]  ;;  %v4799_v40 = vld [vmem:[%s6561_s18 + $0x20] sm:$0xff] }
 0x50f   : > { %v2789_v43 = vpop.f32.mrf.mxu0  ;;  %v2827_v34 = vpop.f32.mrf.mxu1 }
 0x510   : > { %v2846_v44 = vmax.f32 %v2789_v43, %v2827_v34  ;;  %v4765_v43 = vld [vmem:[%s6589_s26 + $0x40] sm:$0xff] }
 0x511   : > { %3156 = vmatpush.bf16.msra.mxu3 %v4765_v43 }
 0x512   : > { %v4847_v46 = vpack.i.bf16 %v2846_v44, %v2844_v41 }
 0x514   : > { %4848 = vrot.lane.b32.xlu0 %v4847_v46, %s6588_s0 }
 0x52f   : > { %v2801_v3 = vpop.f32.mrf.mxu2  ;;  %v2839_v5 = vpop.f32.mrf.mxu3 }
 0x530   : > { %v2845_v23 = vmax.f32 %v2801_v3, %v2839_v5 }
 0x537   : > { %v2803_v0 = vpop.f32.mrf.mxu2  ;;  %v2841_v63 = vpop.f32.mrf.mxu3 }
 0x538   : > { %v2847_v1 = vmax.f32 %v2803_v0, %v2841_v63  ;;  %v3164_v63 = vld [vmem:[%s6554_s11] sm:$0x3] }
 0x53a   : > { %v4842_v19 = vpack.i.bf16 %v2847_v1, %v2845_v23 }
 0x53c   : > { %4843 = vrot.lane.b32.xlu2 %v4842_v19, %s6588_s0  ;;  %s4866_s0 = smov 32   ;;  %v4777_v19 = vld [vmem:[%s6558_s15 + $0x28] sm:$0xff] }
 0x586   : > { %v4849_v60 = vpop.permute.xlu0 %4848 }
 0x587   : > { %v4851_v6 = vunpack.i.h.bf16 %v4849_v60  ;;  %v4850_v22 = vunpack.i.l.bf16 %v4849_v60 }
 0x596   : > { %v4844_v47 = vpop.permute.xlu2 %4843 }
 0x597   : > { %v4846_v4 = vunpack.i.h.bf16 %v4844_v47  ;;  %v4845_v7 = vunpack.i.l.bf16 %v4844_v47  ;;  %v4773_v47 = vld [vmem:[%s6558_s15 + $0x8] sm:$0xff] }
 0x599   : > { %v2869_v51 = vmax.f32 %v2847_v1, %v4846_v4  ;;  %v2867_v9 = vmax.f32 %v2845_v23, %v4845_v7  ;;  %v2861_v10 = vsel %vm1632_vm12, %v4851_v6, %v4846_v4  ;;  %v2860_v11 = vsel %vm1632_vm12, %v4850_v22, %v4845_v7  ;;  %v3185_v23 = vld [vmem:[%s6555_s12] sm:$0x3]  ;;  %v4778_v1 = vld [vmem:[%s6558_s15 + $0x30] sm:$0xff] }
 0x59a   : > { %v2868_v62 = vmax.f32 %v2846_v44, %v2861_v10  ;;  %v2866_v39 = vmax.f32 %v2844_v41, %v2860_v11  ;;  %v4757_v41 = vld [vmem:[%s6589_s26] sm:$0xff] }
 0x59b   : > { %v2871_v21 = vpack.c.bf16 %v2869_v51, %v2867_v9  ;;  %3143 = vmatpush.bf16.msra.mxu1 %v4757_v41  ;;  %v4772_v51 = vld [vmem:[%s6558_s15] sm:$0xff] }
 0x59c   : > { %v2870_v16 = vpack.c.bf16 %v2868_v62, %v2866_v39 }
 0x59d   : > { %4381 = vmatmul.msk.bf16.vlgmr.msra.gmra.mxu2 %vm2948_vm13, %v2871_v21 }
 0x59e   : > { %2963 = vmatmul.bf16.vlgmr.msra.gmra.mxu0 %v2870_v16 }
 0x61b   : > { %v2964_v61 = vpop.f32.mrf.mxu0 }
 0x620   : > { %v2978_v12 = vpop.f32.mrf.mxu2 }
 0x621   : > { %v2979_v14 = vadd.f32 %v2978_v12, %v2964_v61  ;;  %v4786_v12 = vld [vmem:[%s6559_s16 + $0x38] sm:$0xff] }
 0x622   : > { %3435 = vmatpush.bf16.msrb.mxu3 %v4786_v12 }
 0x623   : > { %2984 = vst.msk [vmem:[#allocation5] sm:$0xff] %vm2983_vm14, %v2979_v14  ;;  %v2966_v2 = vpop.f32.mrf.mxu0  ;;  %v2987_v49 = vrot.slane %v2979_v14, 1  ;;  %v2997_v20 = vrot.slane %v2979_v14, 2  ;;  %v4794_v14 = vld [vmem:[%s6559_s16 + $0x78] sm:$0xff] }
 0x624   : > { %3448 = vmatpush.bf16.msrb.mxu1 %v4794_v14 }
 0x628   : > { %v2980_v13 = vpop.f32.mrf.mxu2 }
 0x629   : > { %v2981_v17 = vadd.f32 %v2980_v13, %v2966_v2  ;;  %v4785_v2 = vld [vmem:[%s6559_s16 + $0x30] sm:$0xff] }
 0x62a   : > { %v4793_v13 = vld [vmem:[%s6559_s16 + $0x70] sm:$0xff]  ;;  %3436 = vmatpush.bf16.msrb.mxu3 %v4785_v2 }
 0x62b   : > { %v2988_v37 = vrot.slane %v2981_v17, 1  ;;  %v2998_v36 = vrot.slane %v2981_v17, 2  ;;  %3449 = vmatpush.bf16.msrb.mxu1 %v4793_v13  ;;  %v4784_v17 = vld [vmem:[%s6559_s16 + $0x28] sm:$0xff] }
 0x62d   : > { %v2999_v15 = vsel %vm741_vm2, %v2997_v20, %v2998_v36  ;;  %v2989_v45 = vsel %vm703_vm3, %v2987_v49, %v2988_v37  ;;  %vm2993_vm2 = vcmask 1048192   ;;  %vm2995_vm3 = vcmask 261120   ;;  %v4792_v49 = vld [vmem:[%s6559_s16 + $0x68] sm:$0xff]  ;;  %v4783_v20 = vld [vmem:[%s6559_s16 + $0x20] sm:$0xff]  ;;  %v4782_v36 = vld [vmem:[%s6559_s16 + $0x18] sm:$0xff] }
 0x62e   : > { %3000 = vrot.lane.b32.xlu2 %v2999_v15, %s4866_s0  ;;  %2990 = vrot.lane.b32.xlu1 %v2989_v45, %s4867_s23  ;;  %s4868_s23 = smov 112   ;;  %v4791_v37 = vld [vmem:[%s6559_s16 + $0x60] sm:$0xff]  ;;  %v4790_v15 = vld [vmem:[%s6559_s16 + $0x58] sm:$0xff] }
 0x62f   : > { %3437 = vmatpush.bf16.msrb.mxu3 %v4784_v17  ;;  %3450 = vmatpush.bf16.msrb.mxu1 %v4792_v49  ;;  %v4781_v45 = vld [vmem:[%s6559_s16 + $0x10] sm:$0xff] }
 0x633   : > { %3438 = vmatpush.bf16.msrb.mxu3 %v4783_v20  ;;  %3451 = vmatpush.bf16.msrb.mxu1 %v4791_v37 }
 0x637   : > { %3439 = vmatpush.bf16.msrb.mxu3 %v4782_v36  ;;  %3452 = vmatpush.bf16.msrb.mxu1 %v4790_v15 }
 0x63b   : > { %3440 = vmatpush.bf16.msrb.mxu3 %v4781_v45  ;;  %3453 = vmatpush.bf16.msrb.mxu1 %v4789_v33 }
 0x63f   : > { %3441 = vmatpush.bf16.msrb.mxu3 %v4780_v32  ;;  %3454 = vmatpush.bf16.msrb.mxu1 %v4788_v24 }
 0x643   : > { %3442 = vmatpush.bf16.msrb.mxu3 %v4779_v25  ;;  %3455 = vmatpush.bf16.msrb.mxu1 %v4787_v26 }
 0x688   : > { %v3001_v44 = vpop.permute.xlu2 %3000 }
 0x6a0   : > { %v2991_v34 = vpop.permute.xlu1 %2990 }
 0x6a1   : > { %2994 = vst.msk [vmem:[#allocation5] sm:$0xff] %vm2993_vm2, %v2991_v34 }
 0x6a2   : > { %2996 = vst.msk [vmem:[#allocation5 + $0x8] sm:$0xff] %vm2995_vm3, %v2991_v34 }
 0x6a3   : > { %3004 = vst.msk [vmem:[#allocation5 + $0x8] sm:$0xff] %vm3003_vm6, %v3001_v44 }
 0x6a8   : > { %v3005_v46 = vld [vmem:[#allocation5] sm:$0xff] }
 0x6a9   : > { %v3007_v48 = vpack.c.bf16 %v3005_v46, %v3005_v46 }
 0x6aa   : > { %v3006_v50 = vld [vmem:[#allocation5 + $0x8] sm:$0xff] }
 0x6ab   : > { %3144 = vmatmul.bf16.vlgmr.msra.gmra.mxu1 %v3007_v48  ;;  %v3008_v52 = vpack.c.bf16 %v3006_v50, %v3006_v50  ;;  %v4798_v50 = vld [vmem:[%s6561_s18 + $0x18] sm:$0xff] }
 0x6ad   : > { %4442 = vmatmul.msk.bf16.vlgmr.msra.gmra.mxu3 %vm1189_vm9, %v3008_v52  ;;  %v4797_v52 = vld [vmem:[%s6561_s18 + $0x10] sm:$0xff] }
 0x728   : > { %v3145_v53 = vpop.f32.mrf.mxu1 }
 0x729   : > { %v3146_v54 = vadd.f32 %v4852_v42, %v3145_v53  ;;  %v4796_v53 = vld [vmem:[%s6561_s18 + $0x8] sm:$0xff]  ;;  %v4795_v42 = vld [vmem:[%s6561_s18] sm:$0xff] }
 0x730   : > { %v3158_v55 = vpop.f32.mrf.mxu3  ;;  %v3147_v56 = vpop.f32.mrf.mxu1 }
 0x731   : > { %v3159_v8 = vadd.f32 %v3158_v55, %v3146_v54  ;;  %v4804_v54 = vld [vmem:[%s6563_s20 + $0x10] sm:$0xff]  ;;  %v3338_v56 = vld [vmem:[%s6560_s17] sm:$0x1] }
 0x733   : > { %v3162_v57 = vmax.f32 %v3159_v8, 0.0 }
 0x735   : > { %v3163_v3 = vpack.c.bf16 %v3162_v57, %v3162_v57 }
 0x737   : > { %v3170_v5 = vsel %vm825_vm0, %v3163_v3, 0 }
 0x738   : > { %v3160_v0 = vpop.f32.mrf.mxu3  ;;  %3179 = vmatpush.bf16.msrb.mxu2 %v3170_v5  ;;  %3196 = vmatpush.bf16.msrb.mxu0 %v3170_v5 }
 0x73b   : > { %4443 = vmatmul.msk.bf16.vlgmr.msrb.gmra.mxu2 %vm3165_vm10, %v3164_v63  ;;  %4444 = vmatmul.msk.bf16.vlgmr.msrb.gmra.mxu0 %vm3165_vm10, %v3185_v23 }
 0x73c   : > { %3269 = vmatpush.bf16.msra.mxu2 %v4778_v1  ;;  %3530 = vmatpush.bf16.msra.mxu0 %v3528_v31  ;;  %v4803_v1 = vld [vmem:[%s6563_s20 + $0x8] sm:$0xff] }
 0x740   : > { %3270 = vmatpush.bf16.msra.mxu2 %v4777_v19  ;;  %3531 = vmatpush.bf16.msra.mxu0 %v4801_v35  ;;  %v4802_v19 = vld [vmem:[%s6563_s20] sm:$0xff] }
 0x744   : > { %3271 = vmatpush.bf16.msra.mxu2 %v4776_v58  ;;  %3532 = vmatpush.bf16.msra.mxu0 %v4800_v38  ;;  %v3478_v58 = vld [vmem:[%s6562_s19] sm:$0x1] }
 0x748   : > { %3272 = vmatpush.bf16.msra.mxu2 %v4775_v18  ;;  %3533 = vmatpush.bf16.msra.mxu0 %v4799_v40 }
 0x74c   : > { %3273 = vmatpush.bf16.msra.mxu2 %v4774_v59  ;;  %3534 = vmatpush.bf16.msra.mxu0 %v4798_v50 }
 0x750   : > { %3274 = vmatpush.bf16.msra.mxu2 %v4773_v47  ;;  %3535 = vmatpush.bf16.msra.mxu0 %v4797_v52 }
 0x754   : > { %3275 = vmatpush.bf16.msra.mxu2 %v4772_v51  ;;  %3536 = vmatpush.bf16.msra.mxu0 %v4796_v53 }
 0x758   : > { %3537 = vmatpush.bf16.msra.mxu0 %v4795_v42  ;;  %3578 = vmatpush.bf16.msrb.mxu2 %v4804_v54 }
 0x75c   : > { %3579 = vmatpush.bf16.msrb.mxu2 %v4803_v1 }
 0x760   : > { %3580 = vmatpush.bf16.msrb.mxu2 %v4802_v19 }
 0x7b8   : > { %v3198_v60 = vpop.f32.mrf.mxu0 }
 0x7be   : > { %v3181_v4 = vpop.f32.mrf.mxu2 }
 0x7bf   : > { %v3202_v7 = vmax.f32 %v3181_v4, %v3198_v60 }
 0x7c0   : > { %v3200_v6 = vpop.f32.mrf.mxu0 }
 0x7c1   : > { %3204 = vrot.lane.b32.xlu0 %v3202_v7, %s4868_s23 }
 0x7c6   : > { %v3183_v22 = vpop.f32.mrf.mxu2 }
 0x833   : > { %v3205_v9 = vpop.permute.xlu0 %3204 }
 0x834   : > { %v3207_v10 = vmax.f32 %v3202_v7, %v3205_v9  ;;  %v3551_v7 = vld [vmem:[%s6564_s21] sm:$0x1] }
 0x836   : > { %v3208_v11 = vpack.c.bf16 %v3207_v10, %v3207_v10 }
 0x838   : > { %4473 = vmatmul.msk.bf16.vlgmr.msra.gmra.mxu2 %vm1189_vm9, %v3208_v11  ;;  %vm3288_vm9 = vcmask 1040896  }
 0x8bb   : > { %v3277_v62 = vpop.f32.mrf.mxu2 }
 0x8bc   : > { %v3290_v39 = vrot.slane %v3277_v62, 2  ;;  %v3293_v21 = vrot.slane %v3277_v62, 3  ;;  %v3284_v16 = vrot.slane %v3277_v62, 1  ;;  %3282 = vst.msk [vmem:[#allocation6] sm:$0x1] %vm3281_vm15, %v3277_v62 }
 0x8be   : > { %3294 = vrot.lane.b32.xlu2 %v3293_v21, %s6591_s27  ;;  %3285 = vrot.lane.b32.xlu1 %v3284_v16, %s6591_s27  ;;  %3292 = vst.msk [vmem:[#allocation6 + $0x8] sm:$0x1] %vm3281_vm15, %v3290_v39 }
 0x8c3   : > { %v3279_v61 = vpop.f32.mrf.mxu2 }
 0x918   : > { %v3295_v27 = vpop.permute.xlu2 %3294 }
 0x919   : > { %3297 = vst.msk [vmem:[#allocation6 + $0x8] sm:$0x1] %vm3288_vm9, %v3295_v27 }
 0x930   : > { %v3286_v41 = vpop.permute.xlu1 %3285 }
 0x931   : > { %3289 = vst.msk [vmem:[#allocation6] sm:$0x1] %vm3288_vm9, %v3286_v41 }
 0x938   : > { %v3298_v43 = vld [vmem:[#allocation6] ss:$8 sm:$0x3] }
 0x939   : > { %v3300_v34 = vperm.slane %v3298_v43, 0  ;;  %v3301_v44 = vperm.slane %v3298_v43, 1 }
 0x93b   : > { %v3304_v46 = vpack.c.bf16 %v3300_v34, %v3300_v34  ;;  %v3305_v48 = vpack.c.bf16 %v3301_v44, %v3301_v44 }
 0x93d   : > { %3443 = vmatmul.bf16.vlgmr.msrb.gmra.mxu3 %v3304_v46  ;;  %3456 = vmatmul.bf16.vlgmr.msrb.gmra.mxu1 %v3305_v48 }
 0x9ba   : > { %v3457_v55 = vpop.f32.mrf.mxu1 }
 0x9c0   : > { %v3444_v8 = vpop.f32.mrf.mxu3 }
 0x9c1   : > { %v3445_v57 = vadd.f32 %v3444_v8, %v3338_v56 }
 0x9c2   : > { %v3459_v3 = vpop.f32.mrf.mxu1 }
 0x9c3   : > { %v3458_v5 = vadd.f32 %v3457_v55, %v3445_v57 }
 0x9c5   : > { %v3461_v0 = vmax.f32 %v3458_v5, 0.0 }
 0x9c7   : > { %v3462_v63 = vpack.c.bf16 %v3461_v0, %v3461_v0 }
 0x9c8   : > { %v3446_v23 = vpop.f32.mrf.mxu3 }
 0x9c9   : > { %4566 = vmatmul.msk.bf16.vlgmr.msra.gmra.mxu0 %vm1632_vm12, %v3462_v63 }
 0xa46   : > { %v3539_v18 = vpop.f32.mrf.mxu0 }
 0xa47   : > { %v3540_v59 = vadd.f32 %v3539_v18, %v3478_v58 }
 0xa49   : > { %v3543_v60 = vmax.f32 %v3540_v59, 0.0 }
 0xa4b   : > { %v3544_v47 = vpack.c.bf16 %v3543_v60, %v3543_v60 }
 0xa4d   : > { %4579 = vmatmul.msk.bf16.vlgmr.msrb.gmra.mxu2 %vm689_vm4, %v3544_v47 }
 0xa4e   : > { %v3541_v4 = vpop.f32.mrf.mxu0 }
 0xad0   : > { %v3582_v6 = vpop.f32.mrf.mxu2 }
 0xad1   : > { %v3583_v22 = vadd.f32 %v3582_v6, %v3551_v7 }
 0xad3   : > { %v3586_v51 = vperm.slane %v3583_v22, 0 }
 0xad5   : > { %3587 = vst [vmem:[%s681_s4] sm:$0xff] %v3586_v51 }
 0xad8   : > { %v3584_v9 = vpop.f32.mrf.mxu2 }
 0xad9 PF: > { %s32_s3 = sadd.s32 1, %s4859_s3  }
 0xada   : > { %p29_p4 = scmp.ge.s32.totalorder %s32_s3, 4  }
 0xadc   :  { %31 = sbr.rel (!%p29_p4) target bundleno = 8 (0x8), region = 138 }

</bundles_post_ra>
